<compile_context>
chip_gen: v5e
topology: v5e:2x2
jax: 0.10.0
libtpu: 0.0.40
codegen_flags: <defaults>
</compile_context>

<pallas_src>
import jax
import jax.numpy as jnp
from jax.experimental import pallas as pl
from jax.experimental.pallas import tpu as pltpu


# ---- model dims (from the PyTorch module) ----
D_IN = 100            # latent dim
D_HIDDEN = (256, 512, 1024)
D_OUT = 784           # 28 * 28

# ---- lane-aligned padded input dim used inside the kernel ----
D_IN_PAD = 128        # 100 -> 128 (zero-padded K of the first matmul)

_MAX_TILE_B = 512     # amortizes the ~0.35us/grid-step overhead; ~15 MiB VMEM


def _round_up(n, m):
    return (n + m - 1) // m * m


def _choose_tiling(batch):
    """Pad the batch to a multiple of 16 (bf16 min tile sublanes) and pick the
    largest tile <= _MAX_TILE_B that keeps padding small.  No forced multi-step
    split: smaller tiles only shrink MXU row occupancy and add grid steps on
    single-TensorCore chips."""
    bp = _round_up(batch, 16)
    n_tiles = max(1, -(-bp // _MAX_TILE_B))
    tile = _round_up(-(-bp // n_tiles), 16)
    return n_tiles * tile, tile


def _generator_kernel(x_ref,
                      w1_ref, b1_ref,
                      w2_ref, b2_ref,
                      w3_ref, b3_ref,
                      w4_ref, b4_ref,
                      o_ref):
    # Fully fused 4-layer MLP: bf16 operands feed the MXU, accumulation and
    # bias adds stay f32, ReLU on the VPU, tanh on the EUP.
    h = jnp.dot(x_ref[...], w1_ref[...],
                preferred_element_type=jnp.float32) + b1_ref[...]
    h = jnp.maximum(h, 0.0)
    h = jnp.dot(h.astype(jnp.bfloat16), w2_ref[...],
                preferred_element_type=jnp.float32) + b2_ref[...]
    h = jnp.maximum(h, 0.0)
    h = jnp.dot(h.astype(jnp.bfloat16), w3_ref[...],
                preferred_element_type=jnp.float32) + b3_ref[...]
    h = jnp.maximum(h, 0.0)
    h = jnp.dot(h.astype(jnp.bfloat16), w4_ref[...],
                preferred_element_type=jnp.float32) + b4_ref[...]
    o_ref[...] = jnp.tanh(h)


def prepare_params(params):
    """Pad w1's K to 128 and cast weights to bf16.  Done once, outside the
    per-call path.  params: list of (w:(din,dout) f32, b:(1,dout) f32)."""
    (w1, b1), (w2, b2), (w3, b3), (w4, b4) = params
    # Zero-pad w1's K rows (x is zero-padded on the matching columns).
    w1p = jnp.zeros((D_IN_PAD, w1.shape[1]), jnp.float32).at[:D_IN, :].set(w1)
    bf16 = lambda w: w.astype(jnp.bfloat16)
    return ((bf16(w1p), b1), (bf16(w2), b2), (bf16(w3), b3), (bf16(w4), b4))


@jax.jit
def generator_forward(x, prepared_params):
    """x: (B, 100) float32.  Returns (B, 1, 28, 28) float32."""
    (w1, b1), (w2, b2), (w3, b3), (w4, b4) = prepared_params
    B = x.shape[0]
    Bp, tile_b = _choose_tiling(B)

    # Pad batch (zero rows) and latent dim (zero cols); activations in bf16.
    xp = jnp.zeros((Bp, D_IN_PAD), jnp.bfloat16)
    xp = xp.at[:B, :D_IN].set(x.astype(jnp.bfloat16))

    # Weights/biases: full block, constant index -> DMAed once, held resident;
    # Buffered(1) avoids a pointless second buffer for never-changing blocks.
    resident = lambda a: pl.BlockSpec(a.shape, lambda i: (0, 0),
                                      pipeline_mode=pl.Buffered(1))

    out_flat = pl.pallas_call(
        _generator_kernel,
        out_shape=jax.ShapeDtypeStruct((Bp, D_OUT), jnp.float32),
        grid_spec=pltpu.PrefetchScalarGridSpec(
            num_scalar_prefetch=0,
            grid=(Bp // tile_b,),
            in_specs=[
                pl.BlockSpec((tile_b, D_IN_PAD), lambda i: (i, 0)),  # x tile
                resident(w1), resident(b1),
                resident(w2), resident(b2),
                resident(w3), resident(b3),
                resident(w4), resident(b4),
            ],
            # Last dim = full array dim (784): 6 dense 128-lane groups + one
            # masked tail store; avoids a second HBM depad pass.
            out_specs=pl.BlockSpec((tile_b, D_OUT), lambda i: (i, 0)),
        ),
        compiler_params=pltpu.CompilerParams(
            dimension_semantics=("parallel",),      # batch axis
            vmem_limit_bytes=32 * 1024 * 1024,      # ~2x actual footprint
        ),
    )(xp, w1, b1, w2, b2, w3, b3, w4, b4)

    # Drop batch padding and reshape like `output.view(B, 1, 28, 28)`.
    return out_flat[:B].reshape(B, 1, 28, 28)


def init_params(key):
    """Deterministic init matching the nn.Linear shapes of the module
    (weights stored transposed as (in, out); biases as (1, out))."""
    dims = [D_IN, *D_HIDDEN, D_OUT]
    params = []
    for li, (din, dout) in enumerate(zip(dims[:-1], dims[1:])):
        kw, kb = jax.random.split(jax.random.fold_in(key, li))
        scale = 1.0 / jnp.sqrt(jnp.float32(din))  # PyTorch-style uniform bound
        w = jax.random.uniform(kw, (din, dout), jnp.float32, -scale, scale)
        b = jax.random.uniform(kb, (1, dout), jnp.float32, -scale, scale)
        params.append((w, b))
    return params


def _reference_forward(x, params, mirror_bf16=False):
    """Pure-JAX reference. mirror_bf16=True mimics the kernel's bf16 operand /
    f32-accumulate path for a tight numerical comparison."""
    h = x
    for i, (w, b) in enumerate(params):
        if mirror_bf16:
            h = jnp.dot(h.astype(jnp.bfloat16), w.astype(jnp.bfloat16),
                        preferred_element_type=jnp.float32) + b
        else:
            h = h @ w + b
        if i < 3:
            h = jnp.maximum(h, 0.0)
    h = jnp.tanh(h)
    return h.reshape(x.shape[0], 1, 28, 28)


if __name__ == "__main__":
    key = jax.random.PRNGKey(0)
    k_x, k_p = jax.random.split(key)

    B = 8  # small, non-16-aligned batch: exercises the batch pad-and-slice path
    x = jax.random.normal(k_x, (B, D_IN), dtype=jnp.float32)
    params = init_params(k_p)
    prepared = prepare_params(params)

    out = generator_forward(x, prepared)
    out = jax.block_until_ready(out)
    assert out.shape == (B, 1, 28, 28), out.shape

    # Tight check vs a reference mirroring the kernel's bf16-weight math.
    ref_bf16 = _reference_forward(x, params, mirror_bf16=True)
    err_bf16 = float(jnp.max(jnp.abs(out - ref_bf16)))
    assert jnp.allclose(out, ref_bf16, atol=2e-4, rtol=2e-4), err_bf16

    # Loose check vs the exact f32 module semantics (bf16 quantization only).
    ref_f32 = _reference_forward(x, params, mirror_bf16=False)
    err_f32 = float(jnp.max(jnp.abs(out - ref_f32)))
    assert err_f32 < 2e-2, err_f32

    print("KERNEL_OK")
</pallas_src>

<mosaic_0001>
module attributes {stable_mosaic.version = 11 : i64} {
  func.func @_generator_kernel(%arg0: i32, %arg1: memref<16x128xbf16, #tpu.memory_space<vmem>>, %arg2: memref<128x256xbf16, #tpu.memory_space<vmem>>, %arg3: memref<1x256xf32, #tpu.memory_space<vmem>>, %arg4: memref<256x512xbf16, #tpu.memory_space<vmem>>, %arg5: memref<1x512xf32, #tpu.memory_space<vmem>>, %arg6: memref<512x1024xbf16, #tpu.memory_space<vmem>>, %arg7: memref<1x1024xf32, #tpu.memory_space<vmem>>, %arg8: memref<1024x784xbf16, #tpu.memory_space<vmem>>, %arg9: memref<1x784xf32, #tpu.memory_space<vmem>>, %arg10: memref<16x784xf32, #tpu.memory_space<vmem>>) attributes {dimension_semantics = [#tpu.dimension_semantics<parallel>], iteration_bounds = array<i64: 1>, scalar_prefetch = 0 : i64, scratch_operands = 0 : i64, tpu.core_type = #tpu.core_type<tc>, window_params = [{transform_indices = @transform_0, window_bounds = array<i64: 16, 128>}, {pipeline_mode = #tpu.pipeline_mode<synchronous>, transform_indices = @transform_1, window_bounds = array<i64: 128, 256>}, {pipeline_mode = #tpu.pipeline_mode<synchronous>, transform_indices = @transform_2, window_bounds = array<i64: 1, 256>}, {pipeline_mode = #tpu.pipeline_mode<synchronous>, transform_indices = @transform_3, window_bounds = array<i64: 256, 512>}, {pipeline_mode = #tpu.pipeline_mode<synchronous>, transform_indices = @transform_4, window_bounds = array<i64: 1, 512>}, {pipeline_mode = #tpu.pipeline_mode<synchronous>, transform_indices = @transform_5, window_bounds = array<i64: 512, 1024>}, {pipeline_mode = #tpu.pipeline_mode<synchronous>, transform_indices = @transform_6, window_bounds = array<i64: 1, 1024>}, {pipeline_mode = #tpu.pipeline_mode<synchronous>, transform_indices = @transform_7, window_bounds = array<i64: 1024, 784>}, {pipeline_mode = #tpu.pipeline_mode<synchronous>, transform_indices = @transform_8, window_bounds = array<i64: 1, 784>}, {transform_indices = @transform_9, window_bounds = array<i64: 16, 784>}]} {
    %c0 = arith.constant 0 : index
    %c0_0 = arith.constant 0 : index
    %0 = vector.load %arg1[%c0, %c0_0] : memref<16x128xbf16, #tpu.memory_space<vmem>>, vector<16x128xbf16>
    %c0_1 = arith.constant 0 : index
    %c0_2 = arith.constant 0 : index
    %1 = vector.load %arg2[%c0_1, %c0_2] : memref<128x256xbf16, #tpu.memory_space<vmem>>, vector<128x256xbf16>
    %cst = arith.constant dense<0.000000e+00> : vector<16x256xf32>
    %2 = tpu.matmul %0, %1, %cst {dimension_numbers = #tpu.dot_dimension_numbers<[1], [0], [0], [1], [0, 0, 1, 1], [], []>} : vector<16x128xbf16>, vector<128x256xbf16>, vector<16x256xf32> -> vector<16x256xf32>
    %c0_3 = arith.constant 0 : index
    %c0_4 = arith.constant 0 : index
    %3 = vector.load %arg3[%c0_3, %c0_4] : memref<1x256xf32, #tpu.memory_space<vmem>>, vector<1x256xf32>
    %4 = vector.broadcast %3 : vector<1x256xf32> to vector<16x256xf32>
    %5 = arith.addf %2, %4 : vector<16x256xf32>
    %cst_5 = arith.constant 0.000000e+00 : f32
    %6 = vector.broadcast %cst_5 : f32 to vector<16x256xf32>
    %7 = arith.maximumf %5, %6 : vector<16x256xf32>
    %8 = arith.truncf %7 : vector<16x256xf32> to vector<16x256xbf16>
    %c0_6 = arith.constant 0 : index
    %c0_7 = arith.constant 0 : index
    %9 = vector.load %arg4[%c0_6, %c0_7] : memref<256x512xbf16, #tpu.memory_space<vmem>>, vector<256x512xbf16>
    %cst_8 = arith.constant dense<0.000000e+00> : vector<16x512xf32>
    %10 = tpu.matmul %8, %9, %cst_8 {dimension_numbers = #tpu.dot_dimension_numbers<[1], [0], [0], [1], [0, 0, 1, 1], [], []>} : vector<16x256xbf16>, vector<256x512xbf16>, vector<16x512xf32> -> vector<16x512xf32>
    %c0_9 = arith.constant 0 : index
    %c0_10 = arith.constant 0 : index
    %11 = vector.load %arg5[%c0_9, %c0_10] : memref<1x512xf32, #tpu.memory_space<vmem>>, vector<1x512xf32>
    %12 = vector.broadcast %11 : vector<1x512xf32> to vector<16x512xf32>
    %13 = arith.addf %10, %12 : vector<16x512xf32>
    %cst_11 = arith.constant 0.000000e+00 : f32
    %14 = vector.broadcast %cst_11 : f32 to vector<16x512xf32>
    %15 = arith.maximumf %13, %14 : vector<16x512xf32>
    %16 = arith.truncf %15 : vector<16x512xf32> to vector<16x512xbf16>
    %c0_12 = arith.constant 0 : index
    %c0_13 = arith.constant 0 : index
    %17 = vector.load %arg6[%c0_12, %c0_13] : memref<512x1024xbf16, #tpu.memory_space<vmem>>, vector<512x1024xbf16>
    %cst_14 = arith.constant dense<0.000000e+00> : vector<16x1024xf32>
    %18 = tpu.matmul %16, %17, %cst_14 {dimension_numbers = #tpu.dot_dimension_numbers<[1], [0], [0], [1], [0, 0, 1, 1], [], []>} : vector<16x512xbf16>, vector<512x1024xbf16>, vector<16x1024xf32> -> vector<16x1024xf32>
    %c0_15 = arith.constant 0 : index
    %c0_16 = arith.constant 0 : index
    %19 = vector.load %arg7[%c0_15, %c0_16] : memref<1x1024xf32, #tpu.memory_space<vmem>>, vector<1x1024xf32>
    %20 = vector.broadcast %19 : vector<1x1024xf32> to vector<16x1024xf32>
    %21 = arith.addf %18, %20 : vector<16x1024xf32>
    %cst_17 = arith.constant 0.000000e+00 : f32
    %22 = vector.broadcast %cst_17 : f32 to vector<16x1024xf32>
    %23 = arith.maximumf %21, %22 : vector<16x1024xf32>
    %24 = arith.truncf %23 : vector<16x1024xf32> to vector<16x1024xbf16>
    %c0_18 = arith.constant 0 : index
    %c0_19 = arith.constant 0 : index
    %25 = vector.load %arg8[%c0_18, %c0_19] : memref<1024x784xbf16, #tpu.memory_space<vmem>>, vector<1024x784xbf16>
    %cst_20 = arith.constant dense<0.000000e+00> : vector<16x784xf32>
    %26 = tpu.matmul %24, %25, %cst_20 {dimension_numbers = #tpu.dot_dimension_numbers<[1], [0], [0], [1], [0, 0, 1, 1], [], []>} : vector<16x1024xbf16>, vector<1024x784xbf16>, vector<16x784xf32> -> vector<16x784xf32>
    %c0_21 = arith.constant 0 : index
    %c0_22 = arith.constant 0 : index
    %27 = vector.load %arg9[%c0_21, %c0_22] : memref<1x784xf32, #tpu.memory_space<vmem>>, vector<1x784xf32>
    %28 = vector.broadcast %27 : vector<1x784xf32> to vector<16x784xf32>
    %29 = arith.addf %26, %28 : vector<16x784xf32>
    %30 = math.tanh %29 : vector<16x784xf32>
    %c0_23 = arith.constant 0 : index
    %c0_24 = arith.constant 0 : index
    %31 = vector.load %arg10[%c0_23, %c0_24] : memref<16x784xf32, #tpu.memory_space<vmem>>, vector<16x784xf32>
    tpu.vector_store %arg10[%c0_23, %c0_24], %30 {strides = array<i32>} : memref<16x784xf32, #tpu.memory_space<vmem>>, vector<16x784xf32>,
    return
  }
  func.func @transform_0(%arg0: i32) -> (i32, i32) {
    %c0_i32 = arith.constant 0 : i32
    %c0_i32_0 = arith.constant 0 : i32
    return %arg0, %c0_i32 : i32, i32
  }
  func.func @transform_1(%arg0: i32) -> (i32, i32) {
    %c0_i32 = arith.constant 0 : i32
    %c0_i32_0 = arith.constant 0 : i32
    %c0_i32_1 = arith.constant 0 : i32
    return %c0_i32, %c0_i32_0 : i32, i32
  }
  func.func @transform_2(%arg0: i32) -> (i32, i32) {
    %c0_i32 = arith.constant 0 : i32
    %c0_i32_0 = arith.constant 0 : i32
    %c0_i32_1 = arith.constant 0 : i32
    return %c0_i32, %c0_i32_0 : i32, i32
  }
  func.func @transform_3(%arg0: i32) -> (i32, i32) {
    %c0_i32 = arith.constant 0 : i32
    %c0_i32_0 = arith.constant 0 : i32
    %c0_i32_1 = arith.constant 0 : i32
    return %c0_i32, %c0_i32_0 : i32, i32
  }
  func.func @transform_4(%arg0: i32) -> (i32, i32) {
    %c0_i32 = arith.constant 0 : i32
    %c0_i32_0 = arith.constant 0 : i32
    %c0_i32_1 = arith.constant 0 : i32
    return %c0_i32, %c0_i32_0 : i32, i32
  }
  func.func @transform_5(%arg0: i32) -> (i32, i32) {
    %c0_i32 = arith.constant 0 : i32
    %c0_i32_0 = arith.constant 0 : i32
    %c0_i32_1 = arith.constant 0 : i32
    return %c0_i32, %c0_i32_0 : i32, i32
  }
  func.func @transform_6(%arg0: i32) -> (i32, i32) {
    %c0_i32 = arith.constant 0 : i32
    %c0_i32_0 = arith.constant 0 : i32
    %c0_i32_1 = arith.constant 0 : i32
    return %c0_i32, %c0_i32_0 : i32, i32
  }
  func.func @transform_7(%arg0: i32) -> (i32, i32) {
    %c0_i32 = arith.constant 0 : i32
    %c0_i32_0 = arith.constant 0 : i32
    %c0_i32_1 = arith.constant 0 : i32
    return %c0_i32, %c0_i32_0 : i32, i32
  }
  func.func @transform_8(%arg0: i32) -> (i32, i32) {
    %c0_i32 = arith.constant 0 : i32
    %c0_i32_0 = arith.constant 0 : i32
    %c0_i32_1 = arith.constant 0 : i32
    return %c0_i32, %c0_i32_0 : i32, i32
  }
  func.func @transform_9(%arg0: i32) -> (i32, i32) {
    %c0_i32 = arith.constant 0 : i32
    %c0_i32_0 = arith.constant 0 : i32
    return %arg0, %c0_i32 : i32, i32
  }
}

</mosaic_0001>

<bundles_post_ra>
// kernel: generator_forward.1
= control target key start
LH: loop header
LB: loop body
LE: loop exit
PB: predicated region body
PF: predicated region fallthrough
CT: control target
= control target key end

     0   :  { %vm6356_vm0 = vcmask 130048   ;;  %s15417_s1 = inlined_call_operand.vmem [shape: bf16[128,256], index: 1, kind: input, shape index: {}]   ;;  %s15418_s3 = inlined_call_operand.vmem [shape: bf16[256,512], index: 3, kind: input, shape index: {}]   ;;  %s15419_s0 = inlined_call_operand.vmem [shape: bf16[16,128], index: 0, kind: input, shape index: {}]   ;;  %s15420_s2 = inlined_call_operand.vmem [shape: f32[1,256], index: 2, kind: input, shape index: {}]   ;;  %s15421_s5 = inlined_call_operand.vmem [shape: bf16[512,1024], index: 5, kind: input, shape index: {}]   ;;  %s15422_s4 = inlined_call_operand.vmem [shape: f32[1,512], index: 4, kind: input, shape index: {}]   ;;  %s15423_s7 = inlined_call_operand.vmem [shape: bf16[1024,784], index: 7, kind: input, shape index: {}]   ;;  %s15424_s6 = inlined_call_operand.vmem [shape: f32[1,1024], index: 6, kind: input, shape index: {}]   ;;  %s15425_s8 = inlined_call_operand.vmem [shape: f32[1,784], index: 8, kind: input, shape index: {}]   ;;  %s15426_s9 = inlined_call_operand.vmem [shape: f32[16,784], index: 9, kind: output, shape index: {}]  }
   0x1   :  { %v6431_v0 = vld [vmem:[%s15417_s1 + $0x70] sm:$0xf]  ;;  %v9525_v1 = vld [vmem:[%s15417_s1 + $0x74] sm:$0xf0]  ;;  %v9524_v2 = vld [vmem:[%s15417_s1 + $0x74] sm:$0xf] }
   0x2   :  { %v6432_v3 = vor.u32 %v9525_v1, %v6431_v0  ;;  %v6433_v4 = vld [vmem:[%s15417_s1 + $0x78] sm:$0xf0]  ;;  %v6423_v5 = vld [vmem:[%s15417_s1 + $0x60] sm:$0xf]  ;;  %v9523_v6 = vld [vmem:[%s15417_s1 + $0x64] sm:$0xf0] }
   0x3   :  { %v6436_v7 = vor.u32 %v9524_v2, %v6433_v4  ;;  %v9522_v8 = vld [vmem:[%s15417_s1 + $0x64] sm:$0xf]  ;;  %v6425_v9 = vld [vmem:[%s15417_s1 + $0x68] sm:$0xf0]  ;;  %v6424_v10 = vor.u32 %v9523_v6, %v6423_v5  ;;  %v6415_v12 = vld [vmem:[%s15417_s1 + $0x50] sm:$0xf] }
   0x4   :  { %142 = vmatpush.bf16.msra.mxu0 %v6432_v3  ;;  %v6428_v11 = vor.u32 %v9522_v8, %v6425_v9  ;;  %v9521_v13 = vld [vmem:[%s15417_s1 + $0x54] sm:$0xf0]  ;;  %v9520_v14 = vld [vmem:[%s15417_s1 + $0x54] sm:$0xf]  ;;  %v6417_v15 = vld [vmem:[%s15417_s1 + $0x58] sm:$0xf0] }
   0x5   :  { %156 = vmatpush.bf16.msra.mxu1 %v6436_v7  ;;  %v6416_v16 = vor.u32 %v9521_v13, %v6415_v12  ;;  %v6420_v17 = vor.u32 %v9520_v14, %v6417_v15  ;;  %v6407_v18 = vld [vmem:[%s15417_s1 + $0x40] sm:$0xf]  ;;  %v9519_v19 = vld [vmem:[%s15417_s1 + $0x44] sm:$0xf0]  ;;  %v9518_v20 = vld [vmem:[%s15417_s1 + $0x44] sm:$0xf] }
   0x6   :  { %v6409_v21 = vld [vmem:[%s15417_s1 + $0x48] sm:$0xf0]  ;;  %v6408_v22 = vor.u32 %v9519_v19, %v6407_v18  ;;  %v6551_v23 = vld [vmem:[%s15418_s3 + $0xe0] sm:$0xf]  ;;  %v9556_v24 = vld [vmem:[%s15418_s3 + $0xec] sm:$0xf0] }
   0x7   :  { %v6679_v25 = vld [vmem:[%s15418_s3 + $0x1e0] sm:$0xf]  ;;  %v6412_v26 = vor.u32 %v9518_v20, %v6409_v21  ;;  %v6399_v27 = vld [vmem:[%s15417_s1 + $0x30] sm:$0xf]  ;;  %v9517_v28 = vld [vmem:[%s15417_s1 + $0x34] sm:$0xf0]  ;;  %v6552_v29 = vor.u32 %v9556_v24, %v6551_v23 }
   0x8   :  { %143 = vmatpush.bf16.msra.mxu0 %v6424_v10  ;;  %v9588_v30 = vld [vmem:[%s15418_s3 + $0x1ec] sm:$0xf0]  ;;  %v9516_v31 = vld [vmem:[%s15417_s1 + $0x34] sm:$0xf]  ;;  %v6401_v32 = vld [vmem:[%s15417_s1 + $0x38] sm:$0xf0]  ;;  %v6400_v38 = vor.u32 %v9517_v28, %v6399_v27 }
   0x9   :  { %157 = vmatpush.bf16.msra.mxu1 %v6428_v11  ;;  %v6680_v33 = vor.u32 %v9588_v30, %v6679_v25  ;;  %v6535_v34 = vld [vmem:[%s15418_s3 + $0xc0] sm:$0xf]  ;;  %570 = vmatpush.bf16.msra.mxu2 %v6552_v29  ;;  %v9552_v35 = vld [vmem:[%s15418_s3 + $0xcc] sm:$0xf0]  ;;  %v9515_v40 = vld [vmem:[%s15417_s1 + $0x24] sm:$0xf0]  ;;  %v6404_v43 = vor.u32 %v9516_v31, %v6401_v32 }
   0xa   :  { %v6663_v36 = vld [vmem:[%s15418_s3 + $0x1c0] sm:$0xf]  ;;  %v9584_v37 = vld [vmem:[%s15418_s3 + $0x1cc] sm:$0xf0]  ;;  %v6536_v41 = vor.u32 %v9552_v35, %v6535_v34  ;;  %v9514_v44 = vld [vmem:[%s15417_s1 + $0x24] sm:$0xf] }
   0xb   :  { %v6391_v39 = vld [vmem:[%s15417_s1 + $0x20] sm:$0xf]  ;;  %584 = vmatpush.bf16.msra.mxu3 %v6680_v33  ;;  %v6664_v42 = vor.u32 %v9584_v37, %v6663_v36  ;;  %v9548_v46 = vld [vmem:[%s15418_s3 + $0xac] sm:$0xf0]  ;;  %v6393_v47 = vld [vmem:[%s15417_s1 + $0x28] sm:$0xf0] }
   0xc   :  { %144 = vmatpush.bf16.msra.mxu0 %v6416_v16  ;;  %v6519_v45 = vld [vmem:[%s15418_s3 + $0xa0] sm:$0xf]  ;;  %v9580_v49 = vld [vmem:[%s15418_s3 + $0x1ac] sm:$0xf0]  ;;  %v6392_v51 = vor.u32 %v9515_v40, %v6391_v39  ;;  %v6396_v56 = vor.u32 %v9514_v44, %v6393_v47  ;;  %v9513_v57 = vld [vmem:[%s15417_s1 + $0x14] sm:$0xf0] }
   0xd   :  { %158 = vmatpush.bf16.msra.mxu1 %v6420_v17  ;;  %v6647_v48 = vld [vmem:[%s15418_s3 + $0x1a0] sm:$0xf]  ;;  %571 = vmatpush.bf16.msra.mxu2 %v6536_v41  ;;  %v6520_v50 = vor.u32 %v9548_v46, %v6519_v45  ;;  %v6383_v52 = vld [vmem:[%s15417_s1 + $0x10] sm:$0xf]  ;;  %v9512_v60 = vld [vmem:[%s15417_s1 + $0x14] sm:$0xf] }
   0xe   :  { %v6648_v53 = vor.u32 %v9580_v49, %v6647_v48  ;;  %v6503_v54 = vld [vmem:[%s15418_s3 + $0x80] sm:$0xf]  ;;  %v9544_v55 = vld [vmem:[%s15418_s3 + $0x8c] sm:$0xf0]  ;;  %v6385_v61 = vld [vmem:[%s15417_s1 + $0x18] sm:$0xf0]  ;;  %v6384_v0 = vor.u32 %v9513_v57, %v6383_v52 }
   0xf   :  { %585 = vmatpush.bf16.msra.mxu3 %v6664_v42  ;;  %v6631_v58 = vld [vmem:[%s15418_s3 + $0x180] sm:$0xf]  ;;  %v9576_v59 = vld [vmem:[%s15418_s3 + $0x18c] sm:$0xf0]  ;;  %v6504_v63 = vor.u32 %v9544_v55, %v6503_v54  ;;  %v9511_v1 = vld [vmem:[%s15417_s1 + $0x4] sm:$0xf0]  ;;  %v6388_v5 = vor.u32 %v9512_v60, %v6385_v61 }
  0x10   :  { %145 = vmatpush.bf16.msra.mxu0 %v6408_v22  ;;  %v6375_v62 = vld [vmem:[%s15417_s1] sm:$0xf]  ;;  %v6632_v2 = vor.u32 %v9576_v59, %v6631_v58  ;;  %v9540_v4 = vld [vmem:[%s15418_s3 + $0x6c] sm:$0xf0]  ;;  %v9510_v6 = vld [vmem:[%s15417_s1 + $0x4] sm:$0xf] }
  0x11   :  { %159 = vmatpush.bf16.msra.mxu1 %v6412_v26  ;;  %572 = vmatpush.bf16.msra.mxu2 %v6520_v50  ;;  %v6487_v3 = vld [vmem:[%s15418_s3 + $0x60] sm:$0xf]  ;;  %v9572_v8 = vld [vmem:[%s15418_s3 + $0x16c] sm:$0xf0]  ;;  %v6377_v9 = vld [vmem:[%s15417_s1 + $0x8] sm:$0xf0]  ;;  %v6376_v15 = vor.u32 %v9511_v1, %v6375_v62 }
  0x12   :  { %v6615_v7 = vld [vmem:[%s15418_s3 + $0x160] sm:$0xf]  ;;  %v9554_v10 = vld [vmem:[%s15418_s3 + $0xe4] sm:$0xf]  ;;  %v6553_v11 = vld [vmem:[%s15418_s3 + $0xf0] sm:$0xf0]  ;;  %v6488_v14 = vor.u32 %v9540_v4, %v6487_v3  ;;  %v6380_v19 = vor.u32 %v9510_v6, %v6377_v9 }
  0x13   :  { %586 = vmatpush.bf16.msra.mxu3 %v6648_v53  ;;  %v9586_v12 = vld [vmem:[%s15418_s3 + $0x1e4] sm:$0xf]  ;;  %v6681_v13 = vld [vmem:[%s15418_s3 + $0x1f0] sm:$0xf0]  ;;  %v6616_v16 = vor.u32 %v9572_v8, %v6615_v7  ;;  %v6471_v17 = vld [vmem:[%s15418_s3 + $0x40] sm:$0xf]  ;;  %v6556_v20 = vor.u32 %v9554_v10, %v6553_v11 }
  0x14   :  { %146 = vmatpush.bf16.msra.mxu0 %v6400_v38  ;;  %v9536_v18 = vld [vmem:[%s15418_s3 + $0x4c] sm:$0xf0]  ;;  %v6599_v21 = vld [vmem:[%s15418_s3 + $0x140] sm:$0xf]  ;;  %v6684_v23 = vor.u32 %v9586_v12, %v6681_v13  ;;  %v9550_v24 = vld [vmem:[%s15418_s3 + $0xc4] sm:$0xf] }
  0x15   :  { %160 = vmatpush.bf16.msra.mxu1 %v6404_v43  ;;  %573 = vmatpush.bf16.msra.mxu2 %v6504_v63  ;;  %v9568_v22 = vld [vmem:[%s15418_s3 + $0x14c] sm:$0xf0]  ;;  %v6537_v25 = vld [vmem:[%s15418_s3 + $0xd0] sm:$0xf0]  ;;  %v9509_v26 = vld [vmem:[%s15419_s0] sm:$0xff]  ;;  %v6472_v29 = vor.u32 %v9536_v18, %v6471_v17 }
  0x16   :  { %v9582_v27 = vld [vmem:[%s15418_s3 + $0x1c4] sm:$0xf]  ;;  %v6665_v28 = vld [vmem:[%s15418_s3 + $0x1d0] sm:$0xf0]  ;;  %v6600_v30 = vor.u32 %v9568_v22, %v6599_v21  ;;  %v6455_v31 = vld [vmem:[%s15418_s3 + $0x20] sm:$0xf]  ;;  %v6540_v33 = vor.u32 %v9550_v24, %v6537_v25 }
  0x17   :  { %587 = vmatpush.bf16.msra.mxu3 %v6632_v2  ;;  %v9532_v32 = vld [vmem:[%s15418_s3 + $0x2c] sm:$0xf0]  ;;  %v6583_v34 = vld [vmem:[%s15418_s3 + $0x120] sm:$0xf]  ;;  %v6668_v36 = vor.u32 %v9582_v27, %v6665_v28  ;;  %v9546_v37 = vld [vmem:[%s15418_s3 + $0xa4] sm:$0xf] }
  0x18   :  { %147 = vmatpush.bf16.msra.mxu0 %v6392_v51  ;;  %v9564_v35 = vld [vmem:[%s15418_s3 + $0x12c] sm:$0xf0]  ;;  %v6521_v38 = vld [vmem:[%s15418_s3 + $0xb0] sm:$0xf0]  ;;  %v9578_v39 = vld [vmem:[%s15418_s3 + $0x1a4] sm:$0xf]  ;;  %v6456_v41 = vor.u32 %v9532_v32, %v6455_v31 }
  0x19   :  { %161 = vmatpush.bf16.msra.mxu1 %v6396_v56  ;;  %574 = vmatpush.bf16.msra.mxu2 %v6488_v14  ;;  %v6649_v40 = vld [vmem:[%s15418_s3 + $0x1b0] sm:$0xf0]  ;;  %v6584_v42 = vor.u32 %v9564_v35, %v6583_v34  ;;  %v6439_v43 = vld [vmem:[%s15418_s3] sm:$0xf]  ;;  %v9528_v44 = vld [vmem:[%s15418_s3 + $0xc] sm:$0xf0]  ;;  %v6524_v45 = vor.u32 %v9546_v37, %v6521_v38 }
  0x1a   :  { %v6567_v46 = vld [vmem:[%s15418_s3 + $0x100] sm:$0xf]  ;;  %v9560_v47 = vld [vmem:[%s15418_s3 + $0x10c] sm:$0xf0]  ;;  %v6652_v48 = vor.u32 %v9578_v39, %v6649_v40  ;;  %v9542_v49 = vld [vmem:[%s15418_s3 + $0x84] sm:$0xf]  ;;  %v6440_v53 = vor.u32 %v9528_v44, %v6439_v43 }
  0x1b   :  { %588 = vmatpush.bf16.msra.mxu3 %v6616_v16  ;;  %v6505_v50 = vld [vmem:[%s15418_s3 + $0x90] sm:$0xf0]  ;;  %v9574_v51 = vld [vmem:[%s15418_s3 + $0x184] sm:$0xf]  ;;  %v6568_v54 = vor.u32 %v9560_v47, %v6567_v46  ;;  %v6559_v17 = vld [vmem:[%s15418_s3 + $0xe8] sm:$0xf] }
  0x1c   :  { %148 = vmatpush.bf16.msra.mxu0 %v6384_v0  ;;  %v6633_v52 = vld [vmem:[%s15418_s3 + $0x190] sm:$0xf0]  ;;  %v6508_v55 = vor.u32 %v9542_v49, %v6505_v50  ;;  %v9538_v57 = vld [vmem:[%s15418_s3 + $0x64] sm:$0xf]  ;;  %v9557_v18 = vld [vmem:[%s15418_s3 + $0xf4] sm:$0xf0] }
  0x1d   :  { %162 = vmatpush.bf16.msra.mxu1 %v6388_v5  ;;  %575 = vmatpush.bf16.msra.mxu2 %v6472_v29  ;;  %v6636_v56 = vor.u32 %v9574_v51, %v6633_v52  ;;  %v6489_v58 = vld [vmem:[%s15418_s3 + $0x70] sm:$0xf0]  ;;  %v9570_v59 = vld [vmem:[%s15418_s3 + $0x164] sm:$0xf]  ;;  %v9589_v21 = vld [vmem:[%s15418_s3 + $0x1f4] sm:$0xf0] }
  0x1e   :  { %v6617_v60 = vld [vmem:[%s15418_s3 + $0x170] sm:$0xf0]  ;;  %v6492_v61 = vor.u32 %v9538_v57, %v6489_v58  ;;  %v9534_v63 = vld [vmem:[%s15418_s3 + $0x44] sm:$0xf]  ;;  %v9555_v22 = vld [vmem:[%s15418_s3 + $0xec] sm:$0xf] }
  0x1f   :  { %589 = vmatpush.bf16.msra.mxu3 %v6600_v30  ;;  %v6620_v62 = vor.u32 %v9570_v59, %v6617_v60  ;;  %v6473_v0 = vld [vmem:[%s15418_s3 + $0x50] sm:$0xf0]  ;;  %v9566_v1 = vld [vmem:[%s15418_s3 + $0x144] sm:$0xf]  ;;  %v6689_v27 = vld [vmem:[%s15418_s3 + $0x1f8] sm:$0xf0] }
  0x20   :  { %149 = vmatpush.bf16.msra.mxu0 %v6376_v15  ;;  %v6601_v2 = vld [vmem:[%s15418_s3 + $0x150] sm:$0xf0]  ;;  %v6476_v3 = vor.u32 %v9534_v63, %v6473_v0  ;;  %v9530_v5 = vld [vmem:[%s15418_s3 + $0x24] sm:$0xf]  ;;  %v6543_v29 = vld [vmem:[%s15418_s3 + $0xc8] sm:$0xf] }
  0x21   :  { %163 = vmatpush.bf16.msra.mxu1 %v6380_v19  ;;  %576 = vmatpush.bf16.msra.mxu2 %v6456_v41  ;;  %v6604_v4 = vor.u32 %v9566_v1, %v6601_v2  ;;  %v6457_v6 = vld [vmem:[%s15418_s3 + $0x30] sm:$0xf0]  ;;  %v9562_v7 = vld [vmem:[%s15418_s3 + $0x124] sm:$0xf]  ;;  %v6687_v19 = vld [vmem:[%s15418_s3 + $0x1e8] sm:$0xf] }
  0x22   :  { %v6585_v8 = vld [vmem:[%s15418_s3 + $0x130] sm:$0xf0]  ;;  %v6460_v9 = vor.u32 %v9530_v5, %v6457_v6  ;;  %v9526_v11 = vld [vmem:[%s15418_s3 + $0x4] sm:$0xf]  ;;  %v6688_v24 = vor.u32 %v9589_v21, %v6687_v19  ;;  %v9553_v30 = vld [vmem:[%s15418_s3 + $0xd4] sm:$0xf0] }
  0x23   :  { %150 = vmatmul.bf16.vlgmr.msra.gmra.mxu0 %v9509_v26  ;;  %590 = vmatpush.bf16.msra.mxu3 %v6584_v42  ;;  %v6588_v10 = vor.u32 %v9562_v7, %v6585_v8  ;;  %v6441_v12 = vld [vmem:[%s15418_s3 + $0x10] sm:$0xf0]  ;;  %v9558_v13 = vld [vmem:[%s15418_s3 + $0x104] sm:$0xf]  ;;  %v6544_v31 = vor.u32 %v9553_v30, %v6543_v29  ;;  %v6671_v32 = vld [vmem:[%s15418_s3 + $0x1c8] sm:$0xf] }
  0x24   :  { %598 = vmatpush.bf16.msrb.mxu0 %v6556_v20  ;;  %164 = vmatmul.bf16.vlgmr.msra.gmra.mxu1 %v9509_v26  ;;  %v6569_v14 = vld [vmem:[%s15418_s3 + $0x110] sm:$0xf0]  ;;  %v6444_v15 = vor.u32 %v9526_v11, %v6441_v12  ;;  %v6560_v20 = vor.u32 %v9557_v18, %v6559_v17  ;;  %v9587_v26 = vld [vmem:[%s15418_s3 + $0x1ec] sm:$0xf]  ;;  %v6673_v38 = vld [vmem:[%s15418_s3 + $0x1d8] sm:$0xf0] }
  0x25   :  { %612 = vmatpush.bf16.msrb.mxu1 %v6684_v23  ;;  %577 = vmatpush.bf16.msra.mxu2 %v6440_v53  ;;  %v6572_v16 = vor.u32 %v9558_v13, %v6569_v14  ;;  %v6561_v23 = vld [vmem:[%s15418_s3 + $0xf8] sm:$0xf0]  ;;  %v6692_v28 = vor.u32 %v9587_v26, %v6689_v27  ;;  %v9551_v34 = vld [vmem:[%s15418_s3 + $0xcc] sm:$0xf]  ;;  %v6527_v41 = vld [vmem:[%s15418_s3 + $0xa8] sm:$0xf] }
  0x26   :  { %v6564_v25 = vor.u32 %v9555_v22, %v6561_v23  ;;  %v9583_v37 = vld [vmem:[%s15418_s3 + $0x1cc] sm:$0xf]  ;;  %v9549_v42 = vld [vmem:[%s15418_s3 + $0xb4] sm:$0xf0]  ;;  %v6655_v43 = vld [vmem:[%s15418_s3 + $0x1a8] sm:$0xf] }
  0x27   :  { %591 = vmatpush.bf16.msra.mxu3 %v6568_v54  ;;  %v6676_v40 = vor.u32 %v9583_v37, %v6673_v38  ;;  %v6528_v44 = vor.u32 %v9549_v42, %v6527_v41  ;;  %v9547_v46 = vld [vmem:[%s15418_s3 + $0xac] sm:$0xf]  ;;  %v6529_v47 = vld [vmem:[%s15418_s3 + $0xb8] sm:$0xf0]  ;;  %v6511_v53 = vld [vmem:[%s15418_s3 + $0x88] sm:$0xf] }
  0x28   :  { %599 = vmatpush.bf16.msrb.mxu0 %v6540_v33  ;;  %v9585_v33 = vld [vmem:[%s15418_s3 + $0x1d4] sm:$0xf0]  ;;  %v6532_v49 = vor.u32 %v9547_v46, %v6529_v47  ;;  %v9579_v50 = vld [vmem:[%s15418_s3 + $0x1ac] sm:$0xf]  ;;  %v6657_v51 = vld [vmem:[%s15418_s3 + $0x1b8] sm:$0xf0] }
  0x29   :  { %613 = vmatpush.bf16.msrb.mxu1 %v6668_v36  ;;  %626 = vmatpush.bf16.msrb.mxu2 %v6560_v20  ;;  %v6672_v35 = vor.u32 %v9585_v33, %v6671_v32  ;;  %v6545_v36 = vld [vmem:[%s15418_s3 + $0xd8] sm:$0xf0]  ;;  %v6660_v52 = vor.u32 %v9579_v50, %v6657_v51  ;;  %v9545_v54 = vld [vmem:[%s15418_s3 + $0x94] sm:$0xf0]  ;;  %v9543_v58 = vld [vmem:[%s15418_s3 + $0x8c] sm:$0xf] }
  0x2a   :  { %v6548_v39 = vor.u32 %v9551_v34, %v6545_v36  ;;  %v9577_v57 = vld [vmem:[%s15418_s3 + $0x194] sm:$0xf0]  ;;  %v6513_v59 = vld [vmem:[%s15418_s3 + $0x98] sm:$0xf0]  ;;  %v6495_v1 = vld [vmem:[%s15418_s3 + $0x68] sm:$0xf] }
  0x2b   :  { %640 = vmatpush.bf16.msrb.mxu3 %v6688_v24  ;;  %v6641_v63 = vld [vmem:[%s15418_s3 + $0x198] sm:$0xf0]  ;;  %v9541_v2 = vld [vmem:[%s15418_s3 + $0x74] sm:$0xf0]  ;;  %v9539_v6 = vld [vmem:[%s15418_s3 + $0x6c] sm:$0xf] }
  0x2c   :  { %600 = vmatpush.bf16.msrb.mxu0 %v6524_v45  ;;  %v9581_v45 = vld [vmem:[%s15418_s3 + $0x1b4] sm:$0xf0]  ;;  %v6497_v7 = vld [vmem:[%s15418_s3 + $0x78] sm:$0xf0]  ;;  %v6479_v12 = vld [vmem:[%s15418_s3 + $0x48] sm:$0xf] }
  0x2d   :  { %614 = vmatpush.bf16.msrb.mxu1 %v6652_v48  ;;  %627 = vmatpush.bf16.msrb.mxu2 %v6544_v31  ;;  %v6656_v48 = vor.u32 %v9581_v45, %v6655_v43  ;;  %v9573_v5 = vld [vmem:[%s15418_s3 + $0x174] sm:$0xf0]  ;;  %v6625_v11 = vld [vmem:[%s15418_s3 + $0x178] sm:$0xf0]  ;;  %v9535_v19 = vld [vmem:[%s15418_s3 + $0x4c] sm:$0xf] }
  0x2e   :  { %v9537_v14 = vld [vmem:[%s15418_s3 + $0x54] sm:$0xf0]  ;;  %v6481_v20 = vld [vmem:[%s15418_s3 + $0x58] sm:$0xf0]  ;;  %v9567_v21 = vld [vmem:[%s15418_s3 + $0x14c] sm:$0xf] }
  0x2f   :  { %641 = vmatpush.bf16.msrb.mxu3 %v6672_v35  ;;  %v6480_v17 = vor.u32 %v9537_v14, %v6479_v12  ;;  %v6484_v22 = vor.u32 %v9535_v19, %v6481_v20  ;;  %v6609_v23 = vld [vmem:[%s15418_s3 + $0x158] sm:$0xf0]  ;;  %v6463_v24 = vld [vmem:[%s15418_s3 + $0x28] sm:$0xf]  ;;  %v9531_v29 = vld [vmem:[%s15418_s3 + $0x2c] sm:$0xf] }
  0x30   :  { %601 = vmatpush.bf16.msrb.mxu0 %v6508_v55  ;;  %v6639_v55 = vld [vmem:[%s15418_s3 + $0x188] sm:$0xf]  ;;  %v6612_v26 = vor.u32 %v9567_v21, %v6609_v23  ;;  %v6465_v31 = vld [vmem:[%s15418_s3 + $0x38] sm:$0xf0]  ;;  %v9563_v32 = vld [vmem:[%s15418_s3 + $0x12c] sm:$0xf] }
  0x31   :  { %615 = vmatpush.bf16.msrb.mxu1 %v6636_v56  ;;  %628 = vmatpush.bf16.msrb.mxu2 %v6528_v44  ;;  %v6512_v56 = vor.u32 %v9545_v54, %v6511_v53  ;;  %v6640_v60 = vor.u32 %v9577_v57, %v6639_v55  ;;  %v6591_v27 = vld [vmem:[%s15418_s3 + $0x128] sm:$0xf]  ;;  %v6593_v33 = vld [vmem:[%s15418_s3 + $0x138] sm:$0xf0]  ;;  %v9529_v36 = vld [vmem:[%s15418_s3 + $0x14] sm:$0xf0]  ;;  %v6468_v37 = vor.u32 %v9531_v29, %v6465_v31 }
  0x32   :  { %v6447_v35 = vld [vmem:[%s15418_s3 + $0x8] sm:$0xf]  ;;  %v6596_v38 = vor.u32 %v9563_v32, %v6593_v33  ;;  %v9527_v41 = vld [vmem:[%s15418_s3 + $0xc] sm:$0xf]  ;;  %v6449_v42 = vld [vmem:[%s15418_s3 + $0x18] sm:$0xf0] }
  0x33   :  { %642 = vmatpush.bf16.msrb.mxu3 %v6656_v48  ;;  %v9559_v43 = vld [vmem:[%s15418_s3 + $0x10c] sm:$0xf]  ;;  %v6577_v44 = vld [vmem:[%s15418_s3 + $0x118] sm:$0xf0]  ;;  %v6448_v45 = vor.u32 %v9529_v36, %v6447_v35  ;;  %v6452_v47 = vor.u32 %v9527_v41, %v6449_v42  ;;  %v6887_v14 = vld [vmem:[%s15421_s5 + $0x180] sm:$0xf] }
  0x34   :  { %602 = vmatpush.bf16.msrb.mxu0 %v6492_v61  ;;  %v6516_v61 = vor.u32 %v9543_v58, %v6513_v59  ;;  %v6580_v48 = vor.u32 %v9559_v43, %v6577_v44  ;;  %v7175_v59 = vld [vmem:[%s15421_s5 + $0x3c0] sm:$0xf] }
  0x35   :  { %616 = vmatpush.bf16.msrb.mxu1 %v6620_v62  ;;  %v9575_v62 = vld [vmem:[%s15418_s3 + $0x18c] sm:$0xf]  ;;  %629 = vmatpush.bf16.msrb.mxu2 %v6512_v56  ;;  %v9834_v19 = vld [vmem:[%s15421_s5 + $0x79c] sm:$0xf0] }
  0x36   :  { %v6644_v0 = vor.u32 %v9575_v62, %v6641_v63  ;;  %v9650_v63 = vld [vmem:[%s15421_s5 + $0x1dc] sm:$0xf0] }
  0x37   :  { %643 = vmatpush.bf16.msrb.mxu3 %v6640_v60  ;;  %v9714_v60 = vld [vmem:[%s15421_s5 + $0x3dc] sm:$0xf0] }
  0x38   :  { %603 = vmatpush.bf16.msrb.mxu0 %v6476_v3  ;;  %v6623_v3 = vld [vmem:[%s15418_s3 + $0x168] sm:$0xf]  ;;  %v7399_v20 = vld [vmem:[%s15421_s5 + $0x580] sm:$0xf] }
  0x39   :  { %617 = vmatpush.bf16.msrb.mxu1 %v6604_v4  ;;  %v6496_v4 = vor.u32 %v9541_v2, %v6495_v1  ;;  %v6624_v8 = vor.u32 %v9573_v5, %v6623_v3  ;;  %v9842_v1 = vld [vmem:[%s15421_s5 + $0x7dc] sm:$0xf0] }
  0x3a   :  { %v9778_v5 = vld [vmem:[%s15421_s5 + $0x5dc] sm:$0xf0] }
  0x3b   :  { %630 = vmatpush.bf16.msrb.mxu2 %v6496_v4  ;;  %644 = vmatpush.bf16.msrb.mxu3 %v6624_v8  ;;  %v7431_v4 = vld [vmem:[%s15421_s5 + $0x5c0] sm:$0xf] }
  0x3c   :  { %604 = vmatpush.bf16.msrb.mxu0 %v6460_v9  ;;  %v6500_v9 = vor.u32 %v9539_v6, %v6497_v7  ;;  %v9770_v21 = vld [vmem:[%s15421_s5 + $0x59c] sm:$0xf0] }
  0x3d   :  { %618 = vmatpush.bf16.msrb.mxu1 %v6588_v10  ;;  %v9571_v10 = vld [vmem:[%s15418_s3 + $0x16c] sm:$0xf]  ;;  %v7111_v23 = vld [vmem:[%s15421_s5 + $0x340] sm:$0xf] }
  0x3e   :  { %v6628_v13 = vor.u32 %v9571_v10, %v6625_v11  ;;  %v7143_v10 = vld [vmem:[%s15421_s5 + $0x380] sm:$0xf] }
  0x3f   :  { %631 = vmatpush.bf16.msrb.mxu2 %v6480_v17  ;;  %v9706_v11 = vld [vmem:[%s15421_s5 + $0x39c] sm:$0xf0] }
  0x40   :  { %605 = vmatpush.bf16.msrb.mxu0 %v6444_v15  ;;  %v6607_v15 = vld [vmem:[%s15418_s3 + $0x148] sm:$0xf]  ;;  %v7655_v17 = vld [vmem:[%s15421_s5 + $0x780] sm:$0xf] }
  0x41   :  { %619 = vmatpush.bf16.msrb.mxu1 %v6572_v16  ;;  %v9569_v16 = vld [vmem:[%s15418_s3 + $0x154] sm:$0xf0]  ;;  %v7623_v29 = vld [vmem:[%s15421_s5 + $0x740] sm:$0xf] }
  0x42   :  { %v6608_v18 = vor.u32 %v9569_v16, %v6607_v15  ;;  %v9642_v15 = vld [vmem:[%s15421_s5 + $0x19c] sm:$0xf0] }
  0x43   :  { %v9826_v31 = vld [vmem:[%s15421_s5 + $0x75c] sm:$0xf0] }
  0x44   :  { %654 = vmatpush.bf16.msra.mxu0 %v6564_v25  ;;  %v9533_v25 = vld [vmem:[%s15418_s3 + $0x34] sm:$0xf0]  ;;  %645 = vmatpush.bf16.msrb.mxu3 %v6608_v18  ;;  %v7432_v18 = vor.u32 %v9778_v5, %v7431_v4  ;;  %v7367_v32 = vld [vmem:[%s15421_s5 + $0x540] sm:$0xf] }
  0x45   :  { %668 = vmatpush.bf16.msra.mxu1 %v6692_v28  ;;  %v9565_v28 = vld [vmem:[%s15418_s3 + $0x134] sm:$0xf0]  ;;  %v6464_v30 = vor.u32 %v9533_v25, %v6463_v24  ;;  %v9698_v24 = vld [vmem:[%s15421_s5 + $0x35c] sm:$0xf0]  ;;  %v6888_v25 = vor.u32 %v9642_v15, %v6887_v14 }
  0x46   :  { %v6592_v34 = vor.u32 %v9565_v28, %v6591_v27  ;;  %v9634_v27 = vld [vmem:[%s15421_s5 + $0x15c] sm:$0xf0]  ;;  %v7656_v28 = vor.u32 %v9834_v19, %v7655_v17  ;;  %v9710_v17 = vld [vmem:[%s15421_s5 + $0x3c4] sm:$0xf] }
  0x47   :  { %632 = vmatpush.bf16.msrb.mxu2 %v6464_v30  ;;  %v7400_v30 = vor.u32 %v9770_v21, %v7399_v20  ;;  %v9762_v33 = vld [vmem:[%s15421_s5 + $0x55c] sm:$0xf0]  ;;  %v7177_v21 = vld [vmem:[%s15421_s5 + $0x3e0] sm:$0xf0] }
  0x48   :  { %655 = vmatpush.bf16.msra.mxu0 %v6548_v39  ;;  %v6575_v39 = vld [vmem:[%s15418_s3 + $0x108] sm:$0xf]  ;;  %646 = vmatpush.bf16.msrb.mxu3 %v6592_v34  ;;  %v7112_v34 = vor.u32 %v9698_v24, %v7111_v23  ;;  %v7079_v35 = vld [vmem:[%s15421_s5 + $0x300] sm:$0xf]  ;;  %v7368_v42 = vor.u32 %v9762_v33, %v7367_v32  ;;  %v6921_v23 = vld [vmem:[%s15421_s5 + $0x1e0] sm:$0xf0] }
  0x49   :  { %669 = vmatpush.bf16.msra.mxu1 %v6676_v40  ;;  %v9561_v40 = vld [vmem:[%s15418_s3 + $0x114] sm:$0xf0]  ;;  %v9690_v36 = vld [vmem:[%s15421_s5 + $0x31c] sm:$0xf0] }
  0x4a   :  { %v6576_v46 = vor.u32 %v9561_v40, %v6575_v39  ;;  %v9626_v39 = vld [vmem:[%s15421_s5 + $0x11c] sm:$0xf0]  ;;  %v7624_v40 = vor.u32 %v9826_v31, %v7623_v29  ;;  %v7145_v29 = vld [vmem:[%s15421_s5 + $0x3a0] sm:$0xf0] }
  0x4b   :  { %633 = vmatpush.bf16.msrb.mxu2 %v6448_v45  ;;  %v7591_v41 = vld [vmem:[%s15421_s5 + $0x700] sm:$0xf]  ;;  %v6889_v31 = vld [vmem:[%s15421_s5 + $0x1a0] sm:$0xf0] }
  0x4c   :  { %656 = vmatpush.bf16.msra.mxu0 %v6532_v49  ;;  %647 = vmatpush.bf16.msrb.mxu3 %v6576_v46  ;;  %v50_v49 = vld [vmem:[%s15420_s2] sm:$0x3]  ;;  %v7080_v46 = vor.u32 %v9690_v36, %v7079_v35  ;;  %v7113_v35 = vld [vmem:[%s15421_s5 + $0x360] sm:$0xf0] }
  0x4d   :  { %670 = vmatpush.bf16.msra.mxu1 %v6660_v52  ;;  %v52_v52 = vperm.slane %v50_v49, 0  ;;  %v53_v53 = vperm.slane %v50_v49, 1  ;;  %v9818_v43 = vld [vmem:[%s15421_s5 + $0x71c] sm:$0xf0] }
  0x4e   :  { %v7335_v44 = vld [vmem:[%s15421_s5 + $0x500] sm:$0xf] }
  0x4f   :  { %v9754_v45 = vld [vmem:[%s15421_s5 + $0x51c] sm:$0xf0] }
  0x50   :  { %657 = vmatpush.bf16.msra.mxu0 %v6516_v61  ;;  %v6919_v61 = vld [vmem:[%s15421_s5 + $0x1c0] sm:$0xf] }
  0x51   :  { %671 = vmatpush.bf16.msra.mxu1 %v6644_v0  ;;  %v7687_v0 = vld [vmem:[%s15421_s5 + $0x7c0] sm:$0xf]  ;;  %v6920_v12 = vor.u32 %v9650_v63, %v6919_v61 }
  0x52   :  { %v7688_v16 = vor.u32 %v9842_v1, %v7687_v0  ;;  %v9674_v61 = vld [vmem:[%s15421_s5 + $0x29c] sm:$0xf0] }
  0x53   :  { %v9610_v63 = vld [vmem:[%s15421_s5 + $0x9c] sm:$0xf0] }
  0x54   :  { %658 = vmatpush.bf16.msra.mxu0 %v6500_v9  ;;  %v7176_v9 = vor.u32 %v9714_v60, %v7175_v59  ;;  %v7015_v59 = vld [vmem:[%s15421_s5 + $0x280] sm:$0xf] }
  0x55   :  { %672 = vmatpush.bf16.msra.mxu1 %v6628_v13  ;;  %v7016_v4 = vor.u32 %v9674_v61, %v7015_v59  ;;  %v6983_v5 = vld [vmem:[%s15421_s5 + $0x240] sm:$0xf]  ;;  %v6825_v59 = vld [vmem:[%s15421_s5 + $0x120] sm:$0xf0] }
  0x56   :  { %v6951_v14 = vld [vmem:[%s15421_s5 + $0x200] sm:$0xf]  ;;  %v9670_v61 = vld [vmem:[%s15421_s5 + $0x284] sm:$0xf] }
  0x57   :  { %v9658_v15 = vld [vmem:[%s15421_s5 + $0x21c] sm:$0xf0] }
  0x58   :  { %659 = vmatpush.bf16.msra.mxu0 %v6484_v22  ;;  %v7144_v22 = vor.u32 %v9706_v11, %v7143_v10  ;;  %v7495_v11 = vld [vmem:[%s15421_s5 + $0x640] sm:$0xf]  ;;  %v6952_v24 = vor.u32 %v9658_v15, %v6951_v14  ;;  %v9822_v14 = vld [vmem:[%s15421_s5 + $0x744] sm:$0xf] }
  0x59   :  { %673 = vmatpush.bf16.msra.mxu1 %v6612_v26  ;;  %v6855_v26 = vld [vmem:[%s15421_s5 + $0x140] sm:$0xf] }
  0x5a   :  { %v9594_v19 = vld [vmem:[%s15421_s5 + $0x1c] sm:$0xf0] }
  0x5c   :  { %660 = vmatpush.bf16.msra.mxu0 %v6468_v37  ;;  %v6856_v37 = vor.u32 %v9634_v27, %v6855_v26  ;;  %v7180_v26 = vor.u32 %v9710_v17, %v7177_v21  ;;  %v9702_v27 = vld [vmem:[%s15421_s5 + $0x384] sm:$0xf] }
  0x5d   :  { %674 = vmatpush.bf16.msra.mxu1 %v6596_v38  ;;  %v6823_v38 = vld [vmem:[%s15421_s5 + $0x100] sm:$0xf]  ;;  %v7148_v32 = vor.u32 %v9702_v27, %v7145_v29 }
  0x5e   :  { %v6824_v49 = vor.u32 %v9626_v39, %v6823_v38  ;;  %v7081_v38 = vld [vmem:[%s15421_s5 + $0x320] sm:$0xf0] }
  0x60   :  { %661 = vmatpush.bf16.msra.mxu0 %v6452_v47  ;;  %v7047_v47 = vld [vmem:[%s15421_s5 + $0x2c0] sm:$0xf] }
  0x61   :  { %675 = vmatpush.bf16.msra.mxu1 %v6580_v48  ;;  %v9682_v48 = vld [vmem:[%s15421_s5 + $0x2dc] sm:$0xf0] }
  0xa0   :  { %v151_v50 = vpop.f32.mrf.mxu0 }
  0xa1   :  { %v165_v51 = vpop.f32.mrf.mxu1  ;;  %v152_v54 = vadd.f32 %v151_v50, %v52_v52  ;;  %v6791_v50 = vld [vmem:[%s15421_s5 + $0xc0] sm:$0xf] }
  0xa2   :  { %v166_v55 = vadd.f32 %v165_v51, %v53_v53  ;;  %v9618_v51 = vld [vmem:[%s15421_s5 + $0xdc] sm:$0xf0] }
  0xa3   :  { %v170_v2 = vmax.f32 %v152_v54, 0.0  ;;  %v7336_v54 = vor.u32 %v9754_v45, %v7335_v44  ;;  %v6792_v60 = vor.u32 %v9618_v51, %v6791_v50  ;;  %v6857_v44 = vld [vmem:[%s15421_s5 + $0x160] sm:$0xf0] }
  0xa4   :  { %v171_v6 = vmax.f32 %v166_v55, 0.0  ;;  %v9810_v55 = vld [vmem:[%s15421_s5 + $0x6dc] sm:$0xf0]  ;;  %v7049_v50 = vld [vmem:[%s15421_s5 + $0x2e0] sm:$0xf0] }
  0xa5   :  { %v9838_v51 = vld [vmem:[%s15421_s5 + $0x7c4] sm:$0xf] }
  0xa8   :  { %v153_v56 = vpop.f32.mrf.mxu0 }
  0xa9   :  { %v154_v57 = vadd.f32 %v153_v56, %v52_v52  ;;  %v167_v58 = vpop.f32.mrf.mxu1  ;;  %v7592_v52 = vor.u32 %v9818_v43, %v7591_v41  ;;  %v7303_v56 = vld [vmem:[%s15421_s5 + $0x4c0] sm:$0xf]  ;;  %v9630_v43 = vld [vmem:[%s15421_s5 + $0x144] sm:$0xf] }
  0xaa   :  { %v168_v62 = vadd.f32 %v167_v58, %v53_v53  ;;  %v7559_v53 = vld [vmem:[%s15421_s5 + $0x6c0] sm:$0xf]  ;;  %v7048_v58 = vor.u32 %v9682_v48, %v7047_v47  ;;  %v6860_v45 = vor.u32 %v9630_v43, %v6857_v44  ;;  %v7337_v43 = vld [vmem:[%s15421_s5 + $0x520] sm:$0xf0] }
  0xab   :  { %v172_v3 = vmax.f32 %v154_v57, 0.0  ;;  %v9746_v57 = vld [vmem:[%s15421_s5 + $0x4dc] sm:$0xf0]  ;;  %v7560_v0 = vor.u32 %v9810_v55, %v7559_v53  ;;  %v7689_v53 = vld [vmem:[%s15421_s5 + $0x7e0] sm:$0xf0] }
  0xac   :  { %v173_v7 = vmax.f32 %v168_v62, 0.0  ;;  %v6759_v62 = vld [vmem:[%s15421_s5 + $0x80] sm:$0xf]  ;;  %v7304_v1 = vor.u32 %v9746_v57, %v7303_v56  ;;  %v7692_v56 = vor.u32 %v9838_v51, %v7689_v53  ;;  %v9790_v51 = vld [vmem:[%s15421_s5 + $0x644] sm:$0xf] }
  0xad   :  { %v10884_v8 = vpack.c.bf16 %v172_v3, %v170_v2  ;;  %v7527_v2 = vld [vmem:[%s15421_s5 + $0x680] sm:$0xf] }
  0xae   :  { %v10892_v13 = vpack.c.bf16 %v173_v7, %v171_v6  ;;  %v9802_v3 = vld [vmem:[%s15421_s5 + $0x69c] sm:$0xf0]  ;;  %v6760_v6 = vor.u32 %v9610_v63, %v6759_v62  ;;  %v7017_v62 = vld [vmem:[%s15421_s5 + $0x2a0] sm:$0xf0] }
  0xaf   :  { %578 = vmatmul.bf16.vlgmr.msra.gmra.mxu2 %v10884_v8  ;;  %606 = vmatmul.bf16.vlgmr.msrb.gmra.mxu0 %v10884_v8  ;;  %v9666_v7 = vld [vmem:[%s15421_s5 + $0x25c] sm:$0xf0]  ;;  %v7528_v10 = vor.u32 %v9802_v3, %v7527_v2  ;;  %v9830_v63 = vld [vmem:[%s15421_s5 + $0x784] sm:$0xf] }
  0xb0   :  { %592 = vmatmul.bf16.vlgmr.msra.gmra.mxu3 %v10892_v13  ;;  %620 = vmatmul.bf16.vlgmr.msrb.gmra.mxu1 %v10892_v13  ;;  %v9738_v41 = vld [vmem:[%s15421_s5 + $0x49c] sm:$0xf0] }
  0xb1   :  { %2262 = vmatpush.bf16.msra.mxu3 %v7176_v9  ;;  %2248 = vmatpush.bf16.msra.mxu2 %v6920_v12  ;;  %v9602_v9 = vld [vmem:[%s15421_s5 + $0x5c] sm:$0xf0] }
  0xb2   :  { %2290 = vmatpush.bf16.msrb.mxu1 %v7688_v16  ;;  %2276 = vmatpush.bf16.msrb.mxu0 %v7432_v18  ;;  %v9794_v12 = vld [vmem:[%s15421_s5 + $0x65c] sm:$0xf0] }
  0xb3   :  { %v6695_v18 = vld [vmem:[%s15421_s5] sm:$0xf]  ;;  %v7496_v20 = vor.u32 %v9794_v12, %v7495_v11  ;;  %v9662_v12 = vld [vmem:[%s15421_s5 + $0x244] sm:$0xf] }
  0xb4   :  { %v9786_v47 = vld [vmem:[%s15421_s5 + $0x61c] sm:$0xf0] }
  0xb5   :  { %2263 = vmatpush.bf16.msra.mxu3 %v7144_v22  ;;  %2249 = vmatpush.bf16.msra.mxu2 %v6888_v25  ;;  %v9646_v22 = vld [vmem:[%s15421_s5 + $0x1c4] sm:$0xf]  ;;  %v6696_v25 = vor.u32 %v9594_v19, %v6695_v18  ;;  %v9730_v55 = vld [vmem:[%s15421_s5 + $0x45c] sm:$0xf0] }
  0xb6   :  { %2291 = vmatpush.bf16.msrb.mxu1 %v7656_v28  ;;  %2277 = vmatpush.bf16.msrb.mxu0 %v7400_v30  ;;  %v6924_v28 = vor.u32 %v9646_v22, %v6921_v23  ;;  %v9638_v30 = vld [vmem:[%s15421_s5 + $0x184] sm:$0xf]  ;;  %v7207_v2 = vld [vmem:[%s15421_s5 + $0x400] sm:$0xf] }
  0xb7   :  { %v6892_v33 = vor.u32 %v9638_v30, %v6889_v31  ;;  %v9722_v3 = vld [vmem:[%s15421_s5 + $0x41c] sm:$0xf0]  ;;  %v9606_v18 = vld [vmem:[%s15421_s5 + $0x84] sm:$0xf] }
  0xb8   :  { %v6761_v19 = vld [vmem:[%s15421_s5 + $0xa0] sm:$0xf0] }
  0xb9   :  { %2264 = vmatpush.bf16.msra.mxu3 %v7112_v34  ;;  %2250 = vmatpush.bf16.msra.mxu2 %v6856_v37  ;;  %v9694_v34 = vld [vmem:[%s15421_s5 + $0x344] sm:$0xf]  ;;  %v6764_v21 = vor.u32 %v9606_v18, %v6761_v19 }
  0xba   :  { %2292 = vmatpush.bf16.msrb.mxu1 %v7624_v40  ;;  %2278 = vmatpush.bf16.msrb.mxu0 %v7368_v42  ;;  %v7116_v36 = vor.u32 %v9694_v34, %v7113_v35  ;;  %v9686_v37 = vld [vmem:[%s15421_s5 + $0x304] sm:$0xf]  ;;  %v7271_v40 = vld [vmem:[%s15421_s5 + $0x480] sm:$0xf] }
  0xbb   :  { %v7084_v39 = vor.u32 %v9686_v37, %v7081_v38  ;;  %v7272_v42 = vor.u32 %v9738_v41, %v7271_v40  ;;  %v7401_v22 = vld [vmem:[%s15421_s5 + $0x5a0] sm:$0xf0] }
  0xbc   :  { %v9598_v30 = vld [vmem:[%s15421_s5 + $0x44] sm:$0xf] }
  0xbd   :  { %2265 = vmatpush.bf16.msra.mxu3 %v7080_v46  ;;  %2251 = vmatpush.bf16.msra.mxu2 %v6824_v49  ;;  %v7463_v46 = vld [vmem:[%s15421_s5 + $0x600] sm:$0xf]  ;;  %v9678_v49 = vld [vmem:[%s15421_s5 + $0x2c4] sm:$0xf] }
  0xbe   :  { %2293 = vmatpush.bf16.msrb.mxu1 %v7592_v52  ;;  %2279 = vmatpush.bf16.msrb.mxu0 %v7336_v54  ;;  %v7464_v48 = vor.u32 %v9786_v47, %v7463_v46  ;;  %v7052_v52 = vor.u32 %v9678_v49, %v7049_v50  ;;  %v7239_v54 = vld [vmem:[%s15421_s5 + $0x440] sm:$0xf]  ;;  %v6729_v31 = vld [vmem:[%s15421_s5 + $0x60] sm:$0xf0] }
  0xbf   :  { %634 = vmatmul.bf16.vlgmr.msrb.gmra.mxu2 %v10884_v8  ;;  %662 = vmatmul.bf16.vlgmr.msra.gmra.mxu0 %v10884_v8  ;;  %v6727_v8 = vld [vmem:[%s15421_s5 + $0x40] sm:$0xf]  ;;  %v7240_v57 = vor.u32 %v9730_v55, %v7239_v54  ;;  %v7369_v34 = vld [vmem:[%s15421_s5 + $0x560] sm:$0xf0] }
  0xc0   :  { %648 = vmatmul.bf16.vlgmr.msrb.gmra.mxu3 %v10892_v13  ;;  %676 = vmatmul.bf16.vlgmr.msra.gmra.mxu1 %v10892_v13  ;;  %v6984_v13 = vor.u32 %v9666_v7, %v6983_v5  ;;  %v6728_v16 = vor.u32 %v9602_v9, %v6727_v8  ;;  %v7208_v5 = vor.u32 %v9722_v3, %v7207_v2  ;;  %v6793_v7 = vld [vmem:[%s15421_s5 + $0xe0] sm:$0xf0] }
  0xc1   :  { %2266 = vmatpush.bf16.msra.mxu3 %v7048_v58  ;;  %2252 = vmatpush.bf16.msra.mxu2 %v6792_v60  ;;  %v9622_v58 = vld [vmem:[%s15421_s5 + $0x104] sm:$0xf] }
  0xc2   :  { %2294 = vmatpush.bf16.msrb.mxu1 %v7560_v0  ;;  %2280 = vmatpush.bf16.msrb.mxu0 %v7304_v1  ;;  %v6828_v60 = vor.u32 %v9622_v58, %v6825_v59  ;;  %v7020_v0 = vor.u32 %v9670_v61, %v7017_v62  ;;  %v7657_v1 = vld [vmem:[%s15421_s5 + $0x7a0] sm:$0xf0] }
  0xc3   :  { %v9774_v8 = vld [vmem:[%s15421_s5 + $0x5c4] sm:$0xf] }
  0xc4   :  { %v7561_v37 = vld [vmem:[%s15421_s5 + $0x6e0] sm:$0xf0] }
  0xc5   :  { %2267 = vmatpush.bf16.msra.mxu3 %v7016_v4  ;;  %2253 = vmatpush.bf16.msra.mxu2 %v6760_v6  ;;  %v7660_v4 = vor.u32 %v9830_v63, %v7657_v1  ;;  %v9614_v6 = vld [vmem:[%s15421_s5 + $0xc4] sm:$0xf] }
  0xc6   :  { %2295 = vmatpush.bf16.msrb.mxu1 %v7528_v10  ;;  %2281 = vmatpush.bf16.msrb.mxu0 %v7272_v42  ;;  %v6796_v9 = vor.u32 %v9614_v6, %v6793_v7  ;;  %v7433_v10 = vld [vmem:[%s15421_s5 + $0x5e0] sm:$0xf0] }
  0xc7   :  { %v7436_v11 = vor.u32 %v9774_v8, %v7433_v10  ;;  %v6697_v40 = vld [vmem:[%s15421_s5 + $0x20] sm:$0xf0] }
  0xc8   :  { %v9750_v41 = vld [vmem:[%s15421_s5 + $0x504] sm:$0xf] }
  0xc9   :  { %2268 = vmatpush.bf16.msra.mxu3 %v6984_v13  ;;  %2254 = vmatpush.bf16.msra.mxu2 %v6728_v16  ;;  %v6985_v13 = vld [vmem:[%s15421_s5 + $0x260] sm:$0xf0]  ;;  %v7340_v44 = vor.u32 %v9750_v41, %v7337_v43  ;;  %v9643_v43 = vld [vmem:[%s15421_s5 + $0x1a4] sm:$0xf0] }
  0xca   :  { %2296 = vmatpush.bf16.msrb.mxu1 %v7496_v20  ;;  %2282 = vmatpush.bf16.msrb.mxu0 %v7240_v57  ;;  %v6988_v15 = vor.u32 %v9662_v12, %v6985_v13  ;;  %v7625_v16 = vld [vmem:[%s15421_s5 + $0x760] sm:$0xf0]  ;;  %v11241_v57 = vld [vmem:[%s15422_s4] sm:$0xf] }
  0xcb   :  { %v7628_v17 = vor.u32 %v9822_v14, %v7625_v16  ;;  %v9766_v20 = vld [vmem:[%s15421_s5 + $0x584] sm:$0xf]  ;;  %v242_v8 = vperm.slane %v11241_v57, 0  ;;  %v7183_v16 = vld [vmem:[%s15421_s5 + $0x3c8] sm:$0xf] }
  0xcc   :  { %v7404_v23 = vor.u32 %v9766_v20, %v7401_v22  ;;  %v7529_v46 = vld [vmem:[%s15421_s5 + $0x6a0] sm:$0xf0] }
  0xcd   :  { %2269 = vmatpush.bf16.msra.mxu3 %v6952_v24  ;;  %2255 = vmatpush.bf16.msra.mxu2 %v6696_v25  ;;  %v9654_v24 = vld [vmem:[%s15421_s5 + $0x204] sm:$0xf] }
  0xce   :  { %2297 = vmatpush.bf16.msrb.mxu1 %v7464_v48  ;;  %2283 = vmatpush.bf16.msrb.mxu0 %v7208_v5  ;;  %v6953_v25 = vld [vmem:[%s15421_s5 + $0x220] sm:$0xf0] }
  0xcf   :  { %v6956_v27 = vor.u32 %v9654_v24, %v6953_v25  ;;  %v9742_v48 = vld [vmem:[%s15421_s5 + $0x4c4] sm:$0xf] }
  0xd0   :  { %v7305_v49 = vld [vmem:[%s15421_s5 + $0x4e0] sm:$0xf0] }
  0xd1   :  { %2318 = vmatpush.bf16.msrb.mxu3 %v7180_v26  ;;  %2304 = vmatpush.bf16.msrb.mxu2 %v6924_v28  ;;  %v9814_v26 = vld [vmem:[%s15421_s5 + $0x704] sm:$0xf]  ;;  %v7308_v50 = vor.u32 %v9742_v48, %v7305_v49  ;;  %v7087_v48 = vld [vmem:[%s15421_s5 + $0x308] sm:$0xf] }
  0xd2   :  { %2346 = vmatpush.bf16.msra.mxu1 %v7692_v56  ;;  %2332 = vmatpush.bf16.msra.mxu0 %v7436_v11  ;;  %v7593_v28 = vld [vmem:[%s15421_s5 + $0x720] sm:$0xf0]  ;;  %v9691_v49 = vld [vmem:[%s15421_s5 + $0x324] sm:$0xf0] }
  0xd3   :  { %v7596_v29 = vor.u32 %v9814_v26, %v7593_v28  ;;  %v9734_v54 = vld [vmem:[%s15421_s5 + $0x484] sm:$0xf]  ;;  %v7151_v26 = vld [vmem:[%s15421_s5 + $0x388] sm:$0xf] }
  0xd4   :  { %v7273_v55 = vld [vmem:[%s15421_s5 + $0x4a0] sm:$0xf0] }
  0xd5   :  { %2319 = vmatpush.bf16.msrb.mxu3 %v7148_v32  ;;  %2305 = vmatpush.bf16.msrb.mxu2 %v6892_v33  ;;  %v6732_v32 = vor.u32 %v9598_v30, %v6729_v31  ;;  %v9758_v33 = vld [vmem:[%s15421_s5 + $0x544] sm:$0xf]  ;;  %v7276_v56 = vor.u32 %v9734_v54, %v7273_v55  ;;  %v245_v30 = vperm.slane %v11241_v57, 3  ;;  %v6863_v54 = vld [vmem:[%s15421_s5 + $0x148] sm:$0xf] }
  0xd6   :  { %2347 = vmatpush.bf16.msra.mxu1 %v7660_v4  ;;  %2333 = vmatpush.bf16.msra.mxu0 %v7404_v23  ;;  %v7372_v35 = vor.u32 %v9758_v33, %v7369_v34  ;;  %v9782_v58 = vld [vmem:[%s15421_s5 + $0x604] sm:$0xf]  ;;  %v9651_v33 = vld [vmem:[%s15421_s5 + $0x1e4] sm:$0xf0] }
  0xd7   :  { %v7465_v59 = vld [vmem:[%s15421_s5 + $0x620] sm:$0xf0]  ;;  %v9635_v55 = vld [vmem:[%s15421_s5 + $0x164] sm:$0xf0] }
  0xd8   :  { %v9726_v62 = vld [vmem:[%s15421_s5 + $0x444] sm:$0xf] }
  0xd9   :  { %2320 = vmatpush.bf16.msrb.mxu3 %v7116_v36  ;;  %2306 = vmatpush.bf16.msrb.mxu2 %v6860_v45  ;;  %v9806_v36 = vld [vmem:[%s15421_s5 + $0x6c4] sm:$0xf] }
  0xda   :  { %2348 = vmatpush.bf16.msra.mxu1 %v7628_v17  ;;  %v7564_v38 = vor.u32 %v9806_v36, %v7561_v37  ;;  %2334 = vmatpush.bf16.msra.mxu0 %v7372_v35  ;;  %v9798_v45 = vld [vmem:[%s15421_s5 + $0x684] sm:$0xf]  ;;  %v9715_v17 = vld [vmem:[%s15421_s5 + $0x3e4] sm:$0xf0] }
  0xdb   :  { %v7532_v47 = vor.u32 %v9798_v45, %v7529_v46  ;;  %v7241_v63 = vld [vmem:[%s15421_s5 + $0x460] sm:$0xf0]  ;;  %v7119_v37 = vld [vmem:[%s15421_s5 + $0x348] sm:$0xf]  ;;  %v244_v46 = vperm.slane %v11241_v57, 2 }
  0xdc   :  { %v7244_v2 = vor.u32 %v9726_v62, %v7241_v63  ;;  %v9718_v3 = vld [vmem:[%s15421_s5 + $0x404] sm:$0xf]  ;;  %v7695_v62 = vld [vmem:[%s15421_s5 + $0x7c8] sm:$0xf] }
  0xdd   :  { %2321 = vmatpush.bf16.msrb.mxu3 %v7084_v39  ;;  %2307 = vmatpush.bf16.msrb.mxu2 %v6828_v60  ;;  %v9590_v39 = vld [vmem:[%s15421_s5 + $0x4] sm:$0xf]  ;;  %v7468_v60 = vor.u32 %v9782_v58, %v7465_v59  ;;  %v7055_v58 = vld [vmem:[%s15421_s5 + $0x2c8] sm:$0xf] }
  0xde   :  { %2349 = vmatpush.bf16.msra.mxu1 %v7596_v29  ;;  %v6700_v42 = vor.u32 %v9590_v39, %v6697_v40  ;;  %2335 = vmatpush.bf16.msra.mxu0 %v7340_v44  ;;  %v7209_v4 = vld [vmem:[%s15421_s5 + $0x420] sm:$0xf0]  ;;  %v9843_v63 = vld [vmem:[%s15421_s5 + $0x7e4] sm:$0xf0] }
  0xdf   :  { %v7212_v6 = vor.u32 %v9718_v3, %v7209_v4  ;;  %v6831_v3 = vld [vmem:[%s15421_s5 + $0x108] sm:$0xf] }
  0xe0   :  { %v9627_v4 = vld [vmem:[%s15421_s5 + $0x124] sm:$0xf0] }
  0xe1   :  { %2322 = vmatpush.bf16.msrb.mxu3 %v7052_v52  ;;  %2308 = vmatpush.bf16.msrb.mxu2 %v6796_v9  ;;  %v7497_v52 = vld [vmem:[%s15421_s5 + $0x660] sm:$0xf0] }
  0xe2   :  { %2350 = vmatpush.bf16.msra.mxu1 %v7564_v38  ;;  %v7500_v53 = vor.u32 %v9790_v51, %v7497_v52  ;;  %2336 = vmatpush.bf16.msra.mxu0 %v7308_v50  ;;  %v9699_v38 = vld [vmem:[%s15421_s5 + $0x364] sm:$0xf0] }
  0xe3   :  { %v7120_v45 = vor.u32 %v9699_v38, %v7119_v37  ;;  %v9771_v37 = vld [vmem:[%s15421_s5 + $0x5a4] sm:$0xf0] }
  0xe5   :  { %2323 = vmatpush.bf16.msrb.mxu3 %v7020_v0  ;;  %2309 = vmatpush.bf16.msrb.mxu2 %v6764_v21  ;;  %v243_v0 = vperm.slane %v11241_v57, 1  ;;  %v7184_v21 = vor.u32 %v9715_v17, %v7183_v16  ;;  %v7088_v57 = vor.u32 %v9691_v49, %v7087_v48  ;;  %v6832_v16 = vor.u32 %v9627_v4, %v6831_v3  ;;  %v6799_v17 = vld [vmem:[%s15421_s5 + $0xc8] sm:$0xf]  ;;  %v7185_v48 = vld [vmem:[%s15421_s5 + $0x3e8] sm:$0xf0] }
  0xe6   :  { %2351 = vmatpush.bf16.msra.mxu1 %v7532_v47  ;;  %2337 = vmatpush.bf16.msra.mxu0 %v7276_v56  ;;  %v6735_v49 = vld [vmem:[%s15421_s5 + $0x48] sm:$0xf]  ;;  %v9647_v3 = vld [vmem:[%s15421_s5 + $0x1cc] sm:$0xf] }
  0xe7   :  { %v6929_v4 = vld [vmem:[%s15421_s5 + $0x1e8] sm:$0xf0] }
  0xe9   :  { %2324 = vmatpush.bf16.msrb.mxu3 %v6988_v15  ;;  %2310 = vmatpush.bf16.msrb.mxu2 %v6732_v32  ;;  %v6927_v32 = vld [vmem:[%s15421_s5 + $0x1c8] sm:$0xf] }
  0xea   :  { %2352 = vmatpush.bf16.msra.mxu1 %v7500_v53  ;;  %2338 = vmatpush.bf16.msra.mxu0 %v7244_v2  ;;  %v6928_v39 = vor.u32 %v9651_v33, %v6927_v32  ;;  %v6767_v33 = vld [vmem:[%s15421_s5 + $0x88] sm:$0xf] }
  0xed   :  { %2325 = vmatpush.bf16.msrb.mxu3 %v6956_v27  ;;  %2311 = vmatpush.bf16.msrb.mxu2 %v6700_v42  ;;  %v9707_v27 = vld [vmem:[%s15421_s5 + $0x3a4] sm:$0xf0] }
  0xee   :  { %2353 = vmatpush.bf16.msra.mxu1 %v7468_v60  ;;  %2339 = vmatpush.bf16.msra.mxu0 %v7212_v6  ;;  %v7152_v34 = vor.u32 %v9707_v27, %v7151_v26  ;;  %v6895_v42 = vld [vmem:[%s15421_s5 + $0x188] sm:$0xf] }
  0xef   :  { %v6896_v51 = vor.u32 %v9643_v43, %v6895_v42  ;;  %v9667_v26 = vld [vmem:[%s15421_s5 + $0x264] sm:$0xf0] }
  0xf0   :  { %v9659_v42 = vld [vmem:[%s15421_s5 + $0x224] sm:$0xf0] }
  0xf1   :  { %v7599_v43 = vld [vmem:[%s15421_s5 + $0x708] sm:$0xf] }
 0x12c   :  { %v607_v61 = vpop.f32.mrf.mxu0 }
 0x12d   :  { %v621_v1 = vpop.f32.mrf.mxu1  ;;  %v608_v5 = vadd.f32 %v607_v61, %v243_v0  ;;  %v9683_v61 = vld [vmem:[%s15421_s5 + $0x2e4] sm:$0xf0] }
 0x12e   :  { %v7056_v6 = vor.u32 %v9683_v61, %v7055_v58  ;;  %v7153_v61 = vld [vmem:[%s15421_s5 + $0x3a8] sm:$0xf0] }
 0x12f   :  { %v622_v11 = vadd.f32 %v621_v1, %v608_v5 }
 0x131   :  { %v683_v18 = vmax.f32 %v622_v11, 0.0 }
 0x132   :  { %v579_v7 = vpop.f32.mrf.mxu2 }
 0x133   :  { %v593_v9 = vpop.f32.mrf.mxu3  ;;  %v580_v14 = vadd.f32 %v579_v7, %v242_v8  ;;  %v7696_v7 = vor.u32 %v9843_v63, %v7695_v62  ;;  %v6703_v62 = vld [vmem:[%s15421_s5 + $0x8] sm:$0xf] }
 0x134   :  { %v609_v10 = vpop.f32.mrf.mxu0  ;;  %v9595_v63 = vld [vmem:[%s15421_s5 + $0x24] sm:$0xf0] }
 0x135   :  { %v610_v12 = vadd.f32 %v609_v10, %v243_v0  ;;  %v623_v13 = vpop.f32.mrf.mxu1  ;;  %v594_v22 = vadd.f32 %v593_v9, %v580_v14  ;;  %v6864_v0 = vor.u32 %v9635_v55, %v6863_v54  ;;  %v9835_v14 = vld [vmem:[%s15421_s5 + $0x7a4] sm:$0xf0] }
 0x137   :  { %v624_v15 = vadd.f32 %v623_v13, %v610_v12  ;;  %v682_v35 = vmax.f32 %v594_v22, 0.0  ;;  %v9675_v12 = vld [vmem:[%s15421_s5 + $0x2a4] sm:$0xf0] }
 0x138   :  { %v7663_v13 = vld [vmem:[%s15421_s5 + $0x788] sm:$0xf] }
 0x139   :  { %v687_v19 = vmax.f32 %v624_v15, 0.0 }
 0x13a   :  { %v581_v20 = vpop.f32.mrf.mxu2 }
 0x13b   :  { %v11269_v23 = vpack.c.bf16 %v687_v19, %v683_v18  ;;  %v582_v24 = vadd.f32 %v581_v20, %v242_v8  ;;  %v595_v25 = vpop.f32.mrf.mxu3  ;;  %v7023_v8 = vld [vmem:[%s15421_s5 + $0x288] sm:$0xf] }
 0x13c   :  { %v663_v28 = vpop.f32.mrf.mxu0  ;;  %v9619_v19 = vld [vmem:[%s15421_s5 + $0xe4] sm:$0xf0]  ;;  %v7024_v22 = vor.u32 %v9675_v12, %v7023_v8  ;;  %v6704_v8 = vor.u32 %v9595_v63, %v6703_v62  ;;  %v7121_v12 = vld [vmem:[%s15421_s5 + $0x368] sm:$0xf0] }
 0x13d   :  { %v596_v29 = vadd.f32 %v595_v25, %v582_v24  ;;  %v677_v31 = vpop.f32.mrf.mxu1  ;;  %2270 = vmatmul.bf16.vlgmr.msra.gmra.mxu3 %v11269_v23  ;;  %v664_v41 = vadd.f32 %v663_v28, %v245_v30  ;;  %v7439_v20 = vld [vmem:[%s15421_s5 + $0x5c8] sm:$0xf]  ;;  %v7664_v24 = vor.u32 %v9835_v14, %v7663_v13  ;;  %v6932_v13 = vor.u32 %v9647_v3, %v6929_v4  ;;  %v9823_v3 = vld [vmem:[%s15421_s5 + $0x74c] sm:$0xf] }
 0x13e   :  { %2374 = vmatpush.bf16.msra.mxu3 %v7184_v21  ;;  %v9779_v21 = vld [vmem:[%s15421_s5 + $0x5e4] sm:$0xf0]  ;;  %v7633_v4 = vld [vmem:[%s15421_s5 + $0x768] sm:$0xf0] }
 0x13f   :  { %v686_v36 = vmax.f32 %v596_v29, 0.0  ;;  %v678_v52 = vadd.f32 %v677_v31, %v664_v41  ;;  %v6991_v25 = vld [vmem:[%s15421_s5 + $0x248] sm:$0xf]  ;;  %v6800_v31 = vor.u32 %v9619_v19, %v6799_v17  ;;  %v7440_v32 = vor.u32 %v9779_v21, %v7439_v20  ;;  %v9639_v17 = vld [vmem:[%s15421_s5 + $0x18c] sm:$0xf] }
 0x140   :  { %v7631_v29 = vld [vmem:[%s15421_s5 + $0x748] sm:$0xf]  ;;  %v6992_v38 = vor.u32 %v9667_v26, %v6991_v25  ;;  %v7089_v25 = vld [vmem:[%s15421_s5 + $0x328] sm:$0xf0] }
 0x141   :  { %v11291_v40 = vpack.c.bf16 %v686_v36, %v682_v35  ;;  %v685_v1 = vmax.f32 %v678_v52, 0.0  ;;  %v9611_v35 = vld [vmem:[%s15421_s5 + $0xa4] sm:$0xf0] }
 0x142   :  { %2375 = vmatpush.bf16.msra.mxu3 %v7152_v34  ;;  %v635_v44 = vpop.f32.mrf.mxu2  ;;  %v7407_v36 = vld [vmem:[%s15421_s5 + $0x588] sm:$0xf] }
 0x143   :  { %v649_v47 = vpop.f32.mrf.mxu3  ;;  %2256 = vmatmul.bf16.vlgmr.msra.gmra.mxu2 %v11291_v40  ;;  %v636_v59 = vadd.f32 %v635_v44, %v244_v46  ;;  %v6959_v41 = vld [vmem:[%s15421_s5 + $0x208] sm:$0xf] }
 0x144   :  { %2360 = vmatpush.bf16.msra.mxu2 %v6928_v39  ;;  %v665_v50 = vpop.f32.mrf.mxu0  ;;  %v9819_v44 = vld [vmem:[%s15421_s5 + $0x724] sm:$0xf0] }
 0x145   :  { %v666_v53 = vadd.f32 %v665_v50, %v245_v30  ;;  %v679_v56 = vpop.f32.mrf.mxu1  ;;  %v650_v9 = vadd.f32 %v649_v47, %v636_v59  ;;  %v9827_v30 = vld [vmem:[%s15421_s5 + $0x764] sm:$0xf0]  ;;  %v9711_v47 = vld [vmem:[%s15421_s5 + $0x3cc] sm:$0xf]  ;;  %v7600_v54 = vor.u32 %v9819_v44, %v7599_v43 }
 0x146   :  { %2376 = vmatpush.bf16.msra.mxu3 %v7120_v45  ;;  %v7632_v39 = vor.u32 %v9827_v30, %v7631_v29  ;;  %v6768_v45 = vor.u32 %v9611_v35, %v6767_v33  ;;  %v9603_v50 = vld [vmem:[%s15421_s5 + $0x64] sm:$0xf0]  ;;  %v7188_v55 = vor.u32 %v9711_v47, %v7185_v48  ;;  %v9631_v30 = vld [vmem:[%s15421_s5 + $0x14c] sm:$0xf] }
 0x147   :  { %v680_v60 = vadd.f32 %v679_v56, %v666_v53  ;;  %v684_v27 = vmax.f32 %v650_v9, 0.0  ;;  %v9763_v52 = vld [vmem:[%s15421_s5 + $0x564] sm:$0xf0]  ;;  %v6960_v53 = vor.u32 %v9659_v42, %v6959_v41  ;;  %v6736_v58 = vor.u32 %v9603_v50, %v6735_v49  ;;  %v7697_v41 = vld [vmem:[%s15421_s5 + $0x7e8] sm:$0xf0] }
 0x148   :  { %2361 = vmatpush.bf16.msra.mxu2 %v6896_v51  ;;  %v7375_v51 = vld [vmem:[%s15421_s5 + $0x548] sm:$0xf]  ;;  %v6833_v47 = vld [vmem:[%s15421_s5 + $0x128] sm:$0xf0] }
 0x149   :  { %v689_v2 = vmax.f32 %v680_v60, 0.0  ;;  %v7567_v56 = vld [vmem:[%s15421_s5 + $0x6c8] sm:$0xf]  ;;  %v7376_v59 = vor.u32 %v9763_v52, %v7375_v51  ;;  %v9703_v60 = vld [vmem:[%s15421_s5 + $0x38c] sm:$0xf] }
 0x14a   :  { %2377 = vmatpush.bf16.msra.mxu3 %v7088_v57  ;;  %v637_v5 = vpop.f32.mrf.mxu2  ;;  %v9811_v57 = vld [vmem:[%s15421_s5 + $0x6e4] sm:$0xf0]  ;;  %v9671_v50 = vld [vmem:[%s15421_s5 + $0x28c] sm:$0xf] }
 0x14b   :  { %v11334_v10 = vpack.c.bf16 %v689_v2, %v685_v1  ;;  %v638_v11 = vadd.f32 %v637_v5, %v244_v46  ;;  %v651_v15 = vpop.f32.mrf.mxu3  ;;  %v7408_v46 = vor.u32 %v9771_v37, %v7407_v36  ;;  %v9755_v1 = vld [vmem:[%s15421_s5 + $0x524] sm:$0xf0]  ;;  %v7568_v2 = vor.u32 %v9811_v57, %v7567_v56  ;;  %v9679_v36 = vld [vmem:[%s15421_s5 + $0x2cc] sm:$0xf] }
 0x14c   :  { %2362 = vmatpush.bf16.msra.mxu2 %v6864_v0  ;;  %v7343_v0 = vld [vmem:[%s15421_s5 + $0x508] sm:$0xf]  ;;  %v7156_v5 = vor.u32 %v9703_v60, %v7153_v61  ;;  %v7025_v52 = vld [vmem:[%s15421_s5 + $0x2a8] sm:$0xf0] }
 0x14d   :  { %v652_v18 = vadd.f32 %v651_v15, %v638_v11  ;;  %2298 = vmatmul.bf16.vlgmr.msrb.gmra.mxu1 %v11334_v10  ;;  %2326 = vmatmul.bf16.vlgmr.msrb.gmra.mxu3 %v11269_v23  ;;  %v7344_v9 = vor.u32 %v9755_v1, %v7343_v0  ;;  %v9695_v11 = vld [vmem:[%s15421_s5 + $0x34c] sm:$0xf]  ;;  %v7311_v14 = vld [vmem:[%s15421_s5 + $0x4c8] sm:$0xf]  ;;  %v7028_v62 = vor.u32 %v9671_v50, %v7025_v52  ;;  %v7127_v50 = vld [vmem:[%s15421_s5 + $0x350] sm:$0xf] }
 0x14e   :  { %2378 = vmatpush.bf16.msra.mxu3 %v7056_v6  ;;  %2402 = vmatpush.bf16.msrb.mxu1 %v7696_v7  ;;  %v7535_v6 = vld [vmem:[%s15421_s5 + $0x688] sm:$0xf]  ;;  %v7124_v19 = vor.u32 %v9695_v11, %v7121_v12  ;;  %v9775_v60 = vld [vmem:[%s15421_s5 + $0x5cc] sm:$0xf] }
 0x14f   :  { %v688_v28 = vmax.f32 %v652_v18, 0.0  ;;  %v9803_v7 = vld [vmem:[%s15421_s5 + $0x6a4] sm:$0xf0]  ;;  %v6897_v18 = vld [vmem:[%s15421_s5 + $0x1a8] sm:$0xf0] }
 0x150   :  { %2363 = vmatpush.bf16.msra.mxu2 %v6832_v16  ;;  %v9747_v15 = vld [vmem:[%s15421_s5 + $0x4e4] sm:$0xf0]  ;;  %v7536_v16 = vor.u32 %v9803_v7, %v7535_v6  ;;  %v6900_v26 = vor.u32 %v9639_v17, %v6897_v18  ;;  %v7441_v61 = vld [vmem:[%s15421_s5 + $0x5e8] sm:$0xf0] }
 0x151   :  { %v11374_v34 = vpack.c.bf16 %v688_v28, %v684_v27  ;;  %v7503_v20 = vld [vmem:[%s15421_s5 + $0x648] sm:$0xf]  ;;  %v9663_v0 = vld [vmem:[%s15421_s5 + $0x24c] sm:$0xf]  ;;  %v7444_v6 = vor.u32 %v9775_v60, %v7441_v61 }
 0x152   :  { %2379 = vmatpush.bf16.msra.mxu3 %v7024_v22  ;;  %2403 = vmatpush.bf16.msrb.mxu1 %v7664_v24  ;;  %v9795_v21 = vld [vmem:[%s15421_s5 + $0x664] sm:$0xf0]  ;;  %v7312_v22 = vor.u32 %v9747_v15, %v7311_v14  ;;  %v9687_v24 = vld [vmem:[%s15421_s5 + $0x30c] sm:$0xf] }
 0x153   :  { %2284 = vmatmul.bf16.vlgmr.msrb.gmra.mxu0 %v11374_v34  ;;  %2312 = vmatmul.bf16.vlgmr.msrb.gmra.mxu2 %v11291_v40  ;;  %v7279_v27 = vld [vmem:[%s15421_s5 + $0x488] sm:$0xf]  ;;  %v7504_v29 = vor.u32 %v9795_v21, %v7503_v20  ;;  %v9607_v7 = vld [vmem:[%s15421_s5 + $0x8c] sm:$0xf]  ;;  %v7191_v20 = vld [vmem:[%s15421_s5 + $0x3d0] sm:$0xf] }
 0x154   :  { %2364 = vmatpush.bf16.msra.mxu2 %v6800_v31  ;;  %2388 = vmatpush.bf16.msrb.mxu0 %v7440_v32  ;;  %v9739_v28 = vld [vmem:[%s15421_s5 + $0x4a4] sm:$0xf0]  ;;  %v6865_v31 = vld [vmem:[%s15421_s5 + $0x168] sm:$0xf0]  ;;  %v7092_v32 = vor.u32 %v9687_v24, %v7089_v25  ;;  %v9716_v21 = vld [vmem:[%s15421_s5 + $0x3ec] sm:$0xf0] }
 0x155   :  { %v7471_v33 = vld [vmem:[%s15421_s5 + $0x608] sm:$0xf]  ;;  %v7280_v37 = vor.u32 %v9739_v28, %v7279_v27  ;;  %v6868_v42 = vor.u32 %v9631_v30, %v6865_v31  ;;  %v7409_v11 = vld [vmem:[%s15421_s5 + $0x5a8] sm:$0xf0] }
 0x156   :  { %2380 = vmatpush.bf16.msra.mxu3 %v6992_v38  ;;  %2404 = vmatpush.bf16.msrb.mxu1 %v7632_v39  ;;  %v9787_v35 = vld [vmem:[%s15421_s5 + $0x624] sm:$0xf0]  ;;  %v7057_v38 = vld [vmem:[%s15421_s5 + $0x2e8] sm:$0xf0] }
 0x157   :  { %v9839_v39 = vld [vmem:[%s15421_s5 + $0x7cc] sm:$0xf]  ;;  %v7247_v43 = vld [vmem:[%s15421_s5 + $0x448] sm:$0xf]  ;;  %v7060_v48 = vor.u32 %v9679_v36, %v7057_v38  ;;  %v9708_v36 = vld [vmem:[%s15421_s5 + $0x3ac] sm:$0xf0] }
 0x158   :  { %2365 = vmatpush.bf16.msra.mxu2 %v6768_v45  ;;  %2389 = vmatpush.bf16.msrb.mxu0 %v7408_v46  ;;  %v9731_v44 = vld [vmem:[%s15421_s5 + $0x464] sm:$0xf0]  ;;  %v7472_v45 = vor.u32 %v9787_v35, %v7471_v33  ;;  %v9623_v46 = vld [vmem:[%s15421_s5 + $0x10c] sm:$0xf]  ;;  %v7700_v49 = vor.u32 %v9839_v39, %v7697_v41  ;;  %v7159_v35 = vld [vmem:[%s15421_s5 + $0x390] sm:$0xf] }
 0x159   :  { %v7248_v51 = vor.u32 %v9731_v44, %v7247_v43  ;;  %v7215_v56 = vld [vmem:[%s15421_s5 + $0x408] sm:$0xf]  ;;  %v9655_v14 = vld [vmem:[%s15421_s5 + $0x20c] sm:$0xf]  ;;  %v6935_v43 = vld [vmem:[%s15421_s5 + $0x1d0] sm:$0xf] }
 0x15a   :  { %2381 = vmatpush.bf16.msra.mxu3 %v6960_v53  ;;  %2405 = vmatpush.bf16.msrb.mxu1 %v7600_v54  ;;  %v9831_v53 = vld [vmem:[%s15421_s5 + $0x78c] sm:$0xf]  ;;  %v9723_v57 = vld [vmem:[%s15421_s5 + $0x424] sm:$0xf0]  ;;  %v9652_v44 = vld [vmem:[%s15421_s5 + $0x1ec] sm:$0xf0] }
 0x15b   :  { %v7665_v54 = vld [vmem:[%s15421_s5 + $0x7a8] sm:$0xf0]  ;;  %v7216_v1 = vor.u32 %v9723_v57, %v7215_v56  ;;  %v6936_v52 = vor.u32 %v9652_v44, %v6935_v43  ;;  %v6903_v56 = vld [vmem:[%s15421_s5 + $0x190] sm:$0xf] }
 0x15c   :  { %2366 = vmatpush.bf16.msra.mxu2 %v6736_v58  ;;  %2390 = vmatpush.bf16.msrb.mxu0 %v7376_v59  ;;  %v9615_v58 = vld [vmem:[%s15421_s5 + $0xcc] sm:$0xf]  ;;  %v7668_v63 = vor.u32 %v9831_v53, %v7665_v54  ;;  %v9644_v57 = vld [vmem:[%s15421_s5 + $0x1ac] sm:$0xf0] }
 0x15d   :  { %2354 = vmatmul.bf16.vlgmr.msra.gmra.mxu1 %v11334_v10  ;;  %2382 = vmatmul.bf16.vlgmr.msra.gmra.mxu3 %v11269_v23  ;;  %v6801_v59 = vld [vmem:[%s15421_s5 + $0xe8] sm:$0xf0] }
 0x15e   :  { %2430 = vmatpush.bf16.msrb.mxu3 %v7188_v55  ;;  %2406 = vmatpush.bf16.msrb.mxu1 %v7568_v2  ;;  %v6836_v55 = vor.u32 %v9623_v46, %v6833_v47  ;;  %v6993_v2 = vld [vmem:[%s15421_s5 + $0x268] sm:$0xf0] }
 0x15f   :  { %v6996_v12 = vor.u32 %v9663_v0, %v6993_v2  ;;  %v6961_v15 = vld [vmem:[%s15421_s5 + $0x228] sm:$0xf0]  ;;  %v6904_v0 = vor.u32 %v9644_v57, %v6903_v56  ;;  %v9820_v56 = vld [vmem:[%s15421_s5 + $0x72c] sm:$0xf0] }
 0x160   :  { %2367 = vmatpush.bf16.msra.mxu2 %v6704_v8  ;;  %2391 = vmatpush.bf16.msrb.mxu0 %v7344_v9  ;;  %v6769_v8 = vld [vmem:[%s15421_s5 + $0xa8] sm:$0xf0]  ;;  %v6964_v27 = vor.u32 %v9655_v14, %v6961_v15  ;;  %v9844_v14 = vld [vmem:[%s15421_s5 + $0x7ec] sm:$0xf0] }
 0x161   :  { %v9767_v9 = vld [vmem:[%s15421_s5 + $0x58c] sm:$0xf]  ;;  %v6772_v18 = vor.u32 %v9607_v7, %v6769_v8 }
 0x162   :  { %2431 = vmatpush.bf16.msrb.mxu3 %v7156_v5  ;;  %2407 = vmatpush.bf16.msrb.mxu1 %v7536_v16  ;;  %v6804_v5 = vor.u32 %v9615_v58, %v6801_v59  ;;  %v9815_v16 = vld [vmem:[%s15421_s5 + $0x70c] sm:$0xf] }
 0x163   :  { %2340 = vmatmul.bf16.vlgmr.msra.gmra.mxu0 %v11374_v34  ;;  %2368 = vmatmul.bf16.vlgmr.msra.gmra.mxu2 %v11291_v40  ;;  %v7601_v17 = vld [vmem:[%s15421_s5 + $0x728] sm:$0xf0] }
 0x164   :  { %2416 = vmatpush.bf16.msrb.mxu2 %v6932_v13  ;;  %2392 = vmatpush.bf16.msrb.mxu0 %v7312_v22  ;;  %v7636_v13 = vor.u32 %v9823_v3, %v7633_v4  ;;  %v9599_v22 = vld [vmem:[%s15421_s5 + $0x4c] sm:$0xf]  ;;  %v7604_v28 = vor.u32 %v9815_v16, %v7601_v17  ;;  %v6871_v4 = vld [vmem:[%s15421_s5 + $0x150] sm:$0xf] }
 0x165   :  { %v6737_v24 = vld [vmem:[%s15421_s5 + $0x68] sm:$0xf0] }
 0x166   :  { %2432 = vmatpush.bf16.msrb.mxu3 %v7124_v19  ;;  %2408 = vmatpush.bf16.msrb.mxu1 %v7504_v29  ;;  %v7412_v19 = vor.u32 %v9767_v9, %v7409_v11  ;;  %v9759_v25 = vld [vmem:[%s15421_s5 + $0x54c] sm:$0xf]  ;;  %v7192_v29 = vor.u32 %v9716_v21, %v7191_v20  ;;  %v7063_v9 = vld [vmem:[%s15421_s5 + $0x2d0] sm:$0xf] }
 0x167   :  { %v9807_v30 = vld [vmem:[%s15421_s5 + $0x6cc] sm:$0xf]  ;;  %v9628_v20 = vld [vmem:[%s15421_s5 + $0x12c] sm:$0xf0] }
 0x168   :  { %2417 = vmatpush.bf16.msrb.mxu2 %v6900_v26  ;;  %2393 = vmatpush.bf16.msrb.mxu0 %v7280_v37  ;;  %v7377_v26 = vld [vmem:[%s15421_s5 + $0x568] sm:$0xf0] }
 0x169   :  { %v7569_v31 = vld [vmem:[%s15421_s5 + $0x6e8] sm:$0xf0]  ;;  %v7380_v33 = vor.u32 %v9759_v25, %v7377_v26  ;;  %v9676_v26 = vld [vmem:[%s15421_s5 + $0x2ac] sm:$0xf0] }
 0x16a   :  { %2433 = vmatpush.bf16.msrb.mxu3 %v7092_v32  ;;  %2409 = vmatpush.bf16.msrb.mxu1 %v7472_v45  ;;  %v6740_v32 = vor.u32 %v9599_v22, %v6737_v24  ;;  %v9591_v37 = vld [vmem:[%s15421_s5 + $0xc] sm:$0xf]  ;;  %v7160_v45 = vor.u32 %v9708_v36, %v7159_v35  ;;  %v7031_v24 = vld [vmem:[%s15421_s5 + $0x290] sm:$0xf] }
 0x16b   :  { %v6705_v38 = vld [vmem:[%s15421_s5 + $0x28] sm:$0xf0]  ;;  %v7447_v35 = vld [vmem:[%s15421_s5 + $0x5d0] sm:$0xf] }
 0x16c   :  { %2418 = vmatpush.bf16.msrb.mxu2 %v6868_v42  ;;  %2394 = vmatpush.bf16.msrb.mxu0 %v7248_v51  ;;  %v9751_v39 = vld [vmem:[%s15421_s5 + $0x50c] sm:$0xf]  ;;  %v7572_v42 = vor.u32 %v9807_v30, %v7569_v31  ;;  %v9700_v51 = vld [vmem:[%s15421_s5 + $0x36c] sm:$0xf0] }
 0x16d   :  { %2410 = vmatmul.bf16.vlgmr.msrb.gmra.mxu1 %v11334_v10  ;;  %v7345_v41 = vld [vmem:[%s15421_s5 + $0x528] sm:$0xf0]  ;;  %v7128_v58 = vor.u32 %v9700_v51, %v7127_v50  ;;  %v9780_v36 = vld [vmem:[%s15421_s5 + $0x5ec] sm:$0xf0] }
 0x16e   :  { %2434 = vmatpush.bf16.msrb.mxu3 %v7060_v48  ;;  %2458 = vmatpush.bf16.msra.mxu1 %v7700_v49  ;;  %v9799_v46 = vld [vmem:[%s15421_s5 + $0x68c] sm:$0xf]  ;;  %v6708_v48 = vor.u32 %v9591_v37, %v6705_v38  ;;  %v7348_v49 = vor.u32 %v9751_v39, %v7345_v41  ;;  %v7032_v37 = vor.u32 %v9676_v26, %v7031_v24  ;;  %v6999_v41 = vld [vmem:[%s15421_s5 + $0x250] sm:$0xf]  ;;  %v9696_v24 = vld [vmem:[%s15421_s5 + $0x354] sm:$0xf] }
 0x16f   :  { %v7537_v47 = vld [vmem:[%s15421_s5 + $0x6a8] sm:$0xf0]  ;;  %v7448_v44 = vor.u32 %v9780_v36, %v7447_v35  ;;  %v9772_v50 = vld [vmem:[%s15421_s5 + $0x5ac] sm:$0xf0]  ;;  %v7129_v26 = vld [vmem:[%s15421_s5 + $0x370] sm:$0xf0] }
 0x170   :  { %2419 = vmatpush.bf16.msrb.mxu2 %v6836_v55  ;;  %2395 = vmatpush.bf16.msrb.mxu0 %v7216_v1  ;;  %v9743_v53 = vld [vmem:[%s15421_s5 + $0x4cc] sm:$0xf]  ;;  %v7540_v55 = vor.u32 %v9799_v46, %v7537_v47  ;;  %v9828_v46 = vld [vmem:[%s15421_s5 + $0x76c] sm:$0xf0] }
 0x171   :  { %v7313_v54 = vld [vmem:[%s15421_s5 + $0x4e8] sm:$0xf0]  ;;  %v6775_v47 = vld [vmem:[%s15421_s5 + $0x90] sm:$0xf] }
 0x172   :  { %2435 = vmatpush.bf16.msrb.mxu3 %v7028_v62  ;;  %2459 = vmatpush.bf16.msra.mxu1 %v7668_v63  ;;  %v9791_v59 = vld [vmem:[%s15421_s5 + $0x64c] sm:$0xf]  ;;  %v7316_v61 = vor.u32 %v9743_v53, %v7313_v54  ;;  %v7095_v62 = vld [vmem:[%s15421_s5 + $0x310] sm:$0xf] }
 0x173   :  { %2396 = vmatmul.bf16.vlgmr.msrb.gmra.mxu0 %v11374_v34  ;;  %v7505_v60 = vld [vmem:[%s15421_s5 + $0x668] sm:$0xf0]  ;;  %v9692_v63 = vld [vmem:[%s15421_s5 + $0x32c] sm:$0xf0] }
 0x174   :  { %2420 = vmatpush.bf16.msrb.mxu2 %v6804_v5  ;;  %2444 = vmatpush.bf16.msra.mxu0 %v7444_v6  ;;  %v9735_v1 = vld [vmem:[%s15421_s5 + $0x48c] sm:$0xf]  ;;  %v7508_v3 = vor.u32 %v9791_v59, %v7505_v60  ;;  %v9636_v5 = vld [vmem:[%s15421_s5 + $0x16c] sm:$0xf0]  ;;  %v7096_v6 = vor.u32 %v9692_v63, %v7095_v62  ;;  %v9712_v59 = vld [vmem:[%s15421_s5 + $0x3d4] sm:$0xf] }
 0x175   :  { %v7281_v2 = vld [vmem:[%s15421_s5 + $0x4a8] sm:$0xf0]  ;;  %v6872_v15 = vor.u32 %v9636_v5, %v6871_v4  ;;  %v9660_v54 = vld [vmem:[%s15421_s5 + $0x22c] sm:$0xf0]  ;;  %v7193_v60 = vld [vmem:[%s15421_s5 + $0x3f0] sm:$0xf0] }
 0x176   :  { %2436 = vmatpush.bf16.msrb.mxu3 %v6996_v12  ;;  %2460 = vmatpush.bf16.msra.mxu1 %v7636_v13  ;;  %v9783_v7 = vld [vmem:[%s15421_s5 + $0x60c] sm:$0xf]  ;;  %v7284_v11 = vor.u32 %v9735_v1, %v7281_v2  ;;  %v9684_v12 = vld [vmem:[%s15421_s5 + $0x2ec] sm:$0xf0] }
 0x177   :  { %v7473_v8 = vld [vmem:[%s15421_s5 + $0x628] sm:$0xf0]  ;;  %v7703_v13 = vld [vmem:[%s15421_s5 + $0x7d0] sm:$0xf]  ;;  %v7064_v21 = vor.u32 %v9684_v12, %v7063_v9  ;;  %v7161_v9 = vld [vmem:[%s15421_s5 + $0x3b0] sm:$0xf0] }
 0x178   :  { %2421 = vmatpush.bf16.msrb.mxu2 %v6772_v18  ;;  %2445 = vmatpush.bf16.msra.mxu0 %v7412_v19  ;;  %v9727_v16 = vld [vmem:[%s15421_s5 + $0x44c] sm:$0xf]  ;;  %v7476_v18 = vor.u32 %v9783_v7, %v7473_v8  ;;  %v6839_v19 = vld [vmem:[%s15421_s5 + $0x110] sm:$0xf]  ;;  %v7704_v22 = vor.u32 %v9844_v14, %v7703_v13  ;;  %v9704_v8 = vld [vmem:[%s15421_s5 + $0x394] sm:$0xf] }
 0x179   :  { %v7249_v17 = vld [vmem:[%s15421_s5 + $0x468] sm:$0xf0]  ;;  %v9604_v62 = vld [vmem:[%s15421_s5 + $0x6c] sm:$0xf0] }
 0x17a   :  { %2437 = vmatpush.bf16.msrb.mxu3 %v6964_v27  ;;  %2461 = vmatpush.bf16.msra.mxu1 %v7604_v28  ;;  %v7252_v25 = vor.u32 %v9727_v16, %v7249_v17  ;;  %v7671_v27 = vld [vmem:[%s15421_s5 + $0x790] sm:$0xf]  ;;  %v9719_v30 = vld [vmem:[%s15421_s5 + $0x40c] sm:$0xf]  ;;  %v6937_v16 = vld [vmem:[%s15421_s5 + $0x1f0] sm:$0xf0] }
 0x17b   :  { %v9836_v28 = vld [vmem:[%s15421_s5 + $0x7ac] sm:$0xf0]  ;;  %v7217_v31 = vld [vmem:[%s15421_s5 + $0x428] sm:$0xf0] }
 0x17c   :  { %2422 = vmatpush.bf16.msrb.mxu2 %v6740_v32  ;;  %2446 = vmatpush.bf16.msra.mxu0 %v7380_v33  ;;  %v6807_v32 = vld [vmem:[%s15421_s5 + $0xd0] sm:$0xf]  ;;  %v7672_v38 = vor.u32 %v9836_v28, %v7671_v27  ;;  %v7220_v39 = vor.u32 %v9719_v30, %v7217_v31  ;;  %v6905_v30 = vld [vmem:[%s15421_s5 + $0x1b0] sm:$0xf0] }
 0x17d   :  { %2438 = vmatmul.bf16.vlgmr.msrb.gmra.mxu3 %v11269_v23  ;;  %v9620_v33 = vld [vmem:[%s15421_s5 + $0xec] sm:$0xf0] }
 0x17e   :  { %2486 = vmatpush.bf16.msra.mxu3 %v7192_v29  ;;  %2462 = vmatpush.bf16.msra.mxu1 %v7572_v42  ;;  %v6840_v29 = vor.u32 %v9628_v20, %v6839_v19  ;;  %v9668_v42 = vld [vmem:[%s15421_s5 + $0x26c] sm:$0xf0]  ;;  %v6808_v43 = vor.u32 %v9620_v33, %v6807_v32  ;;  %v7132_v32 = vor.u32 %v9696_v24, %v7129_v26  ;;  %v7417_v24 = vld [vmem:[%s15421_s5 + $0x5b0] sm:$0xf0] }
 0x17f   :  { %v7000_v51 = vor.u32 %v9668_v42, %v6999_v41  ;;  %v7383_v63 = vld [vmem:[%s15421_s5 + $0x550] sm:$0xf]  ;;  %v9656_v26 = vld [vmem:[%s15421_s5 + $0x214] sm:$0xf] }
 0x180   :  { %2423 = vmatpush.bf16.msrb.mxu2 %v6708_v48  ;;  %2447 = vmatpush.bf16.msra.mxu0 %v7348_v49  ;;  %v9612_v48 = vld [vmem:[%s15421_s5 + $0xac] sm:$0xf0] }
 0x181   :  { %v7415_v49 = vld [vmem:[%s15421_s5 + $0x590] sm:$0xf]  ;;  %v6776_v57 = vor.u32 %v9612_v48, %v6775_v47 }
 0x182   :  { %2487 = vmatpush.bf16.msra.mxu3 %v7160_v45  ;;  %2463 = vmatpush.bf16.msra.mxu1 %v7540_v55  ;;  %v7639_v45 = vld [vmem:[%s15421_s5 + $0x750] sm:$0xf] }
 0x183   :  { %2424 = vmatmul.bf16.vlgmr.msrb.gmra.mxu2 %v11291_v40  ;;  %v7640_v53 = vor.u32 %v9828_v46, %v7639_v45  ;;  %v7607_v55 = vld [vmem:[%s15421_s5 + $0x710] sm:$0xf] }
 0x184   :  { %2472 = vmatpush.bf16.msra.mxu2 %v6936_v52  ;;  %2448 = vmatpush.bf16.msra.mxu0 %v7316_v61  ;;  %v6967_v52 = vld [vmem:[%s15421_s5 + $0x210] sm:$0xf]  ;;  %v7608_v2 = vor.u32 %v9820_v56, %v7607_v55 }
 0x185   :  { %v6743_v61 = vld [vmem:[%s15421_s5 + $0x50] sm:$0xf]  ;;  %v6968_v1 = vor.u32 %v9660_v54, %v6967_v52  ;;  %v7705_v54 = vld [vmem:[%s15421_s5 + $0x7f0] sm:$0xf0] }
 0x186   :  { %2488 = vmatpush.bf16.msra.mxu3 %v7128_v58  ;;  %2464 = vmatpush.bf16.msra.mxu1 %v7508_v3  ;;  %v7416_v58 = vor.u32 %v9772_v50, %v7415_v49  ;;  %v7196_v3 = vor.u32 %v9712_v59, %v7193_v60  ;;  %v7575_v4 = vld [vmem:[%s15421_s5 + $0x6d0] sm:$0xf]  ;;  %v9680_v50 = vld [vmem:[%s15421_s5 + $0x2d4] sm:$0xf] }
 0x187   :  { %v9812_v5 = vld [vmem:[%s15421_s5 + $0x6ec] sm:$0xf0] }
 0x188   :  { %2473 = vmatpush.bf16.msra.mxu2 %v6904_v0  ;;  %2449 = vmatpush.bf16.msra.mxu0 %v7284_v11  ;;  %v9764_v0 = vld [vmem:[%s15421_s5 + $0x56c] sm:$0xf0]  ;;  %v7576_v17 = vor.u32 %v9812_v5, %v7575_v4 }
 0x189   :  { %v7384_v7 = vor.u32 %v9764_v0, %v7383_v63  ;;  %v6711_v11 = vld [vmem:[%s15421_s5 + $0x10] sm:$0xf]  ;;  %v7033_v63 = vld [vmem:[%s15421_s5 + $0x2b0] sm:$0xf0] }
 0x18a   :  { %2489 = vmatpush.bf16.msra.mxu3 %v7096_v6  ;;  %2465 = vmatpush.bf16.msra.mxu1 %v7476_v18  ;;  %v6744_v6 = vor.u32 %v9604_v62, %v6743_v61  ;;  %v9596_v12 = vld [vmem:[%s15421_s5 + $0x2c] sm:$0xf0]  ;;  %v7164_v18 = vor.u32 %v9704_v8, %v7161_v9  ;;  %v9672_v62 = vld [vmem:[%s15421_s5 + $0x294] sm:$0xf] }
 0x18b   :  { %v7351_v13 = vld [vmem:[%s15421_s5 + $0x510] sm:$0xf]  ;;  %v6712_v19 = vor.u32 %v9596_v12, %v6711_v11  ;;  %v9776_v8 = vld [vmem:[%s15421_s5 + $0x5d4] sm:$0xf]  ;;  %v7036_v11 = vor.u32 %v9672_v62, %v7033_v63  ;;  %v7135_v62 = vld [vmem:[%s15421_s5 + $0x358] sm:$0xf] }
 0x18c   :  { %2474 = vmatpush.bf16.msra.mxu2 %v6872_v15  ;;  %2450 = vmatpush.bf16.msra.mxu0 %v7252_v25  ;;  %v9756_v14 = vld [vmem:[%s15421_s5 + $0x52c] sm:$0xf0]  ;;  %v9648_v15 = vld [vmem:[%s15421_s5 + $0x1d4] sm:$0xf] }
 0x18d   :  { %2466 = vmatmul.bf16.vlgmr.msra.gmra.mxu1 %v11334_v10  ;;  %v7352_v20 = vor.u32 %v9756_v14, %v7351_v13  ;;  %v6940_v25 = vor.u32 %v9648_v15, %v6937_v16  ;;  %v7319_v27 = vld [vmem:[%s15421_s5 + $0x4d0] sm:$0xf]  ;;  %v7449_v9 = vld [vmem:[%s15421_s5 + $0x5f0] sm:$0xf0] }
 0x18e   :  { %2490 = vmatpush.bf16.msra.mxu3 %v7064_v21  ;;  %2514 = vmatpush.bf16.msrb.mxu1 %v7704_v22  ;;  %v7543_v21 = vld [vmem:[%s15421_s5 + $0x690] sm:$0xf]  ;;  %v9664_v15 = vld [vmem:[%s15421_s5 + $0x254] sm:$0xf] }
 0x18f   :  { %v9804_v22 = vld [vmem:[%s15421_s5 + $0x6ac] sm:$0xf0]  ;;  %v7001_v16 = vld [vmem:[%s15421_s5 + $0x270] sm:$0xf0] }
 0x190   :  { %2475 = vmatpush.bf16.msra.mxu2 %v6840_v29  ;;  %2451 = vmatpush.bf16.msra.mxu0 %v7220_v39  ;;  %v9748_v28 = vld [vmem:[%s15421_s5 + $0x4ec] sm:$0xf0]  ;;  %v9640_v29 = vld [vmem:[%s15421_s5 + $0x194] sm:$0xf]  ;;  %v7544_v31 = vor.u32 %v9804_v22, %v7543_v21 }
 0x191   :  { %v7320_v33 = vor.u32 %v9748_v28, %v7319_v27  ;;  %v7511_v35 = vld [vmem:[%s15421_s5 + $0x650] sm:$0xf]  ;;  %v7097_v39 = vld [vmem:[%s15421_s5 + $0x330] sm:$0xf0] }
 0x192   :  { %2491 = vmatpush.bf16.msra.mxu3 %v7032_v37  ;;  %2515 = vmatpush.bf16.msrb.mxu1 %v7672_v38  ;;  %v9796_v36 = vld [vmem:[%s15421_s5 + $0x66c] sm:$0xf0]  ;;  %v9688_v37 = vld [vmem:[%s15421_s5 + $0x314] sm:$0xf]  ;;  %v6908_v38 = vor.u32 %v9640_v29, %v6905_v30 }
 0x193   :  { %2452 = vmatmul.bf16.vlgmr.msra.gmra.mxu0 %v11374_v34  ;;  %v7287_v41 = vld [vmem:[%s15421_s5 + $0x490] sm:$0xf]  ;;  %v7512_v45 = vor.u32 %v9796_v36, %v7511_v35  ;;  %v7100_v47 = vor.u32 %v9688_v37, %v7097_v39  ;;  %v6777_v21 = vld [vmem:[%s15421_s5 + $0xb0] sm:$0xf0]  ;;  %v9717_v35 = vld [vmem:[%s15421_s5 + $0x3f4] sm:$0xf0] }
 0x194   :  { %2476 = vmatpush.bf16.msra.mxu2 %v6808_v43  ;;  %2500 = vmatpush.bf16.msrb.mxu0 %v7448_v44  ;;  %v9740_v42 = vld [vmem:[%s15421_s5 + $0x4ac] sm:$0xf0]  ;;  %v9632_v43 = vld [vmem:[%s15421_s5 + $0x154] sm:$0xf] }
 0x195   :  { %v6873_v44 = vld [vmem:[%s15421_s5 + $0x170] sm:$0xf0]  ;;  %v7479_v46 = vld [vmem:[%s15421_s5 + $0x610] sm:$0xf]  ;;  %v7288_v48 = vor.u32 %v9740_v42, %v7287_v41 }
 0x196   :  { %2492 = vmatpush.bf16.msra.mxu3 %v7000_v51  ;;  %2516 = vmatpush.bf16.msrb.mxu1 %v7640_v53  ;;  %v9788_v49 = vld [vmem:[%s15421_s5 + $0x62c] sm:$0xf0]  ;;  %v7065_v51 = vld [vmem:[%s15421_s5 + $0x2f0] sm:$0xf0]  ;;  %v6876_v52 = vor.u32 %v9632_v43, %v6873_v44 }
 0x197   :  { %v9840_v53 = vld [vmem:[%s15421_s5 + $0x7d4] sm:$0xf]  ;;  %v7255_v55 = vld [vmem:[%s15421_s5 + $0x450] sm:$0xf]  ;;  %v7480_v59 = vor.u32 %v9788_v49, %v7479_v46  ;;  %v7068_v60 = vor.u32 %v9680_v50, %v7065_v51  ;;  %v9709_v49 = vld [vmem:[%s15421_s5 + $0x3b4] sm:$0xf0] }
 0x198   :  { %2477 = vmatpush.bf16.msra.mxu2 %v6776_v57  ;;  %2501 = vmatpush.bf16.msrb.mxu0 %v7416_v58  ;;  %v9732_v56 = vld [vmem:[%s15421_s5 + $0x46c] sm:$0xf0]  ;;  %v9624_v57 = vld [vmem:[%s15421_s5 + $0x114] sm:$0xf]  ;;  %v7708_v61 = vor.u32 %v9840_v53, %v7705_v54  ;;  %v6943_v54 = vld [vmem:[%s15421_s5 + $0x1d8] sm:$0xf] }
 0x199   :  { %v6841_v58 = vld [vmem:[%s15421_s5 + $0x130] sm:$0xf0]  ;;  %v7256_v0 = vor.u32 %v9732_v56, %v7255_v55  ;;  %v7223_v4 = vld [vmem:[%s15421_s5 + $0x410] sm:$0xf]  ;;  %v9653_v55 = vld [vmem:[%s15421_s5 + $0x1f4] sm:$0xf0] }
 0x19a   :  { %2493 = vmatpush.bf16.msra.mxu3 %v6968_v1  ;;  %2517 = vmatpush.bf16.msrb.mxu1 %v7608_v2  ;;  %v6844_v1 = vor.u32 %v9624_v57, %v6841_v58  ;;  %v9832_v2 = vld [vmem:[%s15421_s5 + $0x794] sm:$0xf]  ;;  %v9724_v5 = vld [vmem:[%s15421_s5 + $0x42c] sm:$0xf0]  ;;  %v6944_v63 = vor.u32 %v9653_v55, %v6943_v54  ;;  %v7007_v54 = vld [vmem:[%s15421_s5 + $0x258] sm:$0xf] }
 0x19b   :  { %v7224_v13 = vor.u32 %v9724_v5, %v7223_v4  ;;  %v9768_v22 = vld [vmem:[%s15421_s5 + $0x594] sm:$0xf]  ;;  %v9645_v4 = vld [vmem:[%s15421_s5 + $0x1b4] sm:$0xf0] }
 0x19c   :  { %2478 = vmatpush.bf16.msra.mxu2 %v6744_v6  ;;  %2502 = vmatpush.bf16.msrb.mxu0 %v7384_v7  ;;  %v9616_v6 = vld [vmem:[%s15421_s5 + $0xd4] sm:$0xf]  ;;  %v9669_v55 = vld [vmem:[%s15421_s5 + $0x274] sm:$0xf0] }
 0x19d   :  { %2494 = vmatmul.bf16.vlgmr.msra.gmra.mxu3 %v11269_v23  ;;  %v6809_v7 = vld [vmem:[%s15421_s5 + $0xf0] sm:$0xf0] }
 0x19e   :  { %2542 = vmatpush.bf16.msrb.mxu3 %v7196_v3  ;;  %2518 = vmatpush.bf16.msrb.mxu1 %v7576_v17  ;;  %v7673_v3 = vld [vmem:[%s15421_s5 + $0x7b0] sm:$0xf0]  ;;  %v6812_v14 = vor.u32 %v9616_v6, %v6809_v7 }
 0x19f   :  { %v7676_v12 = vor.u32 %v9832_v2, %v7673_v3  ;;  %v9824_v17 = vld [vmem:[%s15421_s5 + $0x754] sm:$0xf]  ;;  %v6911_v3 = vld [vmem:[%s15421_s5 + $0x198] sm:$0xf] }
 0x1a0   :  { %2479 = vmatpush.bf16.msra.mxu2 %v6712_v19  ;;  %2503 = vmatpush.bf16.msrb.mxu0 %v7352_v20  ;;  %v7641_v19 = vld [vmem:[%s15421_s5 + $0x770] sm:$0xf0] }
 0x1a1   :  { %v9608_v20 = vld [vmem:[%s15421_s5 + $0x94] sm:$0xf]  ;;  %v7644_v27 = vor.u32 %v9824_v17, %v7641_v19  ;;  %v9637_v17 = vld [vmem:[%s15421_s5 + $0x174] sm:$0xf0] }
 0x1a2   :  { %2543 = vmatpush.bf16.msrb.mxu3 %v7164_v18  ;;  %2519 = vmatpush.bf16.msrb.mxu1 %v7544_v31  ;;  %v7452_v18 = vor.u32 %v9776_v8, %v7449_v9  ;;  %v6780_v28 = vor.u32 %v9608_v20, %v6777_v21  ;;  %v6969_v29 = vld [vmem:[%s15421_s5 + $0x230] sm:$0xf0] }
 0x1a3   :  { %2480 = vmatmul.bf16.vlgmr.msra.gmra.mxu2 %v11291_v40  ;;  %v9816_v30 = vld [vmem:[%s15421_s5 + $0x714] sm:$0xf]  ;;  %v6972_v41 = vor.u32 %v9656_v26, %v6969_v29 }
 0x1a4   :  { %2528 = vmatpush.bf16.msrb.mxu2 %v6940_v25  ;;  %2504 = vmatpush.bf16.msrb.mxu0 %v7320_v33  ;;  %v7004_v25 = vor.u32 %v9664_v15, %v7001_v16  ;;  %v7609_v31 = vld [vmem:[%s15421_s5 + $0x730] sm:$0xf0]  ;;  %v7199_v33 = vld [vmem:[%s15421_s5 + $0x3d8] sm:$0xf] }
 0x1a5   :  { %v9600_v36 = vld [vmem:[%s15421_s5 + $0x54] sm:$0xf]  ;;  %v7612_v42 = vor.u32 %v9816_v30, %v7609_v31  ;;  %v7200_v43 = vor.u32 %v9717_v35, %v7199_v33  ;;  %v6879_v16 = vld [vmem:[%s15421_s5 + $0x158] sm:$0xf] }
 0x1a6   :  { %2544 = vmatpush.bf16.msrb.mxu3 %v7132_v32  ;;  %2520 = vmatpush.bf16.msrb.mxu1 %v7512_v45  ;;  %v7420_v32 = vor.u32 %v9768_v22, %v7417_v24  ;;  %v6745_v37 = vld [vmem:[%s15421_s5 + $0x70] sm:$0xf0]  ;;  %v7071_v24 = vld [vmem:[%s15421_s5 + $0x2d8] sm:$0xf]  ;;  %v6880_v26 = vor.u32 %v9637_v17, %v6879_v16 }
 0x1a7   :  { %v7385_v39 = vld [vmem:[%s15421_s5 + $0x570] sm:$0xf0]  ;;  %v6748_v46 = vor.u32 %v9600_v36, %v6745_v37  ;;  %v6847_v31 = vld [vmem:[%s15421_s5 + $0x118] sm:$0xf] }
 0x1a8   :  { %2529 = vmatpush.bf16.msrb.mxu2 %v6908_v38  ;;  %2505 = vmatpush.bf16.msrb.mxu0 %v7288_v48  ;;  %v9760_v38 = vld [vmem:[%s15421_s5 + $0x554] sm:$0xf]  ;;  %v7167_v48 = vld [vmem:[%s15421_s5 + $0x398] sm:$0xf] }
 0x1a9   :  { %v9808_v44 = vld [vmem:[%s15421_s5 + $0x6d4] sm:$0xf]  ;;  %v7168_v57 = vor.u32 %v9709_v49, %v7167_v48  ;;  %v7039_v37 = vld [vmem:[%s15421_s5 + $0x298] sm:$0xf] }
 0x1aa   :  { %2545 = vmatpush.bf16.msrb.mxu3 %v7100_v47  ;;  %2521 = vmatpush.bf16.msrb.mxu1 %v7480_v59  ;;  %v7577_v45 = vld [vmem:[%s15421_s5 + $0x6f0] sm:$0xf0]  ;;  %v7388_v47 = vor.u32 %v9760_v38, %v7385_v39  ;;  %v9677_v38 = vld [vmem:[%s15421_s5 + $0x2b4] sm:$0xf0] }
 0x1ab   :  { %v9592_v50 = vld [vmem:[%s15421_s5 + $0x14] sm:$0xf]  ;;  %v7580_v56 = vor.u32 %v9808_v44, %v7577_v45  ;;  %v7455_v48 = vld [vmem:[%s15421_s5 + $0x5d8] sm:$0xf] }
 0x1ac   :  { %2530 = vmatpush.bf16.msrb.mxu2 %v6876_v52  ;;  %2506 = vmatpush.bf16.msrb.mxu0 %v7256_v0  ;;  %v6713_v51 = vld [vmem:[%s15421_s5 + $0x30] sm:$0xf0]  ;;  %v9701_v0 = vld [vmem:[%s15421_s5 + $0x374] sm:$0xf0] }
 0x1ad   :  { %2522 = vmatmul.bf16.vlgmr.msrb.gmra.mxu1 %v11334_v10  ;;  %v9752_v52 = vld [vmem:[%s15421_s5 + $0x514] sm:$0xf]  ;;  %v6716_v58 = vor.u32 %v9592_v50, %v6713_v51  ;;  %v7136_v6 = vor.u32 %v9701_v0, %v7135_v62  ;;  %v9781_v49 = vld [vmem:[%s15421_s5 + $0x5f4] sm:$0xf0]  ;;  %v7040_v50 = vor.u32 %v9677_v38, %v7039_v37 }
 0x1ae   :  { %2546 = vmatpush.bf16.msrb.mxu3 %v7068_v60  ;;  %2570 = vmatpush.bf16.msra.mxu1 %v7708_v61  ;;  %v7353_v53 = vld [vmem:[%s15421_s5 + $0x530] sm:$0xf0]  ;;  %v9773_v62 = vld [vmem:[%s15421_s5 + $0x5b4] sm:$0xf0] }
 0x1af   :  { %v7356_v59 = vor.u32 %v9752_v52, %v7353_v53  ;;  %v9800_v60 = vld [vmem:[%s15421_s5 + $0x694] sm:$0xf]  ;;  %v6975_v0 = vld [vmem:[%s15421_s5 + $0x218] sm:$0xf] }
 0x1b0   :  { %2531 = vmatpush.bf16.msrb.mxu2 %v6844_v1  ;;  %2507 = vmatpush.bf16.msrb.mxu0 %v7224_v13  ;;  %v7545_v61 = vld [vmem:[%s15421_s5 + $0x6b0] sm:$0xf0]  ;;  %v9693_v13 = vld [vmem:[%s15421_s5 + $0x334] sm:$0xf0] }
 0x1b1   :  { %v9744_v1 = vld [vmem:[%s15421_s5 + $0x4d4] sm:$0xf]  ;;  %v7548_v5 = vor.u32 %v9800_v60, %v7545_v61  ;;  %v9613_v60 = vld [vmem:[%s15421_s5 + $0xb4] sm:$0xf0] }
 0x1b2   :  { %2547 = vmatpush.bf16.msrb.mxu3 %v7036_v11  ;;  %2571 = vmatpush.bf16.msra.mxu1 %v7676_v12  ;;  %v7321_v2 = vld [vmem:[%s15421_s5 + $0x4f0] sm:$0xf0]  ;;  %v7103_v11 = vld [vmem:[%s15421_s5 + $0x318] sm:$0xf]  ;;  %v6912_v12 = vor.u32 %v9645_v4, %v6911_v3 }
 0x1b3   :  { %2508 = vmatmul.bf16.vlgmr.msrb.gmra.mxu0 %v11374_v34  ;;  %v7324_v7 = vor.u32 %v9744_v1, %v7321_v2  ;;  %v9792_v8 = vld [vmem:[%s15421_s5 + $0x654] sm:$0xf]  ;;  %v7104_v20 = vor.u32 %v9693_v13, %v7103_v11  ;;  %v7423_v61 = vld [vmem:[%s15421_s5 + $0x598] sm:$0xf] }
 0x1b4   :  { %2532 = vmatpush.bf16.msrb.mxu2 %v6812_v14  ;;  %2556 = vmatpush.bf16.msra.mxu0 %v7452_v18  ;;  %v7513_v9 = vld [vmem:[%s15421_s5 + $0x670] sm:$0xf0]  ;;  %v9661_v4 = vld [vmem:[%s15421_s5 + $0x234] sm:$0xf0] }
 0x1b5   :  { %v9736_v14 = vld [vmem:[%s15421_s5 + $0x494] sm:$0xf]  ;;  %v7516_v18 = vor.u32 %v9792_v8, %v7513_v9  ;;  %v9713_v8 = vld [vmem:[%s15421_s5 + $0x3dc] sm:$0xf]  ;;  %v6751_v11 = vld [vmem:[%s15421_s5 + $0x58] sm:$0xf] }
 0x1b6   :  { %2548 = vmatpush.bf16.msrb.mxu3 %v7004_v25  ;;  %2572 = vmatpush.bf16.msra.mxu1 %v7644_v27  ;;  %v7289_v15 = vld [vmem:[%s15421_s5 + $0x4b0] sm:$0xf0]  ;;  %v9685_v25 = vld [vmem:[%s15421_s5 + $0x2f4] sm:$0xf0]  ;;  %v7201_v9 = vld [vmem:[%s15421_s5 + $0x3f8] sm:$0xf0] }
 0x1b7   :  { %v9784_v19 = vld [vmem:[%s15421_s5 + $0x614] sm:$0xf]  ;;  %v7292_v21 = vor.u32 %v9736_v14, %v7289_v15  ;;  %v7711_v27 = vld [vmem:[%s15421_s5 + $0x7d8] sm:$0xf]  ;;  %v7072_v35 = vor.u32 %v9685_v25, %v7071_v24  ;;  %v6976_v15 = vor.u32 %v9661_v4, %v6975_v0  ;;  %v7204_v17 = vor.u32 %v9713_v8, %v7201_v9  ;;  %v7169_v24 = vld [vmem:[%s15421_s5 + $0x3b8] sm:$0xf0] }
 0x1b8   :  { %2533 = vmatpush.bf16.msrb.mxu2 %v6780_v28  ;;  %2557 = vmatpush.bf16.msra.mxu0 %v7420_v32  ;;  %v7481_v22 = vld [vmem:[%s15421_s5 + $0x630] sm:$0xf0]  ;;  %v9845_v28 = vld [vmem:[%s15421_s5 + $0x7f4] sm:$0xf0]  ;;  %v9841_v8 = vld [vmem:[%s15421_s5 + $0x7dc] sm:$0xf] }
 0x1b9   :  { %v9728_v29 = vld [vmem:[%s15421_s5 + $0x454] sm:$0xf]  ;;  %v9629_v32 = vld [vmem:[%s15421_s5 + $0x134] sm:$0xf0]  ;;  %v7484_v33 = vor.u32 %v9784_v19, %v7481_v22  ;;  %v7712_v36 = vor.u32 %v9845_v28, %v7711_v27  ;;  %v9705_v22 = vld [vmem:[%s15421_s5 + $0x39c] sm:$0xf] }
 0x1ba   :  { %2549 = vmatpush.bf16.msrb.mxu3 %v6972_v41  ;;  %2573 = vmatpush.bf16.msra.mxu1 %v7612_v42  ;;  %v7257_v30 = vld [vmem:[%s15421_s5 + $0x470] sm:$0xf0]  ;;  %v6848_v41 = vor.u32 %v9629_v32, %v6847_v31  ;;  %v7679_v42 = vld [vmem:[%s15421_s5 + $0x798] sm:$0xf]  ;;  %v6945_v31 = vld [vmem:[%s15421_s5 + $0x1f8] sm:$0xf0] }
 0x1bb   :  { %v7260_v39 = vor.u32 %v9728_v29, %v7257_v30  ;;  %v9720_v44 = vld [vmem:[%s15421_s5 + $0x414] sm:$0xf]  ;;  %v7391_v13 = vld [vmem:[%s15421_s5 + $0x558] sm:$0xf]  ;;  %v9649_v30 = vld [vmem:[%s15421_s5 + $0x1dc] sm:$0xf] }
 0x1bc   :  { %2534 = vmatpush.bf16.msrb.mxu2 %v6748_v46  ;;  %2558 = vmatpush.bf16.msra.mxu0 %v7388_v47  ;;  %v7225_v45 = vld [vmem:[%s15421_s5 + $0x430] sm:$0xf0]  ;;  %v6815_v46 = vld [vmem:[%s15421_s5 + $0xd8] sm:$0xf]  ;;  %v7713_v9 = vld [vmem:[%s15421_s5 + $0x7f8] sm:$0xf0] }
 0x1bd   :  { %2550 = vmatmul.bf16.vlgmr.msrb.gmra.mxu3 %v11269_v23  ;;  %v9621_v47 = vld [vmem:[%s15421_s5 + $0xf4] sm:$0xf0]  ;;  %v7228_v52 = vor.u32 %v9720_v44, %v7225_v45  ;;  %v6948_v44 = vor.u32 %v9649_v30, %v6945_v31  ;;  %v7137_v45 = vld [vmem:[%s15421_s5 + $0x378] sm:$0xf0] }
 0x1be   :  { %2598 = vmatpush.bf16.msra.mxu3 %v7200_v43  ;;  %2574 = vmatpush.bf16.msra.mxu1 %v7580_v56  ;;  %v9837_v43 = vld [vmem:[%s15421_s5 + $0x7b4] sm:$0xf0]  ;;  %v6816_v53 = vor.u32 %v9621_v47, %v6815_v46  ;;  %v9617_v31 = vld [vmem:[%s15421_s5 + $0xdc] sm:$0xf] }
 0x1bf   :  { %v7680_v51 = vor.u32 %v9837_v43, %v7679_v42  ;;  %v7647_v56 = vld [vmem:[%s15421_s5 + $0x758] sm:$0xf] }
 0x1c0   :  { %2535 = vmatpush.bf16.msrb.mxu2 %v6716_v58  ;;  %2559 = vmatpush.bf16.msra.mxu0 %v7356_v59  ;;  %v9829_v58 = vld [vmem:[%s15421_s5 + $0x774] sm:$0xf0] }
 0x1c1   :  { %v6783_v59 = vld [vmem:[%s15421_s5 + $0x98] sm:$0xf]  ;;  %v7648_v2 = vor.u32 %v9829_v58, %v7647_v56 }
 0x1c2   :  { %2599 = vmatpush.bf16.msra.mxu3 %v7168_v57  ;;  %2575 = vmatpush.bf16.msra.mxu1 %v7548_v5  ;;  %v7456_v57 = vor.u32 %v9781_v49, %v7455_v48  ;;  %v6784_v3 = vor.u32 %v9613_v60, %v6783_v59  ;;  %v7615_v5 = vld [vmem:[%s15421_s5 + $0x718] sm:$0xf]  ;;  %v9641_v48 = vld [vmem:[%s15421_s5 + $0x19c] sm:$0xf] }
 0x1c3   :  { %2536 = vmatmul.bf16.vlgmr.msrb.gmra.mxu2 %v11291_v40  ;;  %v9765_v14 = vld [vmem:[%s15421_s5 + $0x574] sm:$0xf0]  ;;  %v6913_v49 = vld [vmem:[%s15421_s5 + $0x1b8] sm:$0xf0] }
 0x1c4   :  { %2584 = vmatpush.bf16.msra.mxu2 %v6944_v63  ;;  %2560 = vmatpush.bf16.msra.mxu0 %v7324_v7  ;;  %v7008_v63 = vor.u32 %v9669_v55, %v7007_v54  ;;  %v7424_v7 = vor.u32 %v9773_v62, %v7423_v61  ;;  %v9813_v19 = vld [vmem:[%s15421_s5 + $0x6f4] sm:$0xf0]  ;;  %v9689_v55 = vld [vmem:[%s15421_s5 + $0x31c] sm:$0xf]  ;;  %v6916_v56 = vor.u32 %v9641_v48, %v6913_v49 }
 0x1c5   :  { %v6719_v25 = vld [vmem:[%s15421_s5 + $0x18] sm:$0xf]  ;;  %v9633_v60 = vld [vmem:[%s15421_s5 + $0x15c] sm:$0xf] }
 0x1c6   :  { %2600 = vmatpush.bf16.msra.mxu3 %v7136_v6  ;;  %2576 = vmatpush.bf16.msra.mxu1 %v7516_v18  ;;  %v12175_v1 = vpop.f32.mrf.mxu2  ;;  %v9821_v6 = vld [vmem:[%s15421_s5 + $0x734] sm:$0xf0]  ;;  %v6881_v61 = vld [vmem:[%s15421_s5 + $0x178] sm:$0xf0] }
 0x1c7   :  { %v7616_v16 = vor.u32 %v9821_v6, %v7615_v5  ;;  %v7583_v18 = vld [vmem:[%s15421_s5 + $0x6d8] sm:$0xf]  ;;  %v9681_v5 = vld [vmem:[%s15421_s5 + $0x2dc] sm:$0xf] }
 0x1c8   :  { %2585 = vmatpush.bf16.msra.mxu2 %v6912_v12  ;;  %2561 = vmatpush.bf16.msra.mxu0 %v7292_v21  ;;  %v9605_v12 = vld [vmem:[%s15421_s5 + $0x74] sm:$0xf0]  ;;  %v7392_v21 = vor.u32 %v9765_v14, %v7391_v13  ;;  %v7584_v32 = vor.u32 %v9813_v19, %v7583_v18  ;;  %v7073_v6 = vld [vmem:[%s15421_s5 + $0x2f8] sm:$0xf0] }
 0x1c9   :  { %v9597_v27 = vld [vmem:[%s15421_s5 + $0x34] sm:$0xf0]  ;;  %v9625_v14 = vld [vmem:[%s15421_s5 + $0x11c] sm:$0xf]  ;;  %v7076_v19 = vor.u32 %v9681_v5, %v7073_v6 }
 0x1ca   :  { %2601 = vmatpush.bf16.msra.mxu3 %v7104_v20  ;;  %2577 = vmatpush.bf16.msra.mxu1 %v7484_v33  ;;  %v6752_v20 = vor.u32 %v9605_v12, %v6751_v11  ;;  %v7359_v28 = vld [vmem:[%s15421_s5 + $0x518] sm:$0xf]  ;;  %v7172_v33 = vor.u32 %v9705_v22, %v7169_v24  ;;  %v7041_v22 = vld [vmem:[%s15421_s5 + $0x2b8] sm:$0xf0] }
 0x1cb   :  { %v9757_v29 = vld [vmem:[%s15421_s5 + $0x534] sm:$0xf0]  ;;  %v7649_v49 = vld [vmem:[%s15421_s5 + $0x778] sm:$0xf0] }
 0x1cc   :  { %2586 = vmatpush.bf16.msra.mxu2 %v6880_v26  ;;  %2562 = vmatpush.bf16.msra.mxu0 %v7260_v39  ;;  %v12220_v26 = vpop.f32.mrf.mxu3  ;;  %v7360_v37 = vor.u32 %v9757_v29, %v7359_v28  ;;  %v7551_v38 = vld [vmem:[%s15421_s5 + $0x698] sm:$0xf]  ;;  %v7681_v28 = vld [vmem:[%s15421_s5 + $0x7b8] sm:$0xf0] }
 0x1cd   :  { %2578 = vmatmul.bf16.vlgmr.msra.gmra.mxu1 %v11334_v10  ;;  %v9805_v39 = vld [vmem:[%s15421_s5 + $0x6b4] sm:$0xf0]  ;;  %v9601_v5 = vld [vmem:[%s15421_s5 + $0x5c] sm:$0xf] }
 0x1ce   :  { %2602 = vmatpush.bf16.msra.mxu3 %v7072_v35  ;;  %2626 = vmatpush.bf16.msrb.mxu1 %v7712_v36  ;;  %v12237_v35 = vpop.f32.mrf.mxu1  ;;  %v6720_v36 = vor.u32 %v9597_v27, %v6719_v25  ;;  %v12248_v42 = vpop.f32.mrf.mxu2  ;;  %v7327_v46 = vld [vmem:[%s15421_s5 + $0x4d8] sm:$0xf]  ;;  %v9833_v27 = vld [vmem:[%s15421_s5 + $0x79c] sm:$0xf] }
 0x1cf   :  { %v9749_v47 = vld [vmem:[%s15421_s5 + $0x4f4] sm:$0xf0]  ;;  %v6753_v6 = vld [vmem:[%s15421_s5 + $0x78] sm:$0xf0] }
 0x1d0   :  { %2587 = vmatpush.bf16.msra.mxu2 %v6848_v41  ;;  %2563 = vmatpush.bf16.msra.mxu0 %v7228_v52  ;;  %v9697_v41 = vld [vmem:[%s15421_s5 + $0x35c] sm:$0xf]  ;;  %v12250_v43 = vpop.f32.mrf.mxu0  ;;  %v7328_v52 = vor.u32 %v9749_v47, %v7327_v46  ;;  %v9797_v54 = vld [vmem:[%s15421_s5 + $0x674] sm:$0xf0] }
 0x1d1   :  { %v7295_v58 = vld [vmem:[%s15421_s5 + $0x498] sm:$0xf]  ;;  %v7009_v46 = vld [vmem:[%s15421_s5 + $0x278] sm:$0xf0] }
 0x1d2   :  { %2603 = vmatpush.bf16.msra.mxu3 %v7040_v50  ;;  %2627 = vmatpush.bf16.msrb.mxu1 %v7680_v51  ;;  %v7552_v50 = vor.u32 %v9805_v39, %v7551_v38  ;;  %v7140_v51 = vor.u32 %v9697_v41, %v7137_v45  ;;  %v9741_v59 = vld [vmem:[%s15421_s5 + $0x4b4] sm:$0xf0]  ;;  %v7684_v38 = vor.u32 %v9833_v27, %v7681_v28  ;;  %v9665_v45 = vld [vmem:[%s15421_s5 + $0x25c] sm:$0xf] }
 0x1d3   :  { %2564 = vmatmul.bf16.vlgmr.msra.gmra.mxu0 %v11374_v34  ;;  %v7487_v0 = vld [vmem:[%s15421_s5 + $0x618] sm:$0xf]  ;;  %v9825_v47 = vld [vmem:[%s15421_s5 + $0x75c] sm:$0xf] }
 0x1d4   :  { %2588 = vmatpush.bf16.msra.mxu2 %v6816_v53  ;;  %2612 = vmatpush.bf16.msrb.mxu0 %v7456_v57  ;;  %v7519_v53 = vld [vmem:[%s15421_s5 + $0x658] sm:$0xf]  ;;  %v7105_v57 = vld [vmem:[%s15421_s5 + $0x338] sm:$0xf0]  ;;  %v12292_v62 = vpop.f32.mrf.mxu3 }
 0x1d5   :  { %v9789_v4 = vld [vmem:[%s15421_s5 + $0x634] sm:$0xf0]  ;;  %v9753_v27 = vld [vmem:[%s15421_s5 + $0x51c] sm:$0xf] }
 0x1d6   :  { %2604 = vmatpush.bf16.msra.mxu3 %v7008_v63  ;;  %2628 = vmatpush.bf16.msrb.mxu1 %v7648_v2  ;;  %v7520_v63 = vor.u32 %v9797_v54, %v7519_v53  ;;  %v7108_v2 = vor.u32 %v9689_v55, %v7105_v57  ;;  %v7263_v11 = vld [vmem:[%s15421_s5 + $0x458] sm:$0xf]  ;;  %v12316_v12 = vpop.f32.mrf.mxu1  ;;  %v7488_v18 = vor.u32 %v9789_v4, %v7487_v0  ;;  %v7425_v53 = vld [vmem:[%s15421_s5 + $0x5b8] sm:$0xf0]  ;;  %v9954_v4 = vld [vmem:[%s15423_s7 + $0x360] sm:$0xf0] }
 0x1d7   :  { %v9733_v13 = vld [vmem:[%s15421_s5 + $0x474] sm:$0xf0]  ;;  %v7012_v55 = vor.u32 %v9665_v45, %v7009_v46  ;;  %v7617_v0 = vld [vmem:[%s15421_s5 + $0x738] sm:$0xf0] }
 0x1d8   :  { %2589 = vmatpush.bf16.msra.mxu2 %v6784_v3  ;;  %2613 = vmatpush.bf16.msrb.mxu0 %v7424_v7  ;;  %v7296_v3 = vor.u32 %v9741_v59, %v7295_v58  ;;  %v6884_v7 = vor.u32 %v9633_v60, %v6881_v61  ;;  %v7264_v24 = vor.u32 %v9733_v13, %v7263_v11  ;;  %v7231_v29 = vld [vmem:[%s15421_s5 + $0x418] sm:$0xf]  ;;  %v6977_v61 = vld [vmem:[%s15421_s5 + $0x238] sm:$0xf0] }
 0x1d9   :  { %v9725_v30 = vld [vmem:[%s15421_s5 + $0x434] sm:$0xf0]  ;;  %v7652_v59 = vor.u32 %v9825_v47, %v7649_v49  ;;  %v7361_v28 = vld [vmem:[%s15421_s5 + $0x538] sm:$0xf0] }
 0x1da   :  { %2605 = vmatpush.bf16.msra.mxu3 %v6976_v15  ;;  %2629 = vmatpush.bf16.msrb.mxu1 %v7616_v16  ;;  %v6849_v15 = vld [vmem:[%s15421_s5 + $0x138] sm:$0xf0]  ;;  %v12327_v16 = vpop.f32.mrf.mxu2  ;;  %v7232_v41 = vor.u32 %v9725_v30, %v7231_v29  ;;  %v7915_v29 = vld [vmem:[%s15423_s7 + $0x188] sm:$0xf]  ;;  %v9898_v30 = vld [vmem:[%s15423_s7 + $0x1a0] sm:$0xf0] }
 0x1db   :  { %v6852_v25 = vor.u32 %v9625_v14, %v6849_v15  ;;  %v9809_v14 = vld [vmem:[%s15421_s5 + $0x6dc] sm:$0xf]  ;;  %v7916_v47 = vor.u32 %v9898_v30, %v7915_v29  ;;  %v10066_v29 = vld [vmem:[%s15423_s7 + $0x6e0] sm:$0xf0] }
 0x1dc   :  { %2590 = vmatpush.bf16.msra.mxu2 %v6752_v20  ;;  %2614 = vmatpush.bf16.msrb.mxu0 %v7392_v21  ;;  %v7716_v20 = vor.u32 %v9841_v8, %v7713_v9  ;;  %v9673_v21 = vld [vmem:[%s15421_s5 + $0x29c] sm:$0xf]  ;;  %v12361_v39 = vpop.f32.mrf.mxu3 }
 0x1dd   :  { %2606 = vmatmul.bf16.vlgmr.msra.gmra.mxu3 %v11269_v23  ;;  %v7393_v8 = vld [vmem:[%s15421_s5 + $0x578] sm:$0xf0] }
 0x1de   :  { %2654 = vmatpush.bf16.msrb.mxu3 %v7204_v17  ;;  %2630 = vmatpush.bf16.msrb.mxu1 %v7584_v32  ;;  %v12329_v17 = vpop.f32.mrf.mxu0  ;;  %v6817_v32 = vld [vmem:[%s15421_s5 + $0xf8] sm:$0xf0]  ;;  %v12388_v54 = vpop.f32.mrf.mxu1 }
 0x1df   :  { %v7585_v15 = vld [vmem:[%s15421_s5 + $0x6f8] sm:$0xf0] }
 0x1e0   :  { %2591 = vmatpush.bf16.msra.mxu2 %v6720_v36  ;;  %2615 = vmatpush.bf16.msrb.mxu0 %v7360_v37  ;;  %v7457_v36 = vld [vmem:[%s15421_s5 + $0x5f8] sm:$0xf0]  ;;  %v7044_v37 = vor.u32 %v9673_v21, %v7041_v22  ;;  %v9947_v21 = vld [vmem:[%s15423_s7 + $0x328] sm:$0xf0] }
 0x1e1   :  { %v9593_v22 = vld [vmem:[%s15421_s5 + $0x1c] sm:$0xf] }
 0x1e2   :  { %2655 = vmatpush.bf16.msrb.mxu3 %v7172_v33  ;;  %2631 = vmatpush.bf16.msrb.mxu1 %v7552_v50  ;;  %v9777_v33 = vld [vmem:[%s15421_s5 + $0x5dc] sm:$0xf]  ;;  %v12393_v57 = vpop.f32.mrf.mxu2 }
 0x1e3   :  { %2592 = vmatmul.bf16.vlgmr.msra.gmra.mxu2 %v11291_v40  ;;  %v7460_v48 = vor.u32 %v9777_v33, %v7457_v36  ;;  %v9609_v50 = vld [vmem:[%s15421_s5 + $0x9c] sm:$0xf] }
 0x1e4   :  { %2640 = vmatpush.bf16.msrb.mxu2 %v6948_v44  ;;  %2616 = vmatpush.bf16.msrb.mxu0 %v7328_v52  ;;  %v6820_v44 = vor.u32 %v9617_v31, %v6817_v32  ;;  %v9769_v52 = vld [vmem:[%s15421_s5 + $0x59c] sm:$0xf]  ;;  %v7588_v31 = vor.u32 %v9809_v14, %v7585_v15  ;;  %v8027_v15 = vld [vmem:[%s15423_s7 + $0x268] sm:$0xf] }
 0x1e5   :  { %v9745_v49 = vld [vmem:[%s15421_s5 + $0x4dc] sm:$0xf] }
 0x1e6   :  { %2656 = vmatpush.bf16.msrb.mxu3 %v7140_v51  ;;  %2632 = vmatpush.bf16.msrb.mxu1 %v7520_v63  ;;  %v6785_v51 = vld [vmem:[%s15421_s5 + $0xb8] sm:$0xf0]  ;;  %v12395_v58 = vpop.f32.mrf.mxu0  ;;  %v12457_v33 = vpop.f32.mrf.mxu1 }
 0x1e7   :  { %v6788_v60 = vor.u32 %v9609_v50, %v6785_v51  ;;  %v9817_v63 = vld [vmem:[%s15421_s5 + $0x71c] sm:$0xf]  ;;  %v7887_v51 = vld [vmem:[%s15423_s7 + $0x150] sm:$0xf] }
 0x1e8   :  { %2641 = vmatpush.bf16.msrb.mxu2 %v6916_v56  ;;  %2617 = vmatpush.bf16.msrb.mxu0 %v7296_v3  ;;  %v9657_v56 = vld [vmem:[%s15421_s5 + $0x21c] sm:$0xf]  ;;  %v8139_v3 = vld [vmem:[%s15423_s7 + $0x348] sm:$0xf]  ;;  %v7620_v11 = vor.u32 %v9817_v63, %v7617_v0 }
 0x1e9   :  { %v6980_v9 = vor.u32 %v9657_v56, %v6977_v61  ;;  %v8140_v13 = vor.u32 %v9954_v4, %v8139_v3  ;;  %v7329_v50 = vld [vmem:[%s15421_s5 + $0x4f8] sm:$0xf0]  ;;  %v12509_v3 = vld [vmem:[%s15424_s6] sm:$0xff]  ;;  %v7859_v4 = vld [vmem:[%s15423_s7 + $0x118] sm:$0xf] }
 0x1ea   :  { %2657 = vmatpush.bf16.msrb.mxu3 %v7108_v2  ;;  %2633 = vmatpush.bf16.msrb.mxu1 %v7488_v18  ;;  %v7428_v2 = vor.u32 %v9769_v52, %v7425_v53  ;;  %v6756_v18 = vor.u32 %v9601_v5, %v6753_v6  ;;  %v12468_v45 = vpop.f32.mrf.mxu2  ;;  %v9793_v56 = vld [vmem:[%s15421_s5 + $0x65c] sm:$0xf]  ;;  %v9884_v5 = vld [vmem:[%s15423_s7 + $0x130] sm:$0xf0]  ;;  %v953_v6 = vperm.slane %v12509_v3, 1 }
 0x1eb   :  { %v9933_v63 = vld [vmem:[%s15423_s7 + $0x2b8] sm:$0xf0] }
 0x1ec   :  { %2642 = vmatpush.bf16.msrb.mxu2 %v6884_v7  ;;  %2618 = vmatpush.bf16.msrb.mxu0 %v7264_v24  ;;  %v9761_v7 = vld [vmem:[%s15421_s5 + $0x55c] sm:$0xf]  ;;  %v12440_v24 = vpop.f32.mrf.mxu3  ;;  %v2314_v30 = vadd.f32 %v12327_v16, %v953_v6  ;;  %v9919_v16 = vld [vmem:[%s15423_s7 + $0x248] sm:$0xf0] }
 0x1ed   :  { %2634 = vmatmul.bf16.vlgmr.msrb.gmra.mxu1 %v11334_v10  ;;  %v9737_v0 = vld [vmem:[%s15421_s5 + $0x49c] sm:$0xf] }
 0x1ee   :  { %2658 = vmatpush.bf16.msrb.mxu3 %v7076_v19  ;;  %2682 = vmatpush.bf16.msra.mxu1 %v7716_v20  ;;  %v7396_v19 = vor.u32 %v9761_v7, %v7393_v8  ;;  %v8111_v20 = vld [vmem:[%s15423_s7 + $0x310] sm:$0xf]  ;;  %v12470_v46 = vpop.f32.mrf.mxu0  ;;  %v7489_v14 = vld [vmem:[%s15421_s5 + $0x638] sm:$0xf0] }
 0x1ef   :  { %v8112_v32 = vor.u32 %v9947_v21, %v8111_v20  ;;  %v7265_v20 = vld [vmem:[%s15421_s5 + $0x478] sm:$0xf0]  ;;  %v7831_v21 = vld [vmem:[%s15423_s7 + $0xe0] sm:$0xf] }
 0x1f0   :  { %2643 = vmatpush.bf16.msrb.mxu2 %v6852_v25  ;;  %2619 = vmatpush.bf16.msrb.mxu0 %v7232_v41  ;;  %v6721_v25 = vld [vmem:[%s15421_s5 + $0x38] sm:$0xf0] }
 0x1f1   :  { %v6724_v36 = vor.u32 %v9593_v22, %v6721_v25  ;;  %v7553_v41 = vld [vmem:[%s15421_s5 + $0x6b8] sm:$0xf0]  ;;  %v2316_v22 = vadd.f32 %v12393_v57, %v953_v6  ;;  %v12543_v25 = vpop.f32.mrf.mxu1 }
 0x1f2   :  { %2659 = vmatpush.bf16.msrb.mxu3 %v7044_v37  ;;  %2683 = vmatpush.bf16.msra.mxu1 %v7684_v38  ;;  %v7364_v37 = vor.u32 %v9753_v27, %v7361_v28  ;;  %v9801_v38 = vld [vmem:[%s15421_s5 + $0x69c] sm:$0xf]  ;;  %v8587_v28 = vld [vmem:[%s15423_s7 + $0x6c8] sm:$0xf] }
 0x1f3   :  { %2620 = vmatmul.bf16.vlgmr.msrb.gmra.mxu0 %v11374_v34  ;;  %v7556_v52 = vor.u32 %v9801_v38, %v7553_v41  ;;  %v9877_v27 = vld [vmem:[%s15423_s7 + $0xf8] sm:$0xf0]  ;;  %v7999_v41 = vld [vmem:[%s15423_s7 + $0x230] sm:$0xf] }
 0x1f4   :  { %2644 = vmatpush.bf16.msrb.mxu2 %v6820_v44  ;;  %2668 = vmatpush.bf16.msra.mxu0 %v7460_v48  ;;  %v8083_v44 = vld [vmem:[%s15423_s7 + $0x2d8] sm:$0xf]  ;;  %v9940_v48 = vld [vmem:[%s15423_s7 + $0x2f0] sm:$0xf0]  ;;  %v12518_v7 = vpop.f32.mrf.mxu3 }
 0x1f5   :  { %v8084_v53 = vor.u32 %v9940_v48, %v8083_v44  ;;  %v7832_v44 = vor.u32 %v9877_v27, %v7831_v21  ;;  %v9721_v48 = vld [vmem:[%s15421_s5 + $0x41c] sm:$0xf] }
 0x1f6   :  { %2660 = vmatpush.bf16.msrb.mxu3 %v7012_v55  ;;  %2684 = vmatpush.bf16.msra.mxu1 %v7652_v59  ;;  %v7332_v55 = vor.u32 %v9745_v49, %v7329_v50  ;;  %v7521_v59 = vld [vmem:[%s15421_s5 + $0x678] sm:$0xf0]  ;;  %v7803_v50 = vld [vmem:[%s15423_s7 + $0xa8] sm:$0xf] }
 0x1f7   :  { %v7524_v8 = vor.u32 %v9793_v56, %v7521_v59  ;;  %v7233_v49 = vld [vmem:[%s15421_s5 + $0x438] sm:$0xf0]  ;;  %v2328_v56 = vadd.f32 %v12361_v39, %v2314_v30 }
 0x1f8   :  { %2645 = vmatpush.bf16.msrb.mxu2 %v6788_v60  ;;  %2669 = vmatpush.bf16.msra.mxu0 %v7428_v2  ;;  %v8055_v60 = vld [vmem:[%s15423_s7 + $0x2a0] sm:$0xf]  ;;  %v7297_v2 = vld [vmem:[%s15421_s5 + $0x4b8] sm:$0xf0] }
 0x1fa   :  { %2661 = vmatpush.bf16.msrb.mxu3 %v6980_v9  ;;  %2685 = vmatpush.bf16.msra.mxu1 %v7620_v11  ;;  %v9785_v9 = vld [vmem:[%s15421_s5 + $0x61c] sm:$0xf]  ;;  %v8056_v11 = vor.u32 %v9933_v63, %v8055_v60  ;;  %v8000_v60 = vor.u32 %v9919_v16, %v7999_v41  ;;  %v2342_v63 = vadd.f32 %v12395_v58, %v2328_v56  ;;  %v10178_v41 = vld [vmem:[%s15423_s7 + $0xa60] sm:$0xf0]  ;;  %v8475_v56 = vld [vmem:[%s15423_s7 + $0x5e8] sm:$0xf] }
 0x1fb   :  { %v7492_v57 = vor.u32 %v9785_v9, %v7489_v14  ;;  %v9863_v9 = vld [vmem:[%s15423_s7 + $0x88] sm:$0xf0] }
 0x1fc   :  { %2646 = vmatpush.bf16.msrb.mxu2 %v6756_v18  ;;  %2670 = vmatpush.bf16.msra.mxu0 %v7396_v19  ;;  %v7860_v18 = vor.u32 %v9884_v5, %v7859_v4  ;;  %v9729_v19 = vld [vmem:[%s15421_s5 + $0x45c] sm:$0xf]  ;;  %v7971_v4 = vld [vmem:[%s15423_s7 + $0x1f8] sm:$0xf]  ;;  %v7775_v5 = vld [vmem:[%s15423_s7 + $0x70] sm:$0xf]  ;;  %v2356_v21 = vadd.f32 %v12388_v54, %v2342_v63 }
 0x1fd   :  { %2662 = vmatmul.bf16.vlgmr.msrb.gmra.mxu3 %v11269_v23  ;;  %v9891_v23 = vld [vmem:[%s15423_s7 + $0x168] sm:$0xf0]  ;;  %v7268_v38 = vor.u32 %v9729_v19, %v7265_v20  ;;  %v7943_v20 = vld [vmem:[%s15423_s7 + $0x1c0] sm:$0xf] }
 0x1fe   :  { %5566 = vmatpush.bf16.msra.mxu3 %v8140_v13  ;;  %2686 = vmatpush.bf16.msra.mxu1 %v7588_v31  ;;  %v7888_v61 = vor.u32 %v9891_v23, %v7887_v51  ;;  %v7300_v13 = vor.u32 %v9737_v0, %v7297_v2  ;;  %v12555_v31 = vpop.f32.mrf.mxu2  ;;  %v2330_v23 = vadd.f32 %v12440_v24, %v2316_v22  ;;  %v10059_v24 = vld [vmem:[%s15423_s7 + $0x6a8] sm:$0xf0]  ;;  %v12595_v0 = vpop.f32.mrf.mxu3 }
 0x200   :  { %2647 = vmatpush.bf16.msrb.mxu2 %v6724_v36  ;;  %2671 = vmatpush.bf16.msra.mxu0 %v7364_v37  ;;  %v952_v36 = vperm.slane %v12509_v3, 0  ;;  %v2344_v59 = vadd.f32 %v12470_v46, %v2330_v23  ;;  %v9912_v46 = vld [vmem:[%s15423_s7 + $0x210] sm:$0xf0] }
 0x201   :  { %v7972_v19 = vor.u32 %v9912_v46, %v7971_v4  ;;  %v10171_v4 = vld [vmem:[%s15423_s7 + $0xa28] sm:$0xf0] }
 0x202   :  { %5567 = vmatpush.bf16.msra.mxu3 %v8112_v32  ;;  %2687 = vmatpush.bf16.msra.mxu1 %v7556_v52  ;;  %v12557_v32 = vpop.f32.mrf.mxu0  ;;  %v2260_v51 = vadd.f32 %v12248_v42, %v952_v36  ;;  %v9870_v52 = vld [vmem:[%s15423_s7 + $0xc0] sm:$0xf0]  ;;  %v8559_v42 = vld [vmem:[%s15423_s7 + $0x690] sm:$0xf]  ;;  %v2258_v58 = vadd.f32 %v12175_v1, %v952_v36  ;;  %v8531_v1 = vld [vmem:[%s15423_s7 + $0x658] sm:$0xf] }
 0x203   :  { %2648 = vmatmul.bf16.vlgmr.msrb.gmra.mxu2 %v11291_v40  ;;  %v9926_v40 = vld [vmem:[%s15423_s7 + $0x280] sm:$0xf0]  ;;  %v7804_v39 = vor.u32 %v9870_v52, %v7803_v50  ;;  %v9996_v36 = vld [vmem:[%s15423_s7 + $0x4b0] sm:$0xf0]  ;;  %v955_v50 = vperm.slane %v12509_v3, 3 }
 0x204   :  { %5552 = vmatpush.bf16.msra.mxu2 %v7916_v47  ;;  %2672 = vmatpush.bf16.msra.mxu0 %v7332_v55  ;;  %v8028_v37 = vor.u32 %v9926_v40, %v8027_v15  ;;  %v8588_v47 = vor.u32 %v10066_v29, %v8587_v28  ;;  %v10010_v55 = vld [vmem:[%s15423_s7 + $0x520] sm:$0xf0]  ;;  %v2274_v6 = vadd.f32 %v12292_v62, %v2260_v51  ;;  %v954_v15 = vperm.slane %v12509_v3, 2  ;;  %v7747_v28 = vld [vmem:[%s15423_s7 + $0x38] sm:$0xf] }
 0x205   :  { %v2358_v40 = vadd.f32 %v12457_v33, %v2344_v59  ;;  %v9905_v33 = vld [vmem:[%s15423_s7 + $0x1d8] sm:$0xf0]  ;;  %v9856_v29 = vld [vmem:[%s15423_s7 + $0x50] sm:$0xf0]  ;;  %v2272_v54 = vadd.f32 %v12220_v26, %v2258_v58  ;;  %v7719_v52 = vld [vmem:[%s15423_s7] sm:$0xf] }
 0x206   :  { %5568 = vmatpush.bf16.msra.mxu3 %v8084_v53  ;;  %2688 = vmatpush.bf16.msra.mxu1 %v7524_v8  ;;  %v8363_v53 = vld [vmem:[%s15423_s7 + $0x508] sm:$0xf]  ;;  %v8560_v8 = vor.u32 %v10059_v24, %v8559_v42  ;;  %v2425_v14 = vpop.f32.mrf.mxu2  ;;  %v2288_v62 = vadd.f32 %v12329_v17, %v2274_v6  ;;  %v7776_v17 = vor.u32 %v9863_v9, %v7775_v5  ;;  %v10045_v26 = vld [vmem:[%s15423_s7 + $0x638] sm:$0xf0]  ;;  %v10038_v24 = vld [vmem:[%s15423_s7 + $0x600] sm:$0xf0] }
 0x207   :  { %v8364_v2 = vor.u32 %v10010_v55, %v8363_v53  ;;  %v2286_v16 = vadd.f32 %v12250_v43, %v2272_v54  ;;  %v7748_v51 = vor.u32 %v9856_v29, %v7747_v28  ;;  %v9849_v43 = vld [vmem:[%s15423_s7 + $0x18] sm:$0xf0]  ;;  %v8279_v53 = vld [vmem:[%s15423_s7 + $0x460] sm:$0xf]  ;;  %v8811_v59 = vld [vmem:[%s15423_s7 + $0x888] sm:$0xf]  ;;  %v2426_v5 = vadd.f32 %v2425_v14, %v955_v50 }
 0x208   :  { %5553 = vmatpush.bf16.msra.mxu2 %v7888_v61  ;;  %2673 = vmatpush.bf16.msra.mxu0 %v7300_v13  ;;  %v7236_v61 = vor.u32 %v9721_v48, %v7233_v49  ;;  %v10003_v13 = vld [vmem:[%s15423_s7 + $0x4e8] sm:$0xf0]  ;;  %v7944_v48 = vor.u32 %v9905_v33, %v7943_v20  ;;  %v2439_v49 = vpop.f32.mrf.mxu3  ;;  %v9989_v55 = vld [vmem:[%s15423_s7 + $0x478] sm:$0xf0]  ;;  %v8476_v9 = vor.u32 %v10038_v24, %v8475_v56  ;;  %v8447_v14 = vld [vmem:[%s15423_s7 + $0x5b0] sm:$0xf] }
 0x209   :  { %v10164_v33 = vld [vmem:[%s15423_s7 + $0x9f0] sm:$0xf0]  ;;  %v2440_v28 = vadd.f32 %v2439_v49, %v2426_v5  ;;  %v8223_v54 = vld [vmem:[%s15423_s7 + $0x3f0] sm:$0xf]  ;;  %v10157_v49 = vld [vmem:[%s15423_s7 + $0x9b8] sm:$0xf0] }
 0x20a   :  { %5569 = vmatpush.bf16.msra.mxu3 %v8056_v11  ;;  %2689 = vmatpush.bf16.msra.mxu1 %v7492_v57  ;;  %v8335_v11 = vld [vmem:[%s15423_s7 + $0x4d0] sm:$0xf]  ;;  %v12633_v22 = vpop.f32.mrf.mxu0  ;;  %v8307_v57 = vld [vmem:[%s15423_s7 + $0x498] sm:$0xf]  ;;  %v8727_v24 = vld [vmem:[%s15423_s7 + $0x7e0] sm:$0xf] }
 0x20b   :  { %v8336_v27 = vor.u32 %v10003_v13, %v8335_v11  ;;  %v8308_v23 = vor.u32 %v9996_v36, %v8307_v57  ;;  %v8251_v13 = vld [vmem:[%s15423_s7 + $0x428] sm:$0xf]  ;;  %v9975_v57 = vld [vmem:[%s15423_s7 + $0x408] sm:$0xf0]  ;;  %v8419_v36 = vld [vmem:[%s15423_s7 + $0x578] sm:$0xf] }
 0x20c   :  { %5554 = vmatpush.bf16.msra.mxu2 %v7860_v18  ;;  %2674 = vmatpush.bf16.msra.mxu0 %v7268_v38  ;;  %v12627_v18 = vpop.f32.mrf.mxu1  ;;  %v9035_v38 = vld [vmem:[%s15423_s7 + $0xa48] sm:$0xf]  ;;  %v8167_v5 = vld [vmem:[%s15423_s7 + $0x380] sm:$0xf] }
 0x20d   :  { %2690 = vmatmul.bf16.vlgmr.msra.gmra.mxu1 %v11334_v10  ;;  %v10052_v10 = vld [vmem:[%s15423_s7 + $0x670] sm:$0xf0]  ;;  %v9036_v42 = vor.u32 %v10178_v41, %v9035_v38 }
 0x20e   :  { %5570 = vmatpush.bf16.msra.mxu3 %v8028_v37  ;;  %5594 = vmatpush.bf16.msrb.mxu1 %v8588_v47  ;;  %v8532_v30 = vor.u32 %v10052_v10, %v8531_v1  ;;  %v8503_v37 = vld [vmem:[%s15423_s7 + $0x620] sm:$0xf]  ;;  %v2705_v47 = vmax.f32 %v2358_v40, 0.0  ;;  %v2427_v58 = vpop.f32.mrf.mxu2  ;;  %v9982_v1 = vld [vmem:[%s15423_s7 + $0x440] sm:$0xf0]  ;;  %v2370_v10 = vadd.f32 %v12468_v45, %v954_v15  ;;  %v2372_v45 = vadd.f32 %v12555_v31, %v954_v15 }
 0x20f   :  { %v8783_v40 = vld [vmem:[%s15423_s7 + $0x850] sm:$0xf]  ;;  %v8252_v29 = vor.u32 %v9982_v1, %v8251_v13  ;;  %v10094_v13 = vld [vmem:[%s15423_s7 + $0x7c0] sm:$0xf0] }
 0x210   :  { %5555 = vmatpush.bf16.msra.mxu2 %v7832_v44  ;;  %2675 = vmatpush.bf16.msra.mxu0 %v7236_v61  ;;  %v2302_v44 = vadd.f32 %v12316_v12, %v2288_v62  ;;  %v8504_v12 = vor.u32 %v10045_v26, %v8503_v37  ;;  %v2300_v61 = vadd.f32 %v12237_v35, %v2286_v16  ;;  %v10031_v62 = vld [vmem:[%s15423_s7 + $0x5c8] sm:$0xf0]  ;;  %v10024_v37 = vld [vmem:[%s15423_s7 + $0x590] sm:$0xf0]  ;;  %v2441_v38 = vpop.f32.mrf.mxu3  ;;  %v8755_v16 = vld [vmem:[%s15423_s7 + $0x818] sm:$0xf] }
 0x211   :  { %v7720_v35 = vor.u32 %v9849_v43, %v7719_v52  ;;  %v8448_v31 = vor.u32 %v10031_v62, %v8447_v14  ;;  %v2384_v26 = vadd.f32 %v12518_v7, %v2370_v10  ;;  %v8951_v7 = vld [vmem:[%s15423_s7 + $0x9a0] sm:$0xf]  ;;  %v8420_v52 = vor.u32 %v10024_v37, %v8419_v36  ;;  %v8895_v1 = vld [vmem:[%s15423_s7 + $0x930] sm:$0xf]  ;;  %v10143_v14 = vld [vmem:[%s15423_s7 + $0x948] sm:$0xf0] }
 0x212   :  { %5571 = vmatpush.bf16.msra.mxu3 %v8000_v60  ;;  %5595 = vmatpush.bf16.msrb.mxu1 %v8560_v8  ;;  %v10122_v60 = vld [vmem:[%s15423_s7 + $0x8a0] sm:$0xf0]  ;;  %v2704_v46 = vmax.f32 %v2302_v44, 0.0  ;;  %v2453_v6 = vpop.f32.mrf.mxu0  ;;  %v8280_v8 = vor.u32 %v9989_v55, %v8279_v53  ;;  %v10108_v44 = vld [vmem:[%s15423_s7 + $0x830] sm:$0xf0] }
 0x213   :  { %2676 = vmatmul.bf16.vlgmr.msra.gmra.mxu0 %v11374_v34  ;;  %v2697_v34 = vmax.f32 %v2356_v21, 0.0  ;;  %v8812_v11 = vor.u32 %v10122_v60, %v8811_v59  ;;  %v2696_v21 = vmax.f32 %v2300_v61, 0.0  ;;  %v2454_v41 = vadd.f32 %v2453_v6, %v2440_v28  ;;  %v8195_v53 = vld [vmem:[%s15423_s7 + $0x3b8] sm:$0xf]  ;;  %v9968_v55 = vld [vmem:[%s15423_s7 + $0x3d0] sm:$0xf0] }
 0x214   :  { %5556 = vmatpush.bf16.msra.mxu2 %v7804_v39  ;;  %5580 = vmatpush.bf16.msrb.mxu0 %v8364_v2  ;;  %v12694_v39 = vpop.f32.mrf.mxu1  ;;  %v9007_v2 = vld [vmem:[%s15423_s7 + $0xa10] sm:$0xf]  ;;  %v10101_v59 = vld [vmem:[%s15423_s7 + $0x7f8] sm:$0xf0]  ;;  %v8952_v60 = vor.u32 %v10157_v49, %v8951_v7  ;;  %v9259_v10 = vld [vmem:[%s15423_s7 + $0xc08] sm:$0xf]  ;;  %v8896_v28 = vor.u32 %v10143_v14, %v8895_v1 }
 0x215   :  { %v12692_v63 = vpack.c.bf16 %v2705_v47, %v2697_v34  ;;  %v9008_v20 = vor.u32 %v10171_v4, %v9007_v2  ;;  %v2468_v56 = vadd.f32 %v12694_v39, %v2454_v41  ;;  %v8923_v39 = vld [vmem:[%s15423_s7 + $0x968] sm:$0xf]  ;;  %v10150_v2 = vld [vmem:[%s15423_s7 + $0x980] sm:$0xf0]  ;;  %v10080_v41 = vld [vmem:[%s15423_s7 + $0x750] sm:$0xf0] }
 0x216   :  { %5572 = vmatpush.bf16.msra.mxu3 %v7972_v19  ;;  %5596 = vmatpush.bf16.msrb.mxu1 %v8532_v30  ;;  %v10115_v19 = vld [vmem:[%s15423_s7 + $0x868] sm:$0xf0]  ;;  %v12736_v30 = vpack.c.bf16 %v2704_v46, %v2696_v21  ;;  %v8196_v46 = vor.u32 %v9968_v55, %v8195_v53  ;;  %v10234_v62 = vld [vmem:[%s15423_s7 + $0xc20] sm:$0xf0]  ;;  %v8141_v49 = vld [vmem:[%s15423_s7 + $0x364] sm:$0xf0] }
 0x217   :  { %v8784_v15 = vor.u32 %v10115_v19, %v8783_v40  ;;  %v9951_v7 = vld [vmem:[%s15423_s7 + $0x34c] sm:$0xf]  ;;  %v7917_v55 = vld [vmem:[%s15423_s7 + $0x1a4] sm:$0xf0]  ;;  %v9881_v14 = vld [vmem:[%s15423_s7 + $0x11c] sm:$0xf] }
 0x218   :  { %5557 = vmatpush.bf16.msra.mxu2 %v7776_v17  ;;  %5581 = vmatpush.bf16.msrb.mxu0 %v8336_v27  ;;  %v2428_v17 = vadd.f32 %v2427_v58, %v955_v50  ;;  %v8979_v27 = vld [vmem:[%s15423_s7 + $0x9d8] sm:$0xf]  ;;  %v2398_v50 = vadd.f32 %v12557_v32, %v2384_v26  ;;  %v8391_v32 = vld [vmem:[%s15423_s7 + $0x540] sm:$0xf] }
 0x219   :  { %v8980_v47 = vor.u32 %v10164_v33, %v8979_v27  ;;  %v8671_v27 = vld [vmem:[%s15423_s7 + $0x770] sm:$0xf]  ;;  %v10087_v33 = vld [vmem:[%s15423_s7 + $0x788] sm:$0xf0]  ;;  %v8643_v26 = vld [vmem:[%s15423_s7 + $0x738] sm:$0xf] }
 0x21a   :  { %5573 = vmatpush.bf16.msra.mxu3 %v7944_v48  ;;  %5597 = vmatpush.bf16.msrb.mxu1 %v8504_v12  ;;  %v2386_v48 = vadd.f32 %v12595_v0, %v2372_v45  ;;  %v2442_v34 = vadd.f32 %v2441_v38, %v2428_v17  ;;  %v8756_v12 = vor.u32 %v10108_v44, %v8755_v16  ;;  %v9203_v44 = vld [vmem:[%s15423_s7 + $0xb98] sm:$0xf] }
 0x21b   :  { %v2412_v4 = vadd.f32 %v12543_v25, %v2398_v50  ;;  %v8699_v25 = vld [vmem:[%s15423_s7 + $0x7a8] sm:$0xf]  ;;  %v9260_v17 = vor.u32 %v10234_v62, %v9259_v10  ;;  %v8672_v37 = vor.u32 %v10087_v33, %v8671_v27  ;;  %v956_v50 = vperm.slane %v12509_v3, 4  ;;  %v7861_v62 = vld [vmem:[%s15423_s7 + $0x134] sm:$0xf0] }
 0x21c   :  { %5558 = vmatpush.bf16.msra.mxu2 %v7748_v51  ;;  %5582 = vmatpush.bf16.msrb.mxu0 %v8308_v23  ;;  %v2455_v51 = vpop.f32.mrf.mxu0  ;;  %v8224_v23 = vor.u32 %v9975_v57, %v8223_v54  ;;  %v2400_v43 = vadd.f32 %v12633_v22, %v2386_v48  ;;  %v10017_v22 = vld [vmem:[%s15423_s7 + $0x558] sm:$0xf0]  ;;  %v8700_v45 = vor.u32 %v10094_v13, %v8699_v25  ;;  %v10136_v54 = vld [vmem:[%s15423_s7 + $0x910] sm:$0xf0]  ;;  %v8839_v48 = vld [vmem:[%s15423_s7 + $0x8c0] sm:$0xf] }
 0x21d   :  { %5574 = vmatmul.bf16.vlgmr.msra.gmra.mxu3 %v12692_v63  ;;  %v2456_v0 = vadd.f32 %v2455_v51, %v2442_v34  ;;  %v10129_v34 = vld [vmem:[%s15423_s7 + $0x8d8] sm:$0xf0]  ;;  %v8644_v51 = vor.u32 %v10080_v41, %v8643_v26  ;;  %v8085_v25 = vld [vmem:[%s15423_s7 + $0x2f4] sm:$0xf0]  ;;  %v8057_v27 = vld [vmem:[%s15423_s7 + $0x2bc] sm:$0xf0] }
 0x21e   :  { %5622 = vmatpush.bf16.msrb.mxu3 %v9036_v42  ;;  %5598 = vmatpush.bf16.msrb.mxu1 %v8476_v9  ;;  %v2469_v42 = vpop.f32.mrf.mxu1  ;;  %v2414_v58 = vadd.f32 %v12627_v18, %v2400_v43  ;;  %v9961_v9 = vld [vmem:[%s15423_s7 + $0x398] sm:$0xf0]  ;;  %v8924_v18 = vor.u32 %v10150_v2, %v8923_v39  ;;  %v8615_v43 = vld [vmem:[%s15423_s7 + $0x700] sm:$0xf]  ;;  %v8840_v53 = vor.u32 %v10129_v34, %v8839_v48  ;;  %v10192_v41 = vld [vmem:[%s15423_s7 + $0xad0] sm:$0xf0] }
 0x21f   :  { %v2470_v61 = vadd.f32 %v2469_v42, %v2456_v0  ;;  %v8168_v19 = vor.u32 %v9961_v9, %v8167_v5  ;;  %v10073_v0 = vld [vmem:[%s15423_s7 + $0x718] sm:$0xf0]  ;;  %v9888_v5 = vld [vmem:[%s15423_s7 + $0x154] sm:$0xf] }
 0x220   :  { %5559 = vmatpush.bf16.msra.mxu2 %v7720_v35  ;;  %5583 = vmatpush.bf16.msrb.mxu0 %v8280_v8  ;;  %v8392_v35 = vor.u32 %v10017_v22, %v8391_v32  ;;  %v8728_v8 = vor.u32 %v10101_v59, %v8727_v24  ;;  %v2706_v21 = vmax.f32 %v2414_v58, 0.0  ;;  %v8144_v32 = vor.u32 %v9951_v7, %v8141_v49  ;;  %v10213_v42 = vld [vmem:[%s15423_s7 + $0xb78] sm:$0xf0]  ;;  %v9944_v22 = vld [vmem:[%s15423_s7 + $0x314] sm:$0xf] }
 0x221   :  { %v2707_v6 = vmax.f32 %v2470_v61, 0.0  ;;  %v8113_v24 = vld [vmem:[%s15423_s7 + $0x32c] sm:$0xf0]  ;;  %v8616_v61 = vor.u32 %v10073_v0, %v8615_v43  ;;  %v9937_v9 = vld [vmem:[%s15423_s7 + $0x2dc] sm:$0xf] }
 0x222   :  { %5623 = vmatpush.bf16.msrb.mxu3 %v9008_v20  ;;  %5599 = vmatpush.bf16.msrb.mxu1 %v8448_v31  ;;  %v2698_v20 = vmax.f32 %v2412_v4, 0.0  ;;  %v9231_v31 = vld [vmem:[%s15423_s7 + $0xbd0] sm:$0xf]  ;;  %v9867_v49 = vld [vmem:[%s15423_s7 + $0xac] sm:$0xf] }
 0x223   :  { %5560 = vmatmul.bf16.vlgmr.msra.gmra.mxu2 %v12736_v30  ;;  %v7889_v58 = vld [vmem:[%s15423_s7 + $0x16c] sm:$0xf0]  ;;  %v9063_v43 = vld [vmem:[%s15423_s7 + $0xa80] sm:$0xf]  ;;  %v10185_v0 = vld [vmem:[%s15423_s7 + $0xa98] sm:$0xf0] }
 0x224   :  { %5608 = vmatpush.bf16.msrb.mxu2 %v8812_v11  ;;  %5584 = vmatpush.bf16.msrb.mxu0 %v8252_v29  ;;  %v2699_v11 = vmax.f32 %v2468_v56, 0.0  ;;  %v8867_v29 = vld [vmem:[%s15423_s7 + $0x8f8] sm:$0xf]  ;;  %v12836_v36 = vpack.c.bf16 %v2706_v21, %v2698_v20  ;;  %v9175_v56 = vld [vmem:[%s15423_s7 + $0xb60] sm:$0xf]  ;;  %v7892_v1 = vor.u32 %v9888_v5, %v7889_v58 }
 0x225   :  { %v8868_v16 = vor.u32 %v10136_v54, %v8867_v29  ;;  %v9176_v39 = vor.u32 %v10213_v42, %v9175_v56  ;;  %v9119_v20 = vld [vmem:[%s15423_s7 + $0xaf0] sm:$0xf]  ;;  %v10199_v21 = vld [vmem:[%s15423_s7 + $0xb08] sm:$0xf0]  ;;  %v7864_v54 = vor.u32 %v9881_v14, %v7861_v62  ;;  %v9064_v56 = vor.u32 %v10185_v0, %v9063_v43  ;;  %v10290_v42 = vld [vmem:[%s15423_s7 + $0xde0] sm:$0xf0] }
 0x226   :  { %5624 = vmatpush.bf16.msrb.mxu3 %v8980_v47  ;;  %5600 = vmatpush.bf16.msrb.mxu1 %v8420_v52  ;;  %v12815_v40 = vpack.c.bf16 %v2707_v6, %v2699_v11  ;;  %v2481_v57 = vpop.f32.mrf.mxu2  ;;  %v10220_v47 = vld [vmem:[%s15423_s7 + $0xbb0] sm:$0xf0]  ;;  %v2495_v52 = vpop.f32.mrf.mxu3  ;;  %v8116_v6 = vor.u32 %v9944_v22, %v8113_v24  ;;  %v10007_v22 = vld [vmem:[%s15423_s7 + $0x50c] sm:$0xf]  ;;  %v8365_v24 = vld [vmem:[%s15423_s7 + $0x524] sm:$0xf0] }
 0x227   :  { %v2482_v59 = vadd.f32 %v2481_v57, %v956_v50  ;;  %v7973_v5 = vld [vmem:[%s15423_s7 + $0x214] sm:$0xf0]  ;;  %v9455_v58 = vld [vmem:[%s15423_s7 + $0xd90] sm:$0xf]  ;;  %v7945_v62 = vld [vmem:[%s15423_s7 + $0x1dc] sm:$0xf0] }
 0x228   :  { %5609 = vmatpush.bf16.msrb.mxu2 %v8784_v15  ;;  %5585 = vmatpush.bf16.msrb.mxu0 %v8224_v23  ;;  %v10227_v15 = vld [vmem:[%s15423_s7 + $0xbe8] sm:$0xf0]  ;;  %v9204_v23 = vor.u32 %v10220_v47, %v9203_v44  ;;  %v8029_v47 = vld [vmem:[%s15423_s7 + $0x284] sm:$0xf0]  ;;  %v10262_v43 = vld [vmem:[%s15423_s7 + $0xd00] sm:$0xf0] }
 0x229   :  { %v9232_v38 = vor.u32 %v10227_v15, %v9231_v31  ;;  %v2496_v13 = vadd.f32 %v2495_v52, %v2482_v59  ;;  %v9874_v31 = vld [vmem:[%s15423_s7 + $0xe4] sm:$0xf]  ;;  %v9923_v44 = vld [vmem:[%s15423_s7 + $0x26c] sm:$0xf] }
 0x22a   :  { %5625 = vmatpush.bf16.msrb.mxu3 %v8952_v60  ;;  %5601 = vmatpush.bf16.msrb.mxu1 %v8392_v35  ;;  %v2523_v60 = vpop.f32.mrf.mxu1  ;;  %v9147_v35 = vld [vmem:[%s15423_s7 + $0xb28] sm:$0xf]  ;;  %v8032_v52 = vor.u32 %v9923_v44, %v8029_v47  ;;  %v9979_v0 = vld [vmem:[%s15423_s7 + $0x42c] sm:$0xf] }
 0x22c   :  { %5610 = vmatpush.bf16.msrb.mxu2 %v8756_v12  ;;  %5586 = vmatpush.bf16.msrb.mxu0 %v8196_v46  ;;  %v9895_v12 = vld [vmem:[%s15423_s7 + $0x18c] sm:$0xf] }
 0x22d   :  { %5602 = vmatmul.bf16.vlgmr.msrb.gmra.mxu1 %v12815_v40  ;;  %v7920_v46 = vor.u32 %v9895_v12, %v7917_v55  ;;  %v9916_v12 = vld [vmem:[%s15423_s7 + $0x234] sm:$0xf]  ;;  %v9483_v55 = vld [vmem:[%s15423_s7 + $0xdc8] sm:$0xf] }
 0x22e   :  { %5626 = vmatpush.bf16.msrb.mxu3 %v8924_v18  ;;  %v2483_v2 = vpop.f32.mrf.mxu2 }
 0x22f   :  { %v2484_v11 = vadd.f32 %v2483_v2, %v956_v50  ;;  %v7805_v50 = vld [vmem:[%s15423_s7 + $0xc4] sm:$0xf0]  ;;  %v7777_v2 = vld [vmem:[%s15423_s7 + $0x8c] sm:$0xf0] }
 0x230   :  { %5611 = vmatpush.bf16.msrb.mxu2 %v8728_v8  ;;  %5587 = vmatpush.bf16.msrb.mxu0 %v8168_v19  ;;  %v2509_v4 = vpop.f32.mrf.mxu0  ;;  %v10206_v8 = vld [vmem:[%s15423_s7 + $0xb40] sm:$0xf0]  ;;  %v8088_v19 = vor.u32 %v9937_v9, %v8085_v25  ;;  %v7808_v59 = vor.u32 %v9867_v49, %v7805_v50  ;;  %v8337_v9 = vld [vmem:[%s15423_s7 + $0x4ec] sm:$0xf0]  ;;  %v10112_v49 = vld [vmem:[%s15423_s7 + $0x854] sm:$0xf] }
 0x231   :  { %v9148_v18 = vor.u32 %v10206_v8, %v9147_v35  ;;  %v2510_v10 = vadd.f32 %v2509_v4, %v2496_v13  ;;  %v10000_v35 = vld [vmem:[%s15423_s7 + $0x4d4] sm:$0xf]  ;;  %v9853_v13 = vld [vmem:[%s15423_s7 + $0x3c] sm:$0xf]  ;;  %v8785_v50 = vld [vmem:[%s15423_s7 + $0x86c] sm:$0xf0] }
 0x232   :  { %5627 = vmatpush.bf16.msrb.mxu3 %v8896_v28  ;;  %v9120_v28 = vor.u32 %v10199_v21, %v9119_v20  ;;  %v10276_v20 = vld [vmem:[%s15423_s7 + $0xd70] sm:$0xf0]  ;;  %v9993_v21 = vld [vmem:[%s15423_s7 + $0x49c] sm:$0xf] }
 0x233   :  { %5588 = vmatmul.bf16.vlgmr.msrb.gmra.mxu0 %v12836_v36  ;;  %v2524_v15 = vadd.f32 %v2523_v60, %v2510_v10  ;;  %v9860_v60 = vld [vmem:[%s15423_s7 + $0x74] sm:$0xf]  ;;  %v9902_v10 = vld [vmem:[%s15423_s7 + $0x1c4] sm:$0xf] }
 0x234   :  { %5612 = vmatpush.bf16.msrb.mxu2 %v8700_v45  ;;  %5636 = vmatpush.bf16.msra.mxu0 %v9260_v17  ;;  %v2497_v45 = vpop.f32.mrf.mxu3  ;;  %v9930_v17 = vld [vmem:[%s15423_s7 + $0x2a4] sm:$0xf] }
 0x235   :  { %v2498_v33 = vadd.f32 %v2497_v45, %v2484_v11  ;;  %v8060_v26 = vor.u32 %v9930_v17, %v8057_v27  ;;  %v7780_v11 = vor.u32 %v9860_v60, %v7777_v2  ;;  %v8309_v17 = vld [vmem:[%s15423_s7 + $0x4b4] sm:$0xf0]  ;;  %v957_v27 = vperm.slane %v12509_v3, 5  ;;  %v8813_v3 = vld [vmem:[%s15423_s7 + $0x8a4] sm:$0xf0] }
 0x236   :  { %5628 = vmatpush.bf16.msrb.mxu3 %v8868_v16  ;;  %v2525_v16 = vpop.f32.mrf.mxu1  ;;  %v9343_v60 = vld [vmem:[%s15423_s7 + $0xcb0] sm:$0xf] }
 0x238   :  { %5613 = vmatpush.bf16.msrb.mxu2 %v8672_v37  ;;  %5637 = vmatpush.bf16.msra.mxu0 %v9232_v38  ;;  %v2511_v29 = vpop.f32.mrf.mxu0  ;;  %v7833_v37 = vld [vmem:[%s15423_s7 + $0xfc] sm:$0xf0]  ;;  %v9091_v38 = vld [vmem:[%s15423_s7 + $0xab8] sm:$0xf] }
 0x239   :  { %v2512_v57 = vadd.f32 %v2511_v29, %v2498_v33  ;;  %v9092_v34 = vor.u32 %v10192_v41, %v9091_v38  ;;  %v7836_v7 = vor.u32 %v9874_v31, %v7833_v37  ;;  %v8312_v29 = vor.u32 %v9993_v21, %v8309_v17  ;;  %v10119_v31 = vld [vmem:[%s15423_s7 + $0x88c] sm:$0xf]  ;;  %v9399_v37 = vld [vmem:[%s15423_s7 + $0xd20] sm:$0xf]  ;;  %v9986_v38 = vld [vmem:[%s15423_s7 + $0x464] sm:$0xf] }
 0x23a   :  { %5629 = vmatpush.bf16.msrb.mxu3 %v8840_v53  ;;  %v8001_v53 = vld [vmem:[%s15423_s7 + $0x24c] sm:$0xf0] }
 0x23b   :  { %v2526_v48 = vadd.f32 %v2525_v16, %v2512_v57  ;;  %v8004_v4 = vor.u32 %v9916_v12, %v8001_v53  ;;  %v8281_v16 = vld [vmem:[%s15423_s7 + $0x47c] sm:$0xf0]  ;;  %v8253_v53 = vld [vmem:[%s15423_s7 + $0x444] sm:$0xf0] }
 0x23c   :  { %5614 = vmatpush.bf16.msrb.mxu2 %v8644_v51  ;;  %5638 = vmatpush.bf16.msra.mxu0 %v9204_v23  ;;  %v2700_v51 = vmax.f32 %v2524_v15, 0.0  ;;  %v7948_v15 = vor.u32 %v9902_v10, %v7945_v62  ;;  %v8284_v47 = vor.u32 %v9986_v38, %v8281_v16  ;;  %v8197_v62 = vld [vmem:[%s15423_s7 + $0x3d4] sm:$0xf0]  ;;  %v8589_v16 = vld [vmem:[%s15423_s7 + $0x6e4] sm:$0xf0] }
 0x23d   :  { %v2708_v23 = vmax.f32 %v2526_v48, 0.0 }
 0x23e   :  { %5678 = vmatpush.bf16.msra.mxu3 %v8144_v32 }
 0x23f   :  { %v12963_v32 = vpack.c.bf16 %v2708_v23, %v2700_v51 }
 0x240   :  { %5615 = vmatpush.bf16.msrb.mxu2 %v8616_v61  ;;  %5639 = vmatpush.bf16.msra.mxu0 %v9176_v39  ;;  %v9484_v61 = vor.u32 %v10290_v42, %v9483_v55  ;;  %v8368_v39 = vor.u32 %v10007_v22, %v8365_v24  ;;  %v2551_v57 = vpop.f32.mrf.mxu3  ;;  %v8256_v55 = vor.u32 %v9979_v0, %v8253_v53  ;;  %v10105_v24 = vld [vmem:[%s15423_s7 + $0x81c] sm:$0xf]  ;;  %v8981_v53 = vld [vmem:[%s15423_s7 + $0x9f4] sm:$0xf0] }
 0x241   :  { %v8788_v22 = vor.u32 %v10112_v49, %v8785_v50  ;;  %v10084_v49 = vld [vmem:[%s15423_s7 + $0x774] sm:$0xf]  ;;  %v8673_v50 = vld [vmem:[%s15423_s7 + $0x78c] sm:$0xf0] }
 0x242   :  { %5679 = vmatpush.bf16.msra.mxu3 %v8116_v6  ;;  %5650 = vmatpush.bf16.msra.mxu1 %v9484_v61  ;;  %v10283_v6 = vld [vmem:[%s15423_s7 + $0xda8] sm:$0xf0]  ;;  %v8676_v0 = vor.u32 %v10084_v49, %v8673_v50 }
 0x243   :  { %5616 = vmatmul.bf16.vlgmr.msrb.gmra.mxu2 %v12963_v32  ;;  %v9456_v8 = vor.u32 %v10283_v6, %v9455_v58  ;;  %v10255_v61 = vld [vmem:[%s15423_s7 + $0xcc8] sm:$0xf0] }
 0x244   :  { %5664 = vmatpush.bf16.msra.mxu2 %v7920_v46  ;;  %5640 = vmatpush.bf16.msra.mxu0 %v9148_v18  ;;  %v9909_v46 = vld [vmem:[%s15423_s7 + $0x1fc] sm:$0xf]  ;;  %v8340_v18 = vor.u32 %v10000_v35, %v8337_v9  ;;  %v8729_v9 = vld [vmem:[%s15423_s7 + $0x7fc] sm:$0xf0] }
 0x245   :  { %v7976_v14 = vor.u32 %v9909_v46, %v7973_v5  ;;  %v8225_v46 = vld [vmem:[%s15423_s7 + $0x40c] sm:$0xf0] }
 0x246   :  { %5680 = vmatpush.bf16.msra.mxu3 %v8088_v19  ;;  %v2537_v25 = vpop.f32.mrf.mxu2  ;;  %5651 = vmatpush.bf16.msra.mxu1 %v9456_v8  ;;  %v9427_v19 = vld [vmem:[%s15423_s7 + $0xd58] sm:$0xf]  ;;  %v10098_v8 = vld [vmem:[%s15423_s7 + $0x7e4] sm:$0xf] }
 0x247   :  { %v9428_v45 = vor.u32 %v10276_v20, %v9427_v19  ;;  %v2538_v48 = vadd.f32 %v2537_v25, %v957_v27  ;;  %v10175_v20 = vld [vmem:[%s15423_s7 + $0xa4c] sm:$0xf]  ;;  %v8732_v17 = vor.u32 %v10098_v8, %v8729_v9  ;;  %v10042_v8 = vld [vmem:[%s15423_s7 + $0x624] sm:$0xf]  ;;  %v8505_v9 = vld [vmem:[%s15423_s7 + $0x63c] sm:$0xf0] }
 0x248   :  { %5665 = vmatpush.bf16.msra.mxu2 %v7892_v1  ;;  %5641 = vmatpush.bf16.msra.mxu0 %v9120_v28  ;;  %v7749_v1 = vld [vmem:[%s15423_s7 + $0x54] sm:$0xf0]  ;;  %v9846_v28 = vld [vmem:[%s15423_s7 + $0x4] sm:$0xf]  ;;  %v2553_v5 = vpop.f32.mrf.mxu3 }
 0x249   :  { %v7752_v33 = vor.u32 %v9853_v13, %v7749_v1  ;;  %v2552_v42 = vadd.f32 %v2551_v57, %v2538_v48  ;;  %v10248_v13 = vld [vmem:[%s15423_s7 + $0xc90] sm:$0xf0] }
 0x24a   :  { %5681 = vmatpush.bf16.msra.mxu3 %v8060_v26  ;;  %5652 = vmatpush.bf16.msra.mxu1 %v9428_v45  ;;  %v10269_v26 = vld [vmem:[%s15423_s7 + $0xd38] sm:$0xf0]  ;;  %v10168_v48 = vld [vmem:[%s15423_s7 + $0xa14] sm:$0xf] }
 0x24b   :  { %v9400_v41 = vor.u32 %v10269_v26, %v9399_v37  ;;  %v8169_v37 = vld [vmem:[%s15423_s7 + $0x39c] sm:$0xf0] }
 0x24c   :  { %5666 = vmatpush.bf16.msra.mxu2 %v7864_v54  ;;  %5642 = vmatpush.bf16.msra.mxu0 %v9092_v34  ;;  %v7721_v54 = vld [vmem:[%s15423_s7 + $0x1c] sm:$0xf0]  ;;  %v2579_v34 = vpop.f32.mrf.mxu1 }
 0x24d   :  { %v7724_v44 = vor.u32 %v9846_v28, %v7721_v54  ;;  %v8701_v28 = vld [vmem:[%s15423_s7 + $0x7c4] sm:$0xf0]  ;;  %v10241_v54 = vld [vmem:[%s15423_s7 + $0xc58] sm:$0xf0] }
 0x24e   :  { %5682 = vmatpush.bf16.msra.mxu3 %v8032_v52  ;;  %v2539_v51 = vpop.f32.mrf.mxu2  ;;  %5653 = vmatpush.bf16.msra.mxu1 %v9400_v41  ;;  %v9371_v52 = vld [vmem:[%s15423_s7 + $0xce8] sm:$0xf]  ;;  %v10063_v41 = vld [vmem:[%s15423_s7 + $0x6cc] sm:$0xf] }
 0x24f   :  { %v9372_v12 = vor.u32 %v10262_v43, %v9371_v52 }
 0x250   :  { %5667 = vmatpush.bf16.msra.mxu2 %v7836_v7  ;;  %5643 = vmatpush.bf16.msra.mxu0 %v9064_v56  ;;  %v8816_v7 = vor.u32 %v10119_v31, %v8813_v3  ;;  %v2565_v23 = vpop.f32.mrf.mxu0  ;;  %v2540_v56 = vadd.f32 %v2539_v51, %v957_v27  ;;  %v9037_v27 = vld [vmem:[%s15423_s7 + $0xa64] sm:$0xf0]  ;;  %v9958_v31 = vld [vmem:[%s15423_s7 + $0x384] sm:$0xf]  ;;  %v10056_v51 = vld [vmem:[%s15423_s7 + $0x694] sm:$0xf] }
 0x251   :  { %v2566_v2 = vadd.f32 %v2565_v23, %v2552_v42  ;;  %v9040_v26 = vor.u32 %v10175_v20, %v9037_v27  ;;  %v8172_v38 = vor.u32 %v9958_v31, %v8169_v37  ;;  %v8561_v23 = vld [vmem:[%s15423_s7 + $0x6ac] sm:$0xf0]  ;;  %v8645_v42 = vld [vmem:[%s15423_s7 + $0x754] sm:$0xf0] }
 0x252   :  { %5683 = vmatpush.bf16.msra.mxu3 %v8004_v4  ;;  %5654 = vmatpush.bf16.msra.mxu1 %v9372_v12  ;;  %v9344_v4 = vor.u32 %v10255_v61, %v9343_v60  ;;  %v2554_v6 = vadd.f32 %v2553_v5, %v2540_v56  ;;  %v8564_v43 = vor.u32 %v10056_v51, %v8561_v23  ;;  %v10161_v12 = vld [vmem:[%s15423_s7 + $0x9dc] sm:$0xf]  ;;  %v13175_v61 = vld [vmem:[%s15424_s6] sm:$0xff]  ;;  %v8897_v31 = vld [vmem:[%s15423_s7 + $0x94c] sm:$0xf0] }
 0x253   :  { %v2580_v1 = vadd.f32 %v2579_v34, %v2566_v2  ;;  %v9009_v34 = vld [vmem:[%s15423_s7 + $0xa2c] sm:$0xf0]  ;;  %v10077_v56 = vld [vmem:[%s15423_s7 + $0x73c] sm:$0xf]  ;;  %v10070_v5 = vld [vmem:[%s15423_s7 + $0x704] sm:$0xf] }
 0x254   :  { %5668 = vmatpush.bf16.msra.mxu2 %v7808_v59  ;;  %5692 = vmatpush.bf16.msrb.mxu0 %v8368_v39  ;;  %v8757_v59 = vld [vmem:[%s15423_s7 + $0x834] sm:$0xf0]  ;;  %v9972_v39 = vld [vmem:[%s15423_s7 + $0x3f4] sm:$0xf]  ;;  %v2581_v19 = vpop.f32.mrf.mxu1  ;;  %v9012_v52 = vor.u32 %v10168_v48, %v9009_v34  ;;  %v8648_v2 = vor.u32 %v10077_v56, %v8645_v42  ;;  %v10133_v34 = vld [vmem:[%s15423_s7 + $0x8fc] sm:$0xf] }
 0x255   :  { %v8228_v58 = vor.u32 %v9972_v39, %v8225_v46  ;;  %v8760_v35 = vor.u32 %v10105_v24, %v8757_v59  ;;  %v2701_v3 = vmax.f32 %v2580_v1, 0.0  ;;  %v8533_v24 = vld [vmem:[%s15423_s7 + $0x674] sm:$0xf0]  ;;  %v8984_v59 = vor.u32 %v10161_v12, %v8981_v53  ;;  %v8953_v46 = vld [vmem:[%s15423_s7 + $0x9bc] sm:$0xf0] }
 0x256   :  { %5684 = vmatpush.bf16.msra.mxu3 %v7976_v14  ;;  %5655 = vmatpush.bf16.msra.mxu1 %v9344_v4  ;;  %v958_v39 = vperm.slane %v13175_v61, 6  ;;  %v10154_v4 = vld [vmem:[%s15423_s7 + $0x9a4] sm:$0xf]  ;;  %v10147_v1 = vld [vmem:[%s15423_s7 + $0x96c] sm:$0xf] }
 0x257   :  { %v7839_v51 = vld [vmem:[%s15423_s7 + $0xe8] sm:$0xf] }
 0x258   :  { %5669 = vmatpush.bf16.msra.mxu2 %v7780_v11  ;;  %5693 = vmatpush.bf16.msrb.mxu0 %v8340_v18  ;;  %v2567_v25 = vpop.f32.mrf.mxu0  ;;  %v9315_v11 = vld [vmem:[%s15423_s7 + $0xc78] sm:$0xf]  ;;  %v9965_v18 = vld [vmem:[%s15423_s7 + $0x3bc] sm:$0xf] }
 0x259   :  { %v2568_v14 = vadd.f32 %v2567_v25, %v2554_v6  ;;  %v9316_v10 = vor.u32 %v10248_v13, %v9315_v11  ;;  %v8200_v21 = vor.u32 %v9965_v18, %v8197_v62  ;;  %v7923_v6 = vld [vmem:[%s15423_s7 + $0x190] sm:$0xf]  ;;  %v8956_v11 = vor.u32 %v10154_v4, %v8953_v46  ;;  %v7895_v62 = vld [vmem:[%s15423_s7 + $0x158] sm:$0xf]  ;;  %v9955_v46 = vld [vmem:[%s15423_s7 + $0x368] sm:$0xf0] }
 0x25a   :  { %5685 = vmatpush.bf16.msra.mxu3 %v7948_v15  ;;  %v8508_v13 = vor.u32 %v10042_v8, %v8505_v9  ;;  %v8147_v4 = vld [vmem:[%s15423_s7 + $0x350] sm:$0xf]  ;;  %v8393_v8 = vld [vmem:[%s15423_s7 + $0x55c] sm:$0xf0] }
 0x25b   :  { %v2582_v45 = vadd.f32 %v2581_v19, %v2568_v14  ;;  %5656 = vmatpush.bf16.msra.mxu1 %v9316_v10  ;;  %v8925_v14 = vld [vmem:[%s15423_s7 + $0x984] sm:$0xf0] }
 0x25c   :  { %5670 = vmatpush.bf16.msra.mxu2 %v7752_v33  ;;  %5694 = vmatpush.bf16.msrb.mxu0 %v8312_v29  ;;  %v10091_v33 = vld [vmem:[%s15423_s7 + $0x7ac] sm:$0xf]  ;;  %v9287_v29 = vld [vmem:[%s15423_s7 + $0xc40] sm:$0xf] }
 0x25d   :  { %v2709_v15 = vmax.f32 %v2582_v45, 0.0  ;;  %v9288_v57 = vor.u32 %v10241_v54, %v9287_v29  ;;  %v10035_v45 = vld [vmem:[%s15423_s7 + $0x5ec] sm:$0xf]  ;;  %v10140_v54 = vld [vmem:[%s15423_s7 + $0x934] sm:$0xf] }
 0x25f   :  { %5657 = vmatpush.bf16.msra.mxu1 %v9288_v57 }
 0x260   :  { %5671 = vmatpush.bf16.msra.mxu2 %v7724_v44  ;;  %5695 = vmatpush.bf16.msrb.mxu0 %v8284_v47  ;;  %v13133_v44 = vpack.c.bf16 %v2709_v15, %v2701_v3  ;;  %v8704_v47 = vor.u32 %v10091_v33, %v8701_v28  ;;  %v2607_v25 = vpop.f32.mrf.mxu3  ;;  %v8928_v28 = vor.u32 %v10147_v1, %v8925_v14  ;;  %v7867_v15 = vld [vmem:[%s15423_s7 + $0x120] sm:$0xf] }
 0x262   :  { %5630 = vmatmul.bf16.vlgmr.msrb.gmra.mxu3 %v13133_v44 }
 0x263   :  { %5672 = vmatmul.bf16.vlgmr.msra.gmra.mxu2 %v12736_v30  ;;  %5734 = vmatpush.bf16.msrb.mxu3 %v9040_v26  ;;  %v9885_v26 = vld [vmem:[%s15423_s7 + $0x138] sm:$0xf0] }
 0x264   :  { %5720 = vmatpush.bf16.msrb.mxu2 %v8816_v7  ;;  %5696 = vmatpush.bf16.msrb.mxu0 %v8256_v55  ;;  %v8592_v7 = vor.u32 %v10063_v41, %v8589_v16  ;;  %v8449_v41 = vld [vmem:[%s15423_s7 + $0x5cc] sm:$0xf0]  ;;  %v8900_v16 = vor.u32 %v10140_v54, %v8897_v31  ;;  %v7868_v50 = vor.u32 %v9885_v26, %v7867_v15  ;;  %v8091_v54 = vld [vmem:[%s15423_s7 + $0x2e0] sm:$0xf]  ;;  %v9941_v31 = vld [vmem:[%s15423_s7 + $0x2f8] sm:$0xf0] }
 0x265   :  { %v9205_v15 = vld [vmem:[%s15423_s7 + $0xbb4] sm:$0xf0]  ;;  %v8092_v26 = vor.u32 %v9941_v31, %v8091_v54 }
 0x266   :  { %5706 = vmatpush.bf16.msrb.mxu1 %v8592_v7  ;;  %v2593_v55 = vpop.f32.mrf.mxu2  ;;  %v8869_v7 = vld [vmem:[%s15423_s7 + $0x914] sm:$0xf0] }
 0x267   :  { %5735 = vmatpush.bf16.msrb.mxu3 %v9012_v52  ;;  %v2594_v19 = vadd.f32 %v2593_v55, %v958_v39  ;;  %v9878_v52 = vld [vmem:[%s15423_s7 + $0x100] sm:$0xf0]  ;;  %v8872_v53 = vor.u32 %v10133_v34, %v8869_v7  ;;  %v9177_v34 = vld [vmem:[%s15423_s7 + $0xb7c] sm:$0xf0]  ;;  %v7727_v7 = vld [vmem:[%s15423_s7 + $0x8] sm:$0xf] }
 0x268   :  { %5721 = vmatpush.bf16.msrb.mxu2 %v8788_v22  ;;  %5697 = vmatpush.bf16.msrb.mxu0 %v8228_v58  ;;  %v10049_v22 = vld [vmem:[%s15423_s7 + $0x65c] sm:$0xf]  ;;  %v8617_v58 = vld [vmem:[%s15423_s7 + $0x71c] sm:$0xf0]  ;;  %v2609_v49 = vpop.f32.mrf.mxu3  ;;  %v10126_v55 = vld [vmem:[%s15423_s7 + $0x8c4] sm:$0xf] }
 0x269   :  { %v8536_v60 = vor.u32 %v10049_v22, %v8533_v24  ;;  %v8620_v18 = vor.u32 %v10070_v5, %v8617_v58  ;;  %v2608_v37 = vadd.f32 %v2607_v25, %v2594_v19  ;;  %v8841_v24 = vld [vmem:[%s15423_s7 + $0x8dc] sm:$0xf0]  ;;  %v7811_v5 = vld [vmem:[%s15423_s7 + $0xb0] sm:$0xf]  ;;  %v9948_v19 = vld [vmem:[%s15423_s7 + $0x330] sm:$0xf0] }
 0x26a   :  { %5707 = vmatpush.bf16.msrb.mxu1 %v8564_v43  ;;  %v2635_v20 = vpop.f32.mrf.mxu1  ;;  %v10021_v43 = vld [vmem:[%s15423_s7 + $0x57c] sm:$0xf]  ;;  %v8844_v9 = vor.u32 %v10126_v55, %v8841_v24  ;;  %v9149_v55 = vld [vmem:[%s15423_s7 + $0xb44] sm:$0xf0] }
 0x26b   :  { %5736 = vmatpush.bf16.msrb.mxu3 %v8984_v59  ;;  %v10231_v59 = vld [vmem:[%s15423_s7 + $0xc0c] sm:$0xf] }
 0x26c   :  { %5722 = vmatpush.bf16.msrb.mxu2 %v8760_v35  ;;  %5698 = vmatpush.bf16.msrb.mxu0 %v8200_v21  ;;  %v9899_v35 = vld [vmem:[%s15423_s7 + $0x1a8] sm:$0xf0]  ;;  %v9892_v21 = vld [vmem:[%s15423_s7 + $0x170] sm:$0xf0] }
 0x26d   :  { %v7924_v10 = vor.u32 %v9899_v35, %v7923_v6  ;;  %v7896_v3 = vor.u32 %v9892_v21, %v7895_v62  ;;  %v9871_v6 = vld [vmem:[%s15423_s7 + $0xc8] sm:$0xf0]  ;;  %v10014_v35 = vld [vmem:[%s15423_s7 + $0x544] sm:$0xf]  ;;  %v8119_v62 = vld [vmem:[%s15423_s7 + $0x318] sm:$0xf] }
 0x26e   :  { %5708 = vmatpush.bf16.msrb.mxu1 %v8536_v60  ;;  %v2595_v27 = vpop.f32.mrf.mxu2  ;;  %v9261_v60 = vld [vmem:[%s15423_s7 + $0xc24] sm:$0xf0]  ;;  %v8396_v25 = vor.u32 %v10014_v35, %v8393_v8  ;;  %v7812_v14 = vor.u32 %v9871_v6, %v7811_v5  ;;  %v9233_v21 = vld [vmem:[%s15423_s7 + $0xbec] sm:$0xf0]  ;;  %v10196_v5 = vld [vmem:[%s15423_s7 + $0xaf4] sm:$0xf] }
 0x26f   :  { %5737 = vmatpush.bf16.msrb.mxu3 %v8956_v11  ;;  %v2596_v57 = vadd.f32 %v2595_v27, %v958_v39  ;;  %v9264_v1 = vor.u32 %v10231_v59, %v9261_v60  ;;  %v8120_v27 = vor.u32 %v9948_v19, %v8119_v62  ;;  %v8791_v59 = vld [vmem:[%s15423_s7 + $0x858] sm:$0xf]  ;;  %v10116_v60 = vld [vmem:[%s15423_s7 + $0x870] sm:$0xf0]  ;;  %v9121_v6 = vld [vmem:[%s15423_s7 + $0xb0c] sm:$0xf0] }
 0x270   :  { %5723 = vmatpush.bf16.msrb.mxu2 %v8732_v17  ;;  %5699 = vmatpush.bf16.msrb.mxu0 %v8172_v38  ;;  %v8477_v17 = vld [vmem:[%s15423_s7 + $0x604] sm:$0xf0]  ;;  %v2621_v33 = vpop.f32.mrf.mxu0  ;;  %v10028_v38 = vld [vmem:[%s15423_s7 + $0x5b4] sm:$0xf]  ;;  %v8007_v35 = vld [vmem:[%s15423_s7 + $0x238] sm:$0xf] }
 0x271   :  { %v8480_v29 = vor.u32 %v10035_v45, %v8477_v17  ;;  %v2622_v48 = vadd.f32 %v2621_v33, %v2608_v37  ;;  %v2610_v23 = vadd.f32 %v2609_v49, %v2596_v57  ;;  %v7783_v45 = vld [vmem:[%s15423_s7 + $0x78] sm:$0xf]  ;;  %v9864_v17 = vld [vmem:[%s15423_s7 + $0x90] sm:$0xf0]  ;;  %v7755_v57 = vld [vmem:[%s15423_s7 + $0x40] sm:$0xf] }
 0x272   :  { %5709 = vmatpush.bf16.msrb.mxu1 %v8508_v13  ;;  %5686 = vmatmul.bf16.vlgmr.msra.gmra.mxu3 %v12692_v63  ;;  %v2637_v39 = vpop.f32.mrf.mxu1  ;;  %v9857_v37 = vld [vmem:[%s15423_s7 + $0x58] sm:$0xf0]  ;;  %v9850_v49 = vld [vmem:[%s15423_s7 + $0x20] sm:$0xf0]  ;;  %v9920_v8 = vld [vmem:[%s15423_s7 + $0x250] sm:$0xf0] }
 0x273   :  { %5738 = vmatpush.bf16.msrb.mxu3 %v8928_v28  ;;  %v2636_v42 = vadd.f32 %v2635_v20, %v2622_v48  ;;  %v7784_v28 = vor.u32 %v9864_v17, %v7783_v45  ;;  %v9934_v48 = vld [vmem:[%s15423_s7 + $0x2c0] sm:$0xf0]  ;;  %v9093_v62 = vld [vmem:[%s15423_s7 + $0xad4] sm:$0xf0]  ;;  %v7979_v45 = vld [vmem:[%s15423_s7 + $0x200] sm:$0xf] }
 0x274   :  { %5724 = vmatpush.bf16.msrb.mxu2 %v8704_v47  ;;  %v8452_v47 = vor.u32 %v10028_v38, %v8449_v41  ;;  %v7756_v41 = vor.u32 %v9857_v37, %v7755_v57  ;;  %v9913_v17 = vld [vmem:[%s15423_s7 + $0x218] sm:$0xf0]  ;;  %v10182_v57 = vld [vmem:[%s15423_s7 + $0xa84] sm:$0xf] }
 0x275   :  { %v2702_v11 = vmax.f32 %v2636_v42, 0.0  ;;  %v9927_v42 = vld [vmem:[%s15423_s7 + $0x288] sm:$0xf0] }
 0x276   :  { %5710 = vmatpush.bf16.msrb.mxu1 %v8480_v29  ;;  %v10217_v29 = vld [vmem:[%s15423_s7 + $0xb9c] sm:$0xf] }
 0x277   :  { %5739 = vmatpush.bf16.msrb.mxu3 %v8900_v16  ;;  %v9208_v38 = vor.u32 %v10217_v29, %v9205_v15  ;;  %v10210_v16 = vld [vmem:[%s15423_s7 + $0xb64] sm:$0xf]  ;;  %v7980_v15 = vor.u32 %v9913_v17, %v7979_v45  ;;  %v8287_v17 = vld [vmem:[%s15423_s7 + $0x468] sm:$0xf] }
 0x278   :  { %5725 = vmatpush.bf16.msrb.mxu2 %v8676_v0  ;;  %v8421_v0 = vld [vmem:[%s15423_s7 + $0x594] sm:$0xf0]  ;;  %v2623_v12 = vpop.f32.mrf.mxu0  ;;  %v10266_v45 = vld [vmem:[%s15423_s7 + $0xd24] sm:$0xf] }
 0x279   :  { %v8424_v56 = vor.u32 %v10021_v43, %v8421_v0  ;;  %v2624_v22 = vadd.f32 %v2623_v12, %v2610_v23  ;;  %v10123_v23 = vld [vmem:[%s15423_s7 + $0x8a8] sm:$0xf0]  ;;  %v9180_v0 = vor.u32 %v10210_v16, %v9177_v34  ;;  %v7728_v12 = vor.u32 %v9850_v49, %v7727_v7  ;;  %v9906_v16 = vld [vmem:[%s15423_s7 + $0x1e0] sm:$0xf0]  ;;  %v8371_v34 = vld [vmem:[%s15423_s7 + $0x510] sm:$0xf] }
 0x27a   :  { %5711 = vmatpush.bf16.msrb.mxu1 %v8452_v47  ;;  %v8063_v47 = vld [vmem:[%s15423_s7 + $0x2a8] sm:$0xf]  ;;  %v10011_v7 = vld [vmem:[%s15423_s7 + $0x528] sm:$0xf0] }
 0x27b   :  { %v2638_v58 = vadd.f32 %v2637_v39, %v2624_v22  ;;  %5740 = vmatpush.bf16.msrb.mxu3 %v8872_v53  ;;  %v8064_v43 = vor.u32 %v9934_v48, %v8063_v47  ;;  %v10203_v53 = vld [vmem:[%s15423_s7 + $0xb2c] sm:$0xf]  ;;  %v9485_v49 = vld [vmem:[%s15423_s7 + $0xde4] sm:$0xf0] }
 0x27c   :  { %5726 = vmatpush.bf16.msrb.mxu2 %v8648_v2  ;;  %v7840_v2 = vor.u32 %v9878_v52, %v7839_v51  ;;  %v8819_v51 = vld [vmem:[%s15423_s7 + $0x890] sm:$0xf]  ;;  %v10287_v48 = vld [vmem:[%s15423_s7 + $0xdcc] sm:$0xf] }
 0x27d   :  { %v2710_v13 = vmax.f32 %v2638_v58, 0.0  ;;  %v8792_v58 = vor.u32 %v10116_v60, %v8791_v59  ;;  %v10004_v59 = vld [vmem:[%s15423_s7 + $0x4f0] sm:$0xf0] }
 0x27e   :  { %5712 = vmatpush.bf16.msrb.mxu1 %v8424_v56  ;;  %v8035_v56 = vld [vmem:[%s15423_s7 + $0x270] sm:$0xf] }
 0x27f   :  { %v13297_v20 = vpack.c.bf16 %v2710_v13, %v2702_v11  ;;  %5741 = vmatpush.bf16.msrb.mxu3 %v8844_v9  ;;  %v8763_v11 = vld [vmem:[%s15423_s7 + $0x820] sm:$0xf]  ;;  %v10109_v13 = vld [vmem:[%s15423_s7 + $0x838] sm:$0xf0] }
 0x280   :  { %5727 = vmatpush.bf16.msrb.mxu2 %v8620_v18  ;;  %v8148_v18 = vor.u32 %v9955_v46, %v8147_v4  ;;  %v2663_v52 = vpop.f32.mrf.mxu3  ;;  %v9152_v4 = vor.u32 %v10203_v53, %v9149_v55  ;;  %v8036_v46 = vor.u32 %v9927_v42, %v8035_v56  ;;  %v10095_v53 = vld [vmem:[%s15423_s7 + $0x7c8] sm:$0xf0]  ;;  %v9488_v56 = vor.u32 %v10287_v48, %v9485_v49  ;;  %v8931_v49 = vld [vmem:[%s15423_s7 + $0x970] sm:$0xf] }
 0x281   :  { %5644 = vmatmul.bf16.vlgmr.msra.gmra.mxu0 %v13297_v20  ;;  %v10259_v48 = vld [vmem:[%s15423_s7 + $0xcec] sm:$0xf] }
 0x282   :  { %5713 = vmatpush.bf16.msrb.mxu1 %v8396_v25  ;;  %5748 = vmatpush.bf16.msra.mxu0 %v9264_v1  ;;  %v9124_v1 = vor.u32 %v10196_v5, %v9121_v6  ;;  %v10088_v5 = vld [vmem:[%s15423_s7 + $0x790] sm:$0xf0] }
 0x283   :  { %5728 = vmatmul.bf16.vlgmr.msrb.gmra.mxu2 %v12963_v32  ;;  %5790 = vmatpush.bf16.msra.mxu3 %v8148_v18 }
 0x284   :  { %5776 = vmatpush.bf16.msra.mxu2 %v7924_v10  ;;  %v10224_v10 = vld [vmem:[%s15423_s7 + $0xbd4] sm:$0xf]  ;;  %5742 = vmatmul.bf16.vlgmr.msrb.gmra.mxu3 %v13133_v44 }
 0x285   :  { %v9236_v33 = vor.u32 %v10224_v10, %v9233_v21  ;;  %v10189_v10 = vld [vmem:[%s15423_s7 + $0xabc] sm:$0xf]  ;;  %v8764_v21 = vor.u32 %v10109_v13, %v8763_v11  ;;  %v9429_v13 = vld [vmem:[%s15423_s7 + $0xd74] sm:$0xf0] }
 0x286   :  { %v9096_v54 = vor.u32 %v10189_v10, %v9093_v62  ;;  %v10081_v10 = vld [vmem:[%s15423_s7 + $0x758] sm:$0xf0] }
 0x287   :  { %5791 = vmatpush.bf16.msra.mxu3 %v8120_v27  ;;  %5749 = vmatpush.bf16.msra.mxu0 %v9236_v33  ;;  %v8735_v33 = vld [vmem:[%s15423_s7 + $0x7e8] sm:$0xf] }
 0x288   :  { %5777 = vmatpush.bf16.msra.mxu2 %v7896_v3  ;;  %v2649_v3 = vpop.f32.mrf.mxu2  ;;  %v2665_v19 = vpop.f32.mrf.mxu3 }
 0x28a   :  { %v2691_v24 = vpop.f32.mrf.mxu1 }
 0x28b   :  { %5792 = vmatpush.bf16.msra.mxu3 %v8092_v26  ;;  %5750 = vmatpush.bf16.msra.mxu0 %v9208_v38  ;;  %v9065_v38 = vld [vmem:[%s15423_s7 + $0xa9c] sm:$0xf0] }
 0x28c   :  { %5778 = vmatpush.bf16.msra.mxu2 %v7868_v50  ;;  %v959_v50 = vperm.slane %v13175_v61, 7  ;;  %v8820_v61 = vor.u32 %v10123_v23, %v8819_v51  ;;  %v10179_v51 = vld [vmem:[%s15423_s7 + $0xa68] sm:$0xf0] }
 0x28e   :  { %v2650_v22 = vadd.f32 %v2649_v3, %v959_v50 }
 0x28f   :  { %5793 = vmatpush.bf16.msra.mxu3 %v8064_v43  ;;  %5751 = vmatpush.bf16.msra.mxu0 %v9180_v0  ;;  %v9068_v43 = vor.u32 %v10182_v57, %v9065_v38  ;;  %v9896_v57 = vld [vmem:[%s15423_s7 + $0x194] sm:$0xf] }
 0x290   :  { %5779 = vmatpush.bf16.msra.mxu2 %v7840_v2  ;;  %v2651_v39 = vpop.f32.mrf.mxu2  ;;  %v2677_v2 = vpop.f32.mrf.mxu0  ;;  %v2664_v25 = vadd.f32 %v2663_v52, %v2650_v22  ;;  %v10280_v22 = vld [vmem:[%s15423_s7 + $0xd94] sm:$0xf] }
 0x291   :  { %v2652_v9 = vadd.f32 %v2651_v39, %v959_v50  ;;  %5700 = vmatmul.bf16.vlgmr.msrb.gmra.mxu0 %v12836_v36  ;;  %v9043_v50 = vld [vmem:[%s15423_s7 + $0xa50] sm:$0xf] }
 0x292   :  { %v2678_v18 = vadd.f32 %v2677_v2, %v2664_v25  ;;  %v2693_v37 = vpop.f32.mrf.mxu1  ;;  %v9044_v42 = vor.u32 %v10179_v51, %v9043_v50  ;;  %v9457_v39 = vld [vmem:[%s15423_s7 + $0xdac] sm:$0xf0]  ;;  %v9015_v2 = vld [vmem:[%s15423_s7 + $0xa18] sm:$0xf]  ;;  %v9997_v25 = vld [vmem:[%s15423_s7 + $0x4b8] sm:$0xf0] }
 0x293   :  { %5752 = vmatpush.bf16.msra.mxu0 %v9152_v4  ;;  %5794 = vmatpush.bf16.msra.mxu3 %v8036_v46  ;;  %v2666_v27 = vadd.f32 %v2665_v19, %v2652_v9  ;;  %v10172_v4 = vld [vmem:[%s15423_s7 + $0xa30] sm:$0xf0]  ;;  %v8679_v46 = vld [vmem:[%s15423_s7 + $0x778] sm:$0xf]  ;;  %v9460_v6 = vor.u32 %v10280_v22, %v9457_v39  ;;  %v8315_v9 = vld [vmem:[%s15423_s7 + $0x4a0] sm:$0xf] }
 0x294   :  { %5780 = vmatpush.bf16.msra.mxu2 %v7812_v14  ;;  %v8008_v14 = vor.u32 %v9920_v8, %v8007_v35  ;;  %v2692_v31 = vadd.f32 %v2691_v24, %v2678_v18  ;;  %v8343_v24 = vld [vmem:[%s15423_s7 + $0x4d8] sm:$0xf]  ;;  %v9016_v35 = vor.u32 %v10172_v4, %v9015_v2  ;;  %v10273_v8 = vld [vmem:[%s15423_s7 + $0xd5c] sm:$0xf]  ;;  %v8680_v11 = vor.u32 %v10088_v5, %v8679_v46  ;;  %v8987_v18 = vld [vmem:[%s15423_s7 + $0x9e0] sm:$0xf] }
 0x295   :  { %v8316_v62 = vor.u32 %v9997_v25, %v8315_v9  ;;  %v9432_v19 = vor.u32 %v10273_v8, %v9429_v13  ;;  %v10151_v50 = vld [vmem:[%s15423_s7 + $0x988] sm:$0xf0]  ;;  %v8903_v22 = vld [vmem:[%s15423_s7 + $0x938] sm:$0xf]  ;;  %v7869_v39 = vld [vmem:[%s15423_s7 + $0x13c] sm:$0xf0] }
 0x296   :  { %v2703_v23 = vmax.f32 %v2692_v31, 0.0  ;;  %v8623_v31 = vld [vmem:[%s15423_s7 + $0x708] sm:$0xf]  ;;  %v8203_v4 = vld [vmem:[%s15423_s7 + $0x3c0] sm:$0xf] }
 0x297   :  { %5753 = vmatpush.bf16.msra.mxu0 %v9124_v1  ;;  %5795 = vmatpush.bf16.msra.mxu3 %v8008_v14  ;;  %v10165_v1 = vld [vmem:[%s15423_s7 + $0x9f8] sm:$0xf0]  ;;  %v8651_v14 = vld [vmem:[%s15423_s7 + $0x740] sm:$0xf]  ;;  %v9875_v25 = vld [vmem:[%s15423_s7 + $0xec] sm:$0xf] }
 0x298   :  { %5781 = vmatpush.bf16.msra.mxu2 %v7784_v28  ;;  %v10102_v28 = vld [vmem:[%s15423_s7 + $0x800] sm:$0xf0]  ;;  %v2679_v29 = vpop.f32.mrf.mxu0  ;;  %v9969_v46 = vld [vmem:[%s15423_s7 + $0x3d8] sm:$0xf0]  ;;  %v8875_v8 = vld [vmem:[%s15423_s7 + $0x900] sm:$0xf] }
 0x299   :  { %v2680_v3 = vadd.f32 %v2679_v29, %v2666_v27  ;;  %v8736_v26 = vor.u32 %v10102_v28, %v8735_v33  ;;  %v9990_v27 = vld [vmem:[%s15423_s7 + $0x480] sm:$0xf0]  ;;  %v8652_v33 = vor.u32 %v10081_v10, %v8651_v14  ;;  %v9401_v28 = vld [vmem:[%s15423_s7 + $0xd3c] sm:$0xf0]  ;;  %v8959_v29 = vld [vmem:[%s15423_s7 + $0x9a8] sm:$0xf] }
 0x29a   :  { %v10137_v9 = vld [vmem:[%s15423_s7 + $0x918] sm:$0xf0]  ;;  %v7841_v13 = vld [vmem:[%s15423_s7 + $0x104] sm:$0xf0] }
 0x29b   :  { %v2694_v47 = vadd.f32 %v2693_v37, %v2680_v3  ;;  %5754 = vmatpush.bf16.msra.mxu0 %v9096_v54  ;;  %5796 = vmatpush.bf16.msra.mxu3 %v7980_v15  ;;  %v10158_v54 = vld [vmem:[%s15423_s7 + $0x9c0] sm:$0xf0]  ;;  %v8288_v15 = vor.u32 %v9990_v27, %v8287_v17  ;;  %v7925_v37 = vld [vmem:[%s15423_s7 + $0x1ac] sm:$0xf0]  ;;  %v8175_v10 = vld [vmem:[%s15423_s7 + $0x388] sm:$0xf] }
 0x29c   :  { %5782 = vmatpush.bf16.msra.mxu2 %v7756_v41  ;;  %v7951_v41 = vld [vmem:[%s15423_s7 + $0x1c8] sm:$0xf]  ;;  %v10074_v3 = vld [vmem:[%s15423_s7 + $0x720] sm:$0xf0]  ;;  %v8960_v38 = vor.u32 %v10158_v54, %v8959_v29  ;;  %v9267_v17 = vld [vmem:[%s15423_s7 + $0xc10] sm:$0xf] }
 0x29d   :  { %v2711_v52 = vmax.f32 %v2694_v47, 0.0  ;;  %v7952_v0 = vor.u32 %v9906_v16, %v7951_v41  ;;  %v8259_v41 = vld [vmem:[%s15423_s7 + $0x430] sm:$0xf]  ;;  %v9983_v16 = vld [vmem:[%s15423_s7 + $0x448] sm:$0xf0]  ;;  %v8624_v47 = vor.u32 %v10074_v3, %v8623_v31 }
 0x29e   :  { %v8260_v51 = vor.u32 %v9983_v16, %v8259_v41  ;;  %v10235_v27 = vld [vmem:[%s15423_s7 + $0xc28] sm:$0xf0]  ;;  %v9952_v54 = vld [vmem:[%s15423_s7 + $0x354] sm:$0xf]  ;;  %v8149_v3 = vld [vmem:[%s15423_s7 + $0x36c] sm:$0xf0] }
 0x29f   :  { %v13445_v55 = vpack.c.bf16 %v2711_v52, %v2703_v23  ;;  %5755 = vmatpush.bf16.msra.mxu0 %v9068_v43  ;;  %5797 = vmatpush.bf16.msra.mxu3 %v7952_v0  ;;  %v9889_v23 = vld [vmem:[%s15423_s7 + $0x15c] sm:$0xf]  ;;  %v7897_v52 = vld [vmem:[%s15423_s7 + $0x174] sm:$0xf0]  ;;  %v10067_v29 = vld [vmem:[%s15423_s7 + $0x6e8] sm:$0xf0] }
 0x2a0   :  { %5783 = vmatpush.bf16.msra.mxu2 %v7728_v12  ;;  %v8707_v12 = vld [vmem:[%s15423_s7 + $0x7b0] sm:$0xf]  ;;  %v8231_v0 = vld [vmem:[%s15423_s7 + $0x3f8] sm:$0xf] }
 0x2a1   :  { %v8708_v60 = vor.u32 %v10095_v53, %v8707_v12  ;;  %5658 = vmatmul.bf16.vlgmr.msra.gmra.mxu1 %v13445_v55  ;;  %v9976_v12 = vld [vmem:[%s15423_s7 + $0x410] sm:$0xf0]  ;;  %v8932_v53 = vor.u32 %v10151_v50, %v8931_v49  ;;  %v9239_v16 = vld [vmem:[%s15423_s7 + $0xbd8] sm:$0xf]  ;;  %v9945_v50 = vld [vmem:[%s15423_s7 + $0x31c] sm:$0xf] }
 0x2a2   :  { %5762 = vmatpush.bf16.msra.mxu1 %v9488_v56  ;;  %5798 = vmatmul.bf16.vlgmr.msra.gmra.mxu3 %v12692_v63  ;;  %v9345_v56 = vld [vmem:[%s15423_s7 + $0xccc] sm:$0xf0]  ;;  %v10060_v49 = vld [vmem:[%s15423_s7 + $0x6b0] sm:$0xf0] }
 0x2a3   :  { %5784 = vmatmul.bf16.vlgmr.msra.gmra.mxu2 %v12736_v30  ;;  %5846 = vmatpush.bf16.msrb.mxu3 %v9044_v42  ;;  %v7900_v42 = vor.u32 %v9889_v23, %v7897_v52  ;;  %v9861_v23 = vld [vmem:[%s15423_s7 + $0x7c] sm:$0xf]  ;;  %v7785_v52 = vld [vmem:[%s15423_s7 + $0x94] sm:$0xf0] }
 0x2a4   :  { %5832 = vmatpush.bf16.msrb.mxu2 %v8820_v61  ;;  %v8372_v61 = vor.u32 %v10011_v7, %v8371_v34  ;;  %5756 = vmatmul.bf16.vlgmr.msra.gmra.mxu0 %v13297_v20  ;;  %v9373_v34 = vld [vmem:[%s15423_s7 + $0xd04] sm:$0xf0]  ;;  %v7928_v7 = vor.u32 %v9896_v57, %v7925_v37  ;;  %v7813_v57 = vld [vmem:[%s15423_s7 + $0xcc] sm:$0xf0] }
 0x2a5   :  { %v9376_v43 = vor.u32 %v10259_v48, %v9373_v34  ;;  %v8152_v48 = vor.u32 %v9952_v54, %v8149_v3  ;;  %v8793_v3 = vld [vmem:[%s15423_s7 + $0x874] sm:$0xf0] }
 0x2a6   :  { %5804 = vmatpush.bf16.msrb.mxu0 %v8372_v61  ;;  %5763 = vmatpush.bf16.msra.mxu1 %v9460_v6  ;;  %v10252_v61 = vld [vmem:[%s15423_s7 + $0xcb4] sm:$0xf]  ;;  %v9317_v6 = vld [vmem:[%s15423_s7 + $0xc94] sm:$0xf0] }
 0x2a7   :  { %5847 = vmatpush.bf16.msrb.mxu3 %v9016_v35  ;;  %v9348_v2 = vor.u32 %v10252_v61, %v9345_v56  ;;  %v7788_v56 = vor.u32 %v9861_v23, %v7785_v52  ;;  %v10193_v23 = vld [vmem:[%s15423_s7 + $0xad8] sm:$0xf0] }
 0x2a8   :  { %5833 = vmatpush.bf16.msrb.mxu2 %v8792_v58  ;;  %v8344_v58 = vor.u32 %v10004_v59, %v8343_v24  ;;  %v10144_v24 = vld [vmem:[%s15423_s7 + $0x950] sm:$0xf0]  ;;  %v8232_v59 = vor.u32 %v9976_v12, %v8231_v0  ;;  %v9211_v12 = vld [vmem:[%s15423_s7 + $0xba0] sm:$0xf] }
 0x2a9   :  { %v8904_v5 = vor.u32 %v10144_v24, %v8903_v22  ;;  %v10053_v22 = vld [vmem:[%s15423_s7 + $0x678] sm:$0xf0]  ;;  %v9938_v24 = vld [vmem:[%s15423_s7 + $0x2e4] sm:$0xf] }
 0x2aa   :  { %5805 = vmatpush.bf16.msrb.mxu0 %v8344_v58  ;;  %5764 = vmatpush.bf16.msra.mxu1 %v9432_v19  ;;  %v10245_v58 = vld [vmem:[%s15423_s7 + $0xc7c] sm:$0xf]  ;;  %v8847_v19 = vld [vmem:[%s15423_s7 + $0x8c8] sm:$0xf] }
 0x2ab   :  { %v9320_v14 = vor.u32 %v10245_v58, %v9317_v6 }
 0x2ac   :  { %5834 = vmatpush.bf16.msrb.mxu2 %v8764_v21  ;;  %v8988_v21 = vor.u32 %v10165_v1, %v8987_v18  ;;  %v10238_v18 = vld [vmem:[%s15423_s7 + $0xc44] sm:$0xf]  ;;  %v9289_v1 = vld [vmem:[%s15423_s7 + $0xc5c] sm:$0xf0] }
 0x2ad   :  { %v9292_v37 = vor.u32 %v10238_v18, %v9289_v1  ;;  %v10120_v1 = vld [vmem:[%s15423_s7 + $0x894] sm:$0xf] }
 0x2ae   :  { %5806 = vmatpush.bf16.msrb.mxu0 %v8316_v62  ;;  %5848 = vmatpush.bf16.msrb.mxu3 %v8988_v21  ;;  %v9962_v62 = vld [vmem:[%s15423_s7 + $0x3a0] sm:$0xf0]  ;;  %v8876_v21 = vor.u32 %v10137_v9, %v8875_v8  ;;  %v9931_v9 = vld [vmem:[%s15423_s7 + $0x2ac] sm:$0xf] }
 0x2af   :  { %v8176_v31 = vor.u32 %v9962_v62, %v8175_v10  ;;  %v10046_v8 = vld [vmem:[%s15423_s7 + $0x640] sm:$0xf0]  ;;  %v9155_v62 = vld [vmem:[%s15423_s7 + $0xb30] sm:$0xf] }
 0x2b0   :  { %5835 = vmatpush.bf16.msrb.mxu2 %v8736_v26  ;;  %v9404_v26 = vor.u32 %v10266_v45, %v9401_v28  ;;  %v10130_v45 = vld [vmem:[%s15423_s7 + $0x8e0] sm:$0xf0]  ;;  %v8595_v28 = vld [vmem:[%s15423_s7 + $0x6d0] sm:$0xf] }
 0x2b1   :  { %5714 = vmatmul.bf16.vlgmr.msrb.gmra.mxu1 %v12815_v40  ;;  %v8596_v41 = vor.u32 %v10067_v29, %v8595_v28  ;;  %v9924_v28 = vld [vmem:[%s15423_s7 + $0x274] sm:$0xf]  ;;  %v8037_v29 = vld [vmem:[%s15423_s7 + $0x28c] sm:$0xf0] }
 0x2b2   :  { %5807 = vmatpush.bf16.msrb.mxu0 %v8288_v15  ;;  %5765 = vmatpush.bf16.msra.mxu1 %v9404_v26  ;;  %v9868_v15 = vld [vmem:[%s15423_s7 + $0xb4] sm:$0xf]  ;;  %v9268_v26 = vor.u32 %v10235_v27, %v9267_v17  ;;  %v8483_v17 = vld [vmem:[%s15423_s7 + $0x5f0] sm:$0xf]  ;;  %v10039_v27 = vld [vmem:[%s15423_s7 + $0x608] sm:$0xf0] }
 0x2b3   :  { %5849 = vmatpush.bf16.msrb.mxu3 %v8960_v38  ;;  %v8848_v38 = vor.u32 %v10130_v45, %v8847_v19  ;;  %v7816_v34 = vor.u32 %v9868_v15, %v7813_v57  ;;  %v10207_v19 = vld [vmem:[%s15423_s7 + $0xb48] sm:$0xf0]  ;;  %v8484_v15 = vor.u32 %v10039_v27, %v8483_v17  ;;  %v9127_v57 = vld [vmem:[%s15423_s7 + $0xaf8] sm:$0xf] }
 0x2b4   :  { %5836 = vmatpush.bf16.msrb.mxu2 %v8708_v60  ;;  %v9882_v60 = vld [vmem:[%s15423_s7 + $0x124] sm:$0xf]  ;;  %v9156_v54 = vor.u32 %v10207_v19, %v9155_v62 }
 0x2b5   :  { %v7872_v35 = vor.u32 %v9882_v60, %v7869_v39  ;;  %v9854_v60 = vld [vmem:[%s15423_s7 + $0x44] sm:$0xf]  ;;  %v7757_v39 = vld [vmem:[%s15423_s7 + $0x5c] sm:$0xf0] }
 0x2b6   :  { %5808 = vmatpush.bf16.msrb.mxu0 %v8260_v51  ;;  %5766 = vmatpush.bf16.msra.mxu1 %v9376_v43  ;;  %v8121_v51 = vld [vmem:[%s15423_s7 + $0x334] sm:$0xf0]  ;;  %v7760_v6 = vor.u32 %v9854_v60, %v7757_v39  ;;  %v9071_v39 = vld [vmem:[%s15423_s7 + $0xa88] sm:$0xf] }
 0x2b7   :  { %5850 = vmatpush.bf16.msrb.mxu3 %v8932_v53  ;;  %v10221_v53 = vld [vmem:[%s15423_s7 + $0xbb8] sm:$0xf0]  ;;  %v8124_v61 = vor.u32 %v9945_v50, %v8121_v51  ;;  %v9099_v51 = vld [vmem:[%s15423_s7 + $0xac0] sm:$0xf] }
 0x2b8   :  { %5837 = vmatpush.bf16.msrb.mxu2 %v8680_v11  ;;  %v8204_v11 = vor.u32 %v9969_v46, %v8203_v4  ;;  %v9183_v46 = vld [vmem:[%s15423_s7 + $0xb68] sm:$0xf] }
 0x2ba   :  { %5809 = vmatpush.bf16.msrb.mxu0 %v8232_v59  ;;  %5767 = vmatpush.bf16.msra.mxu1 %v9348_v2  ;;  %v8093_v59 = vld [vmem:[%s15423_s7 + $0x2fc] sm:$0xf0]  ;;  %v9212_v2 = vor.u32 %v10221_v53, %v9211_v12  ;;  %v9910_v53 = vld [vmem:[%s15423_s7 + $0x204] sm:$0xf] }
 0x2bb   :  { %5851 = vmatpush.bf16.msrb.mxu3 %v8904_v5  ;;  %v10214_v5 = vld [vmem:[%s15423_s7 + $0xb80] sm:$0xf0]  ;;  %v8096_v58 = vor.u32 %v9938_v24, %v8093_v59  ;;  %v8399_v24 = vld [vmem:[%s15423_s7 + $0x548] sm:$0xf] }
 0x2bc   :  { %5838 = vmatpush.bf16.msrb.mxu2 %v8652_v33  ;;  %v7844_v33 = vor.u32 %v9875_v25, %v7841_v13  ;;  %v8065_v25 = vld [vmem:[%s15423_s7 + $0x2c4] sm:$0xf0]  ;;  %v9184_v18 = vor.u32 %v10214_v5, %v9183_v46  ;;  %v10018_v59 = vld [vmem:[%s15423_s7 + $0x560] sm:$0xf0] }
 0x2bd   :  { %v7729_v13 = vld [vmem:[%s15423_s7 + $0x24] sm:$0xf0] }
 0x2be   :  { %5810 = vmatpush.bf16.msrb.mxu0 %v8204_v11  ;;  %5768 = vmatpush.bf16.msra.mxu1 %v9320_v14  ;;  %v9847_v11 = vld [vmem:[%s15423_s7 + $0xc] sm:$0xf]  ;;  %v8821_v14 = vld [vmem:[%s15423_s7 + $0x8ac] sm:$0xf0]  ;;  %v7953_v5 = vld [vmem:[%s15423_s7 + $0x1e4] sm:$0xf0] }
 0x2bf   :  { %5852 = vmatpush.bf16.msrb.mxu3 %v8876_v21  ;;  %v8068_v21 = vor.u32 %v9931_v9, %v8065_v25  ;;  %v7732_v45 = vor.u32 %v9847_v11, %v7729_v13  ;;  %v10291_v9 = vld [vmem:[%s15423_s7 + $0xde8] sm:$0xf0]  ;;  %v10176_v25 = vld [vmem:[%s15423_s7 + $0xa54] sm:$0xf]  ;;  %v9045_v13 = vld [vmem:[%s15423_s7 + $0xa6c] sm:$0xf0] }
 0x2c0   :  { %5839 = vmatpush.bf16.msrb.mxu2 %v8624_v47  ;;  %v10228_v47 = vld [vmem:[%s15423_s7 + $0xbf0] sm:$0xf0]  ;;  %v9048_v17 = vor.u32 %v10176_v25, %v9045_v13  ;;  %v9893_v13 = vld [vmem:[%s15423_s7 + $0x178] sm:$0xf0] }
 0x2c1   :  { %v9240_v43 = vor.u32 %v10228_v47, %v9239_v16  ;;  %v9917_v47 = vld [vmem:[%s15423_s7 + $0x23c] sm:$0xf] }
 0x2c2   :  { %5811 = vmatpush.bf16.msrb.mxu0 %v8176_v31  ;;  %5769 = vmatpush.bf16.msra.mxu1 %v9292_v37  ;;  %v10113_v31 = vld [vmem:[%s15423_s7 + $0x85c] sm:$0xf]  ;;  %v10200_v37 = vld [vmem:[%s15423_s7 + $0xb10] sm:$0xf0] }
 0x2c3   :  { %5840 = vmatmul.bf16.vlgmr.msrb.gmra.mxu2 %v12963_v32  ;;  %5853 = vmatpush.bf16.msrb.mxu3 %v8848_v38  ;;  %v8455_v38 = vld [vmem:[%s15423_s7 + $0x5b8] sm:$0xf]  ;;  %v8796_v16 = vor.u32 %v10113_v31, %v8793_v3  ;;  %v10085_v31 = vld [vmem:[%s15423_s7 + $0x77c] sm:$0xf] }
 0x2c4   :  { %5888 = vmatpush.bf16.msra.mxu2 %v7928_v7  ;;  %v8567_v7 = vld [vmem:[%s15423_s7 + $0x698] sm:$0xf] }
 0x2c5   :  { %v8568_v0 = vor.u32 %v10060_v49, %v8567_v7  ;;  %5812 = vmatmul.bf16.vlgmr.msrb.gmra.mxu0 %v12836_v36  ;;  %5770 = vmatmul.bf16.vlgmr.msra.gmra.mxu1 %v13445_v55  ;;  %v10106_v7 = vld [vmem:[%s15423_s7 + $0x824] sm:$0xf]  ;;  %v8765_v49 = vld [vmem:[%s15423_s7 + $0x83c] sm:$0xf0]  ;;  %v8681_v3 = vld [vmem:[%s15423_s7 + $0x794] sm:$0xf0] }
 0x2c6   :  { %5860 = vmatpush.bf16.msra.mxu0 %v9268_v26  ;;  %5818 = vmatpush.bf16.msrb.mxu1 %v8596_v41  ;;  %v8040_v26 = vor.u32 %v9924_v28, %v8037_v29  ;;  %v10032_v41 = vld [vmem:[%s15423_s7 + $0x5d0] sm:$0xf0]  ;;  %v8768_v12 = vor.u32 %v10106_v7, %v8765_v49  ;;  %v10169_v29 = vld [vmem:[%s15423_s7 + $0xa1c] sm:$0xf]  ;;  %v10078_v7 = vld [vmem:[%s15423_s7 + $0x744] sm:$0xf] }
 0x2c7   :  { %5902 = vmatpush.bf16.msra.mxu3 %v8152_v48  ;;  %v8009_v48 = vld [vmem:[%s15423_s7 + $0x254] sm:$0xf0]  ;;  %v8456_v50 = vor.u32 %v10032_v41, %v8455_v38  ;;  %v10284_v28 = vld [vmem:[%s15423_s7 + $0xdb0] sm:$0xf0]  ;;  %v8684_v41 = vor.u32 %v10085_v31, %v8681_v3  ;;  %v8653_v49 = vld [vmem:[%s15423_s7 + $0x75c] sm:$0xf0] }
 0x2c8   :  { %5889 = vmatpush.bf16.msra.mxu2 %v7900_v42  ;;  %v8539_v42 = vld [vmem:[%s15423_s7 + $0x660] sm:$0xf]  ;;  %5854 = vmatmul.bf16.vlgmr.msrb.gmra.mxu3 %v13133_v44  ;;  %v8012_v52 = vor.u32 %v9917_v47, %v8009_v48  ;;  %v10277_v47 = vld [vmem:[%s15423_s7 + $0xd78] sm:$0xf0]  ;;  %v10162_v48 = vld [vmem:[%s15423_s7 + $0x9e4] sm:$0xf] }
 0x2c9   :  { %v8540_v4 = vor.u32 %v10053_v22, %v8539_v42  ;;  %v9100_v42 = vor.u32 %v10193_v23, %v9099_v51  ;;  %v8737_v22 = vld [vmem:[%s15423_s7 + $0x804] sm:$0xf0]  ;;  %v9987_v23 = vld [vmem:[%s15423_s7 + $0x46c] sm:$0xf]  ;;  %v8205_v31 = vld [vmem:[%s15423_s7 + $0x3dc] sm:$0xf0] }
 0x2ca   :  { %5861 = vmatpush.bf16.msra.mxu0 %v9240_v43  ;;  %5819 = vmatpush.bf16.msrb.mxu1 %v8568_v0  ;;  %v8427_v43 = vld [vmem:[%s15423_s7 + $0x580] sm:$0xf]  ;;  %v10025_v0 = vld [vmem:[%s15423_s7 + $0x598] sm:$0xf0] }
 0x2cb   :  { %5903 = vmatpush.bf16.msra.mxu3 %v8124_v61  ;;  %v7981_v61 = vld [vmem:[%s15423_s7 + $0x21c] sm:$0xf0]  ;;  %v8428_v60 = vor.u32 %v10025_v0, %v8427_v43  ;;  %v8656_v0 = vor.u32 %v10078_v7, %v8653_v49  ;;  %v9959_v49 = vld [vmem:[%s15423_s7 + $0x38c] sm:$0xf] }
 0x2cc   :  { %5890 = vmatpush.bf16.msra.mxu2 %v7872_v35  ;;  %v8511_v35 = vld [vmem:[%s15423_s7 + $0x628] sm:$0xf]  ;;  %v7984_v46 = vor.u32 %v9910_v53, %v7981_v61  ;;  %v10270_v53 = vld [vmem:[%s15423_s7 + $0xd40] sm:$0xf0]  ;;  %v10155_v61 = vld [vmem:[%s15423_s7 + $0x9ac] sm:$0xf] }
 0x2cd   :  { %v8512_v10 = vor.u32 %v10046_v8, %v8511_v35  ;;  %v9491_v8 = vld [vmem:[%s15423_s7 + $0xdd0] sm:$0xf] }
 0x2ce   :  { %5862 = vmatpush.bf16.msra.mxu0 %v9212_v2  ;;  %5820 = vmatpush.bf16.msrb.mxu1 %v8540_v4  ;;  %v10186_v2 = vld [vmem:[%s15423_s7 + $0xaa0] sm:$0xf0]  ;;  %v9903_v4 = vld [vmem:[%s15423_s7 + $0x1cc] sm:$0xf]  ;;  %v9492_v19 = vor.u32 %v10291_v9, %v9491_v8  ;;  %v10148_v8 = vld [vmem:[%s15423_s7 + $0x974] sm:$0xf] }
 0x2cf   :  { %5904 = vmatpush.bf16.msra.mxu3 %v8096_v58  ;;  %v10008_v58 = vld [vmem:[%s15423_s7 + $0x514] sm:$0xf]  ;;  %v9072_v11 = vor.u32 %v10186_v2, %v9071_v39  ;;  %v7956_v62 = vor.u32 %v9903_v4, %v7953_v5  ;;  %v8261_v4 = vld [vmem:[%s15423_s7 + $0x44c] sm:$0xf0] }
 0x2d0   :  { %5891 = vmatpush.bf16.msra.mxu2 %v7844_v33  ;;  %v8824_v33 = vor.u32 %v10120_v1, %v8821_v14  ;;  %v8709_v1 = vld [vmem:[%s15423_s7 + $0x7cc] sm:$0xf0]  ;;  %v8400_v14 = vor.u32 %v10018_v59, %v8399_v24  ;;  %v7931_v59 = vld [vmem:[%s15423_s7 + $0x198] sm:$0xf]  ;;  %v9980_v2 = vld [vmem:[%s15423_s7 + $0x434] sm:$0xf] }
 0x2d1   :  { %v8933_v9 = vld [vmem:[%s15423_s7 + $0x98c] sm:$0xf0]  ;;  %v8264_v25 = vor.u32 %v9980_v2, %v8261_v4 }
 0x2d2   :  { %5863 = vmatpush.bf16.msra.mxu0 %v9184_v18  ;;  %5821 = vmatpush.bf16.msrb.mxu1 %v8512_v10  ;;  %v10092_v18 = vld [vmem:[%s15423_s7 + $0x7b4] sm:$0xf] }
 0x2d3   :  { %5905 = vmatpush.bf16.msra.mxu3 %v8068_v21  ;;  %v10001_v21 = vld [vmem:[%s15423_s7 + $0x4dc] sm:$0xf]  ;;  %v8712_v27 = vor.u32 %v10092_v18, %v8709_v1 }
 0x2d4   :  { %5892 = vmatpush.bf16.msra.mxu2 %v7816_v34  ;;  %v9128_v34 = vor.u32 %v10200_v37, %v9127_v57  ;;  %v9994_v37 = vld [vmem:[%s15423_s7 + $0x4a4] sm:$0xf]  ;;  %v9973_v1 = vld [vmem:[%s15423_s7 + $0x3fc] sm:$0xf] }
 0x2d6   :  { %5864 = vmatpush.bf16.msra.mxu0 %v9156_v54  ;;  %5822 = vmatpush.bf16.msrb.mxu1 %v8484_v15  ;;  %v9017_v54 = vld [vmem:[%s15423_s7 + $0xa34] sm:$0xf0] }
 0x2d7   :  { %5906 = vmatpush.bf16.msra.mxu3 %v8040_v26  ;;  %v8317_v26 = vld [vmem:[%s15423_s7 + $0x4bc] sm:$0xf0]  ;;  %v9020_v38 = vor.u32 %v10169_v29, %v9017_v54  ;;  %v9966_v54 = vld [vmem:[%s15423_s7 + $0x3c4] sm:$0xf] }
 0x2d8   :  { %5893 = vmatpush.bf16.msra.mxu2 %v7788_v56  ;;  %v10099_v56 = vld [vmem:[%s15423_s7 + $0x7ec] sm:$0xf] }
 0x2d9   :  { %v8740_v35 = vor.u32 %v10099_v56, %v8737_v22  ;;  %v8961_v56 = vld [vmem:[%s15423_s7 + $0x9c4] sm:$0xf0] }
 0x2da   :  { %5865 = vmatpush.bf16.msra.mxu0 %v9128_v34  ;;  %5823 = vmatpush.bf16.msrb.mxu1 %v8456_v50  ;;  %v8989_v34 = vld [vmem:[%s15423_s7 + $0x9fc] sm:$0xf0]  ;;  %v8320_v50 = vor.u32 %v9994_v37, %v8317_v26  ;;  %v8625_v22 = vld [vmem:[%s15423_s7 + $0x724] sm:$0xf0]  ;;  %v10134_v26 = vld [vmem:[%s15423_s7 + $0x904] sm:$0xf] }
 0x2db   :  { %5907 = vmatpush.bf16.msra.mxu3 %v8012_v52  ;;  %v8289_v52 = vld [vmem:[%s15423_s7 + $0x484] sm:$0xf0]  ;;  %v8992_v43 = vor.u32 %v10162_v48, %v8989_v34  ;;  %v10242_v34 = vld [vmem:[%s15423_s7 + $0xc60] sm:$0xf0] }
 0x2dc   :  { %5894 = vmatpush.bf16.msra.mxu2 %v7760_v6  ;;  %v8373_v6 = vld [vmem:[%s15423_s7 + $0x52c] sm:$0xf0]  ;;  %v8292_v24 = vor.u32 %v9987_v23, %v8289_v52  ;;  %v9295_v48 = vld [vmem:[%s15423_s7 + $0xc48] sm:$0xf] }
 0x2dd   :  { %v8376_v10 = vor.u32 %v10008_v58, %v8373_v6  ;;  %v9379_v58 = vld [vmem:[%s15423_s7 + $0xcf0] sm:$0xf]  ;;  %v10263_v6 = vld [vmem:[%s15423_s7 + $0xd08] sm:$0xf0]  ;;  %v8849_v52 = vld [vmem:[%s15423_s7 + $0x8e4] sm:$0xf0] }
 0x2de   :  { %5866 = vmatpush.bf16.msra.mxu0 %v9100_v42  ;;  %5824 = vmatpush.bf16.msrb.mxu1 %v8428_v60  ;;  %v10071_v42 = vld [vmem:[%s15423_s7 + $0x70c] sm:$0xf]  ;;  %v9900_v60 = vld [vmem:[%s15423_s7 + $0x1b0] sm:$0xf0]  ;;  %v9380_v18 = vor.u32 %v10263_v6, %v9379_v58 }
 0x2df   :  { %5908 = vmatpush.bf16.msra.mxu3 %v7984_v46  ;;  %v8964_v46 = vor.u32 %v10155_v61, %v8961_v56  ;;  %v8628_v5 = vor.u32 %v10071_v42, %v8625_v22  ;;  %v8597_v61 = vld [vmem:[%s15423_s7 + $0x6ec] sm:$0xf0]  ;;  %v8155_v56 = vld [vmem:[%s15423_s7 + $0x358] sm:$0xf]  ;;  %v9956_v22 = vld [vmem:[%s15423_s7 + $0x370] sm:$0xf0] }
 0x2e0   :  { %5895 = vmatpush.bf16.msra.mxu2 %v7732_v45  ;;  %v8345_v45 = vld [vmem:[%s15423_s7 + $0x4f4] sm:$0xf0]  ;;  %v8156_v58 = vor.u32 %v9956_v22, %v8155_v56  ;;  %v9928_v22 = vld [vmem:[%s15423_s7 + $0x290] sm:$0xf0] }
 0x2e1   :  { %v8348_v15 = vor.u32 %v10001_v21, %v8345_v45  ;;  %v10141_v45 = vld [vmem:[%s15423_s7 + $0x93c] sm:$0xf] }
 0x2e2   :  { %5867 = vmatpush.bf16.msra.mxu0 %v9072_v11  ;;  %5825 = vmatpush.bf16.msrb.mxu1 %v8400_v14  ;;  %v7903_v11 = vld [vmem:[%s15423_s7 + $0x160] sm:$0xf]  ;;  %v8233_v14 = vld [vmem:[%s15423_s7 + $0x414] sm:$0xf0] }
 0x2e3   :  { %5896 = vmatmul.bf16.vlgmr.msra.gmra.mxu2 %v12736_v30  ;;  %5909 = vmatpush.bf16.msra.mxu3 %v7956_v62  ;;  %v9351_v62 = vld [vmem:[%s15423_s7 + $0xcb8] sm:$0xf]  ;;  %v7904_v21 = vor.u32 %v9893_v13, %v7903_v11  ;;  %v7791_v11 = vld [vmem:[%s15423_s7 + $0x80] sm:$0xf]  ;;  %v9865_v13 = vld [vmem:[%s15423_s7 + $0x98] sm:$0xf0] }
 0x2e4   :  { %5944 = vmatpush.bf16.msrb.mxu2 %v8824_v33  ;;  %v9463_v33 = vld [vmem:[%s15423_s7 + $0xd98] sm:$0xf] }
 0x2e5   :  { %v9464_v57 = vor.u32 %v10284_v28, %v9463_v33  ;;  %5826 = vmatmul.bf16.vlgmr.msrb.gmra.mxu1 %v12815_v40  ;;  %5868 = vmatmul.bf16.vlgmr.msra.gmra.mxu0 %v13297_v20  ;;  %v7875_v33 = vld [vmem:[%s15423_s7 + $0x128] sm:$0xf]  ;;  %v9886_v28 = vld [vmem:[%s15423_s7 + $0x140] sm:$0xf0] }
 0x2e6   :  { %5916 = vmatpush.bf16.msrb.mxu0 %v8376_v10  ;;  %5874 = vmatpush.bf16.msra.mxu1 %v9492_v19  ;;  %v8936_v10 = vor.u32 %v10148_v8, %v8933_v9  ;;  %v10256_v19 = vld [vmem:[%s15423_s7 + $0xcd0] sm:$0xf0]  ;;  %v7876_v37 = vor.u32 %v9886_v28, %v7875_v33  ;;  %v8569_v8 = vld [vmem:[%s15423_s7 + $0x6b4] sm:$0xf0]  ;;  %v8127_v9 = vld [vmem:[%s15423_s7 + $0x320] sm:$0xf] }
 0x2e7   :  { %5958 = vmatpush.bf16.msrb.mxu3 %v9048_v17  ;;  %v8905_v17 = vld [vmem:[%s15423_s7 + $0x954] sm:$0xf0]  ;;  %v9352_v29 = vor.u32 %v10256_v19, %v9351_v62  ;;  %v14066_v62 = vpop.f32.mrf.mxu2  ;;  %v9942_v33 = vld [vmem:[%s15423_s7 + $0x300] sm:$0xf0]  ;;  %v7763_v28 = vld [vmem:[%s15423_s7 + $0x48] sm:$0xf] }
 0x2e8   :  { %5945 = vmatpush.bf16.msrb.mxu2 %v8796_v16  ;;  %v9435_v16 = vld [vmem:[%s15423_s7 + $0xd60] sm:$0xf]  ;;  %5910 = vmatmul.bf16.vlgmr.msra.gmra.mxu3 %v12692_v63  ;;  %v8908_v3 = vor.u32 %v10141_v45, %v8905_v17  ;;  %v10050_v45 = vld [vmem:[%s15423_s7 + $0x664] sm:$0xf] }
 0x2e9   :  { %v9436_v51 = vor.u32 %v10277_v47, %v9435_v16  ;;  %v8208_v16 = vor.u32 %v9966_v54, %v8205_v31  ;;  %v9879_v47 = vld [vmem:[%s15423_s7 + $0x108] sm:$0xf0]  ;;  %v8541_v17 = vld [vmem:[%s15423_s7 + $0x67c] sm:$0xf0]  ;;  %v14088_v54 = vpop.f32.mrf.mxu3 }
 0x2ea   :  { %5917 = vmatpush.bf16.msrb.mxu0 %v8348_v15  ;;  %5875 = vmatpush.bf16.msra.mxu1 %v9464_v57  ;;  %v9323_v15 = vld [vmem:[%s15423_s7 + $0xc80] sm:$0xf]  ;;  %v10249_v57 = vld [vmem:[%s15423_s7 + $0xc98] sm:$0xf0] }
 0x2eb   :  { %5959 = vmatpush.bf16.msrb.mxu3 %v9020_v38  ;;  %v8877_v38 = vld [vmem:[%s15423_s7 + $0x91c] sm:$0xf0]  ;;  %v9324_v7 = vor.u32 %v10249_v57, %v9323_v15  ;;  %v10211_v15 = vld [vmem:[%s15423_s7 + $0xb6c] sm:$0xf]  ;;  %v9185_v57 = vld [vmem:[%s15423_s7 + $0xb84] sm:$0xf0] }
 0x2ec   :  { %5946 = vmatpush.bf16.msrb.mxu2 %v8768_v12  ;;  %v9407_v12 = vld [vmem:[%s15423_s7 + $0xd28] sm:$0xf]  ;;  %v8880_v23 = vor.u32 %v10134_v26, %v8877_v38  ;;  %v10043_v38 = vld [vmem:[%s15423_s7 + $0x62c] sm:$0xf] }
 0x2ed   :  { %v9408_v39 = vor.u32 %v10270_v53, %v9407_v12  ;;  %v10064_v53 = vld [vmem:[%s15423_s7 + $0x6d4] sm:$0xf] }
 0x2ee   :  { %5918 = vmatpush.bf16.msrb.mxu0 %v8320_v50  ;;  %5876 = vmatpush.bf16.msra.mxu1 %v9436_v51  ;;  %v8177_v50 = vld [vmem:[%s15423_s7 + $0x3a4] sm:$0xf0]  ;;  %v10127_v51 = vld [vmem:[%s15423_s7 + $0x8cc] sm:$0xf]  ;;  %v8600_v4 = vor.u32 %v10064_v53, %v8597_v61  ;;  %v10036_v53 = vld [vmem:[%s15423_s7 + $0x5f4] sm:$0xf] }
 0x2ef   :  { %5960 = vmatpush.bf16.msrb.mxu3 %v8992_v43  ;;  %v10232_v43 = vld [vmem:[%s15423_s7 + $0xc14] sm:$0xf]  ;;  %v8180_v42 = vor.u32 %v9959_v49, %v8177_v50  ;;  %v8852_v2 = vor.u32 %v10127_v51, %v8849_v52  ;;  %v9188_v49 = vor.u32 %v10211_v15, %v9185_v57  ;;  %v8827_v50 = vld [vmem:[%s15423_s7 + $0x898] sm:$0xf]  ;;  %v8485_v61 = vld [vmem:[%s15423_s7 + $0x60c] sm:$0xf0]  ;;  %v5603_v15 = vpop.f32.mrf.mxu1 }
 0x2f0   :  { %5947 = vmatpush.bf16.msrb.mxu2 %v8740_v35  ;;  %v7932_v35 = vor.u32 %v9900_v60, %v7931_v59  ;;  %v9872_v59 = vld [vmem:[%s15423_s7 + $0xd0] sm:$0xf0]  ;;  %v9296_v60 = vor.u32 %v10242_v34, %v9295_v48  ;;  %v7735_v48 = vld [vmem:[%s15423_s7 + $0x10] sm:$0xf]  ;;  %v9851_v34 = vld [vmem:[%s15423_s7 + $0x28] sm:$0xf0] }
 0x2f1   :  { %v10124_v51 = vld [vmem:[%s15423_s7 + $0x8b0] sm:$0xf0] }
 0x2f2   :  { %5919 = vmatpush.bf16.msrb.mxu0 %v8292_v24  ;;  %5877 = vmatpush.bf16.msra.mxu1 %v9408_v39  ;;  %v7819_v24 = vld [vmem:[%s15423_s7 + $0xb8] sm:$0xf]  ;;  %v10204_v52 = vld [vmem:[%s15423_s7 + $0xb34] sm:$0xf]  ;;  %v8828_v56 = vor.u32 %v10124_v51, %v8827_v50 }
 0x2f3   :  { %5961 = vmatpush.bf16.msrb.mxu3 %v8964_v46  ;;  %v10225_v46 = vld [vmem:[%s15423_s7 + $0xbdc] sm:$0xf]  ;;  %v7820_v6 = vor.u32 %v9872_v59, %v7819_v24  ;;  %v14141_v24 = vpop.f32.mrf.mxu2 }
 0x2f4   :  { %5948 = vmatpush.bf16.msrb.mxu2 %v8712_v27  ;;  %v8236_v27 = vor.u32 %v9973_v1, %v8233_v14  ;;  %v10218_v14 = vld [vmem:[%s15423_s7 + $0xba4] sm:$0xf] }
 0x2f6   :  { %5920 = vmatpush.bf16.msrb.mxu0 %v8264_v25  ;;  %5878 = vmatpush.bf16.msra.mxu1 %v9380_v18  ;;  %v9949_v25 = vld [vmem:[%s15423_s7 + $0x338] sm:$0xf0] }
 0x2f7   :  { %5962 = vmatpush.bf16.msrb.mxu3 %v8936_v10  ;;  %v9213_v10 = vld [vmem:[%s15423_s7 + $0xbbc] sm:$0xf0]  ;;  %v8128_v19 = vor.u32 %v9949_v25, %v8127_v9 }
 0x2f8   :  { %5949 = vmatpush.bf16.msrb.mxu2 %v8684_v41  ;;  %v7847_v41 = vld [vmem:[%s15423_s7 + $0xf0] sm:$0xf]  ;;  %v9216_v31 = vor.u32 %v10218_v14, %v9213_v10  ;;  %v8015_v25 = vld [vmem:[%s15423_s7 + $0x240] sm:$0xf] }
 0x2f9   :  { %v7848_v12 = vor.u32 %v9879_v47, %v7847_v41  ;;  %v8513_v41 = vld [vmem:[%s15423_s7 + $0x644] sm:$0xf0]  ;;  %v9935_v47 = vld [vmem:[%s15423_s7 + $0x2c8] sm:$0xf0] }
 0x2fa   :  { %5921 = vmatpush.bf16.msrb.mxu0 %v8236_v27  ;;  %5879 = vmatpush.bf16.msra.mxu1 %v9352_v29  ;;  %v8099_v27 = vld [vmem:[%s15423_s7 + $0x2e8] sm:$0xf]  ;;  %v9858_v29 = vld [vmem:[%s15423_s7 + $0x60] sm:$0xf0] }
 0x2fb   :  { %5963 = vmatpush.bf16.msrb.mxu3 %v8908_v3  ;;  %v8544_v3 = vor.u32 %v10050_v45, %v8541_v17  ;;  %v7764_v26 = vor.u32 %v9858_v29, %v7763_v28  ;;  %v7987_v29 = vld [vmem:[%s15423_s7 + $0x208] sm:$0xf]  ;;  %v14205_v57 = vpop.f32.mrf.mxu2 }
 0x2fc   :  { %5950 = vmatpush.bf16.msrb.mxu2 %v8656_v0  ;;  %v9269_v0 = vld [vmem:[%s15423_s7 + $0xc2c] sm:$0xf0] }
 0x2fd   :  { %v9272_v39 = vor.u32 %v10232_v43, %v9269_v0  ;;  %v9157_v43 = vld [vmem:[%s15423_s7 + $0xb4c] sm:$0xf0] }
 0x2fe   :  { %5922 = vmatpush.bf16.msrb.mxu0 %v8208_v16  ;;  %5880 = vmatpush.bf16.msra.mxu1 %v9324_v7  ;;  %v8071_v16 = vld [vmem:[%s15423_s7 + $0x2b0] sm:$0xf]  ;;  %v14115_v7 = vpop.f32.mrf.mxu0  ;;  %v9160_v59 = vor.u32 %v10204_v52, %v9157_v43  ;;  %v10012_v52 = vld [vmem:[%s15423_s7 + $0x530] sm:$0xf0] }
 0x2ff   :  { %5964 = vmatpush.bf16.msrb.mxu3 %v8880_v23  ;;  %v8516_v23 = vor.u32 %v10043_v38, %v8513_v41  ;;  %v8072_v0 = vor.u32 %v9935_v47, %v8071_v16  ;;  %v10015_v38 = vld [vmem:[%s15423_s7 + $0x54c] sm:$0xf]  ;;  %v8401_v41 = vld [vmem:[%s15423_s7 + $0x564] sm:$0xf0] }
 0x300   :  { %5951 = vmatpush.bf16.msrb.mxu2 %v8628_v5  ;;  %v9241_v5 = vld [vmem:[%s15423_s7 + $0xbf4] sm:$0xf0] }
 0x301   :  { %v9244_v18 = vor.u32 %v10225_v46, %v9241_v5  ;;  %v9129_v46 = vld [vmem:[%s15423_s7 + $0xb14] sm:$0xf0]  ;;  %v14158_v5 = vld [vmem:[%s15425_s8] sm:$0x7f] }
 0x302   :  { %5923 = vmatpush.bf16.msrb.mxu0 %v8180_v42  ;;  %5881 = vmatpush.bf16.msra.mxu1 %v9296_v60  ;;  %v8043_v42 = vld [vmem:[%s15423_s7 + $0x278] sm:$0xf]  ;;  %v8799_v60 = vld [vmem:[%s15423_s7 + $0x860] sm:$0xf]  ;;  %v3234_v14 = vperm.slane %v14158_v5, 0 }
 0x303   :  { %5952 = vmatmul.bf16.vlgmr.msrb.gmra.mxu2 %v12963_v32  ;;  %5965 = vmatpush.bf16.msrb.mxu3 %v8852_v2  ;;  %v8488_v2 = vor.u32 %v10036_v53, %v8485_v61  ;;  %v9051_v53 = vld [vmem:[%s15423_s7 + $0xa58] sm:$0xf] }
 0x304   :  { %6000 = vmatpush.bf16.msra.mxu2 %v7932_v35  ;;  %v10057_v35 = vld [vmem:[%s15423_s7 + $0x69c] sm:$0xf]  ;;  %v5562_v16 = vadd.f32 %v14066_v62, %v3234_v14  ;;  %v9907_v62 = vld [vmem:[%s15423_s7 + $0x1e8] sm:$0xf0] }
 0x305   :  { %v8572_v1 = vor.u32 %v10057_v35, %v8569_v8  ;;  %5882 = vmatmul.bf16.vlgmr.msra.gmra.mxu1 %v13445_v55  ;;  %5924 = vmatmul.bf16.vlgmr.msrb.gmra.mxu0 %v12836_v36  ;;  %v10029_v35 = vld [vmem:[%s15423_s7 + $0x5bc] sm:$0xf]  ;;  %v8457_v8 = vld [vmem:[%s15423_s7 + $0x5d4] sm:$0xf0] }
 0x306   :  { %5972 = vmatpush.bf16.msra.mxu0 %v9272_v39  ;;  %5930 = vmatpush.bf16.msrb.mxu1 %v8600_v4  ;;  %v10117_v39 = vld [vmem:[%s15423_s7 + $0x878] sm:$0xf0]  ;;  %v8460_v10 = vor.u32 %v10029_v35, %v8457_v8  ;;  %v14188_v45 = vpop.f32.mrf.mxu0 }
 0x307   :  { %6014 = vmatpush.bf16.msra.mxu3 %v8156_v58  ;;  %v10197_v4 = vld [vmem:[%s15423_s7 + $0xafc] sm:$0xf]  ;;  %v14160_v58 = vpop.f32.mrf.mxu3  ;;  %v8800_v9 = vor.u32 %v10117_v39, %v8799_v60  ;;  %v8404_v60 = vor.u32 %v10015_v38, %v8401_v41  ;;  %v8659_v41 = vld [vmem:[%s15423_s7 + $0x748] sm:$0xf] }
 0x308   :  { %6001 = vmatpush.bf16.msra.mxu2 %v7904_v21  ;;  %v7792_v21 = vor.u32 %v9865_v13, %v7791_v11  ;;  %5966 = vmatmul.bf16.vlgmr.msrb.gmra.mxu3 %v13133_v44  ;;  %v9921_v11 = vld [vmem:[%s15423_s7 + $0x258] sm:$0xf0]  ;;  %v9132_v13 = vor.u32 %v10197_v4, %v9129_v46 }
 0x309   :  { %v8016_v17 = vor.u32 %v9921_v11, %v8015_v25  ;;  %v10005_v35 = vld [vmem:[%s15423_s7 + $0x4f8] sm:$0xf0]  ;;  %v9465_v11 = vld [vmem:[%s15423_s7 + $0xdb4] sm:$0xf0] }
 0x30a   :  { %5973 = vmatpush.bf16.msra.mxu0 %v9244_v18  ;;  %5931 = vmatpush.bf16.msrb.mxu1 %v8572_v1  ;;  %v8771_v18 = vld [vmem:[%s15423_s7 + $0x828] sm:$0xf]  ;;  %v10110_v1 = vld [vmem:[%s15423_s7 + $0x840] sm:$0xf0]  ;;  %v10281_v25 = vld [vmem:[%s15423_s7 + $0xd9c] sm:$0xf] }
 0x30b   :  { %6015 = vmatpush.bf16.msra.mxu3 %v8128_v19  ;;  %v10190_v19 = vld [vmem:[%s15423_s7 + $0xac4] sm:$0xf]  ;;  %v8772_v28 = vor.u32 %v10110_v1, %v8771_v18  ;;  %v5564_v18 = vadd.f32 %v14141_v24, %v3234_v14  ;;  %v8687_v1 = vld [vmem:[%s15423_s7 + $0x780] sm:$0xf]  ;;  %v9468_v24 = vor.u32 %v10281_v25, %v9465_v11  ;;  %v8323_v14 = vld [vmem:[%s15423_s7 + $0x4a8] sm:$0xf] }
 0x30c   :  { %6002 = vmatpush.bf16.msra.mxu2 %v7876_v37  ;;  %v8100_v37 = vor.u32 %v9942_v33, %v8099_v27  ;;  %v10022_v27 = vld [vmem:[%s15423_s7 + $0x584] sm:$0xf]  ;;  %v8429_v33 = vld [vmem:[%s15423_s7 + $0x59c] sm:$0xf0]  ;;  %v8939_v11 = vld [vmem:[%s15423_s7 + $0x978] sm:$0xf] }
 0x30d   :  { %v8432_v47 = vor.u32 %v10022_v27, %v8429_v33  ;;  %v9998_v27 = vld [vmem:[%s15423_s7 + $0x4c0] sm:$0xf0] }
 0x30e   :  { %5974 = vmatpush.bf16.msra.mxu0 %v9216_v31  ;;  %5932 = vmatpush.bf16.msrb.mxu1 %v8544_v3  ;;  %v9914_v31 = vld [vmem:[%s15423_s7 + $0x220] sm:$0xf0]  ;;  %v8743_v3 = vld [vmem:[%s15423_s7 + $0x7f0] sm:$0xf] }
 0x30f   :  { %6016 = vmatpush.bf16.msra.mxu3 %v8100_v37  ;;  %v14226_v50 = vpop.f32.mrf.mxu3  ;;  %v7988_v51 = vor.u32 %v9914_v31, %v7987_v29  ;;  %v10274_v31 = vld [vmem:[%s15423_s7 + $0xd64] sm:$0xf] }
 0x310   :  { %6003 = vmatpush.bf16.msra.mxu2 %v7848_v12  ;;  %v7736_v12 = vor.u32 %v9851_v34, %v7735_v48  ;;  %v10183_v48 = vld [vmem:[%s15423_s7 + $0xa8c] sm:$0xf]  ;;  %v9073_v34 = vld [vmem:[%s15423_s7 + $0xaa4] sm:$0xf0] }
 0x311   :  { %v9076_v61 = vor.u32 %v10183_v48, %v9073_v34 }
 0x312   :  { %5975 = vmatpush.bf16.msra.mxu0 %v9188_v49  ;;  %5933 = vmatpush.bf16.msrb.mxu1 %v8516_v23  ;;  %v7959_v49 = vld [vmem:[%s15423_s7 + $0x1d0] sm:$0xf]  ;;  %v8379_v23 = vld [vmem:[%s15423_s7 + $0x518] sm:$0xf] }
 0x313   :  { %6017 = vmatpush.bf16.msra.mxu3 %v8072_v0  ;;  %v10288_v0 = vld [vmem:[%s15423_s7 + $0xdd4] sm:$0xf]  ;;  %v8380_v39 = vor.u32 %v10012_v52, %v8379_v23  ;;  %v7960_v4 = vor.u32 %v9907_v62, %v7959_v49  ;;  %v8295_v49 = vld [vmem:[%s15423_s7 + $0x470] sm:$0xf]  ;;  %v9409_v52 = vld [vmem:[%s15423_s7 + $0xd44] sm:$0xf0] }
 0x314   :  { %6004 = vmatpush.bf16.msra.mxu2 %v7820_v6  ;;  %v8044_v6 = vor.u32 %v9928_v22, %v8043_v42  ;;  %v8715_v42 = vld [vmem:[%s15423_s7 + $0x7b8] sm:$0xf]  ;;  %v10096_v22 = vld [vmem:[%s15423_s7 + $0x7d0] sm:$0xf0] }
 0x316   :  { %5976 = vmatpush.bf16.msra.mxu0 %v9160_v59  ;;  %5934 = vmatpush.bf16.msrb.mxu1 %v8488_v2  ;;  %v5576_v59 = vadd.f32 %v14088_v54, %v5562_v16  ;;  %v14256_v2 = vpop.f32.mrf.mxu0  ;;  %v10082_v16 = vld [vmem:[%s15423_s7 + $0x760] sm:$0xf0] }
 0x317   :  { %6018 = vmatpush.bf16.msra.mxu3 %v8044_v6  ;;  %v8351_v6 = vld [vmem:[%s15423_s7 + $0x4e0] sm:$0xf]  ;;  %v5633_v38 = vpop.f32.mrf.mxu3  ;;  %v8660_v23 = vor.u32 %v10082_v16, %v8659_v41 }
 0x318   :  { %6005 = vmatpush.bf16.msra.mxu2 %v7792_v21  ;;  %v9101_v21 = vld [vmem:[%s15423_s7 + $0xadc] sm:$0xf0]  ;;  %v5590_v8 = vadd.f32 %v14115_v7, %v5576_v59  ;;  %v10173_v7 = vld [vmem:[%s15423_s7 + $0xa38] sm:$0xf0] }
 0x319   :  { %v9104_v37 = vor.u32 %v10190_v19, %v9101_v21  ;;  %v8352_v19 = vor.u32 %v10005_v35, %v8351_v6  ;;  %v5605_v21 = vpop.f32.mrf.mxu1 }
 0x31a   :  { %5977 = vmatpush.bf16.msra.mxu0 %v9132_v13  ;;  %5935 = vmatpush.bf16.msrb.mxu1 %v8460_v10  ;;  %v9023_v13 = vld [vmem:[%s15423_s7 + $0xa20] sm:$0xf]  ;;  %v10089_v10 = vld [vmem:[%s15423_s7 + $0x798] sm:$0xf0]  ;;  %v5604_v33 = vadd.f32 %v5603_v15, %v5590_v8  ;;  %v10166_v15 = vld [vmem:[%s15423_s7 + $0xa00] sm:$0xf0] }
 0x31b   :  { %6019 = vmatpush.bf16.msra.mxu3 %v8016_v17  ;;  %v14284_v17 = vpop.f32.mrf.mxu2  ;;  %v8688_v29 = vor.u32 %v10089_v10, %v8687_v1  ;;  %v10260_v8 = vld [vmem:[%s15423_s7 + $0xcf4] sm:$0xf]  ;;  %v9890_v1 = vld [vmem:[%s15423_s7 + $0x164] sm:$0xf]  ;;  %v7905_v10 = vld [vmem:[%s15423_s7 + $0x17c] sm:$0xf0] }
 0x31c   :  { %6006 = vmatpush.bf16.msra.mxu2 %v7764_v26  ;;  %v10103_v26 = vld [vmem:[%s15423_s7 + $0x808] sm:$0xf0] }
 0x31d   :  { %v8744_v43 = vor.u32 %v10103_v26, %v8743_v3  ;;  %v9437_v3 = vld [vmem:[%s15423_s7 + $0xd7c] sm:$0xf0]  ;;  %v5578_v26 = vadd.f32 %v14160_v58, %v5564_v18  ;;  %v8324_v58 = vor.u32 %v9998_v27, %v8323_v14 }
 0x31e   :  { %5978 = vmatpush.bf16.msra.mxu0 %v9104_v37  ;;  %5936 = vmatpush.bf16.msrb.mxu1 %v8432_v47  ;;  %v8995_v37 = vld [vmem:[%s15423_s7 + $0x9e8] sm:$0xf]  ;;  %v5618_v47 = vadd.f32 %v14205_v57, %v5604_v33  ;;  %v9440_v34 = vor.u32 %v10274_v31, %v9437_v3  ;;  %v10253_v33 = vld [vmem:[%s15423_s7 + $0xcbc] sm:$0xf]  ;;  %v8911_v31 = vld [vmem:[%s15423_s7 + $0x940] sm:$0xf] }
 0x31f   :  { %6020 = vmatpush.bf16.msra.mxu3 %v7988_v51  ;;  %v5592_v48 = vadd.f32 %v14188_v45, %v5578_v26  ;;  %v9991_v51 = vld [vmem:[%s15423_s7 + $0x488] sm:$0xf0]  ;;  %v8996_v57 = vor.u32 %v10166_v15, %v8995_v37  ;;  %v10145_v3 = vld [vmem:[%s15423_s7 + $0x958] sm:$0xf0]  ;;  %v7877_v15 = vld [vmem:[%s15423_s7 + $0x144] sm:$0xf0] }
 0x320   :  { %6007 = vmatpush.bf16.msra.mxu2 %v7736_v12  ;;  %v9493_v12 = vld [vmem:[%s15423_s7 + $0xdec] sm:$0xf0]  ;;  %v5632_v62 = vadd.f32 %v14226_v50, %v5618_v47  ;;  %v10267_v45 = vld [vmem:[%s15423_s7 + $0xd2c] sm:$0xf] }
 0x321   :  { %v9496_v46 = vor.u32 %v10288_v0, %v9493_v12  ;;  %v5647_v0 = vpop.f32.mrf.mxu0  ;;  %v10159_v50 = vld [vmem:[%s15423_s7 + $0x9c8] sm:$0xf0]  ;;  %v8631_v12 = vld [vmem:[%s15423_s7 + $0x710] sm:$0xf]  ;;  %v5606_v59 = vadd.f32 %v5605_v21, %v5592_v48  ;;  %v9970_v48 = vld [vmem:[%s15423_s7 + $0x3e0] sm:$0xf0] }
 0x322   :  { %5979 = vmatpush.bf16.msra.mxu0 %v9076_v61  ;;  %5937 = vmatpush.bf16.msrb.mxu1 %v8404_v60  ;;  %v5646_v61 = vadd.f32 %v14256_v2, %v5632_v62  ;;  %v5659_v60 = vpop.f32.mrf.mxu1  ;;  %v9984_v2 = vld [vmem:[%s15423_s7 + $0x450] sm:$0xf0]  ;;  %v8912_v62 = vor.u32 %v10145_v3, %v8911_v31 }
 0x323   :  { %6008 = vmatmul.bf16.vlgmr.msra.gmra.mxu2 %v12736_v30  ;;  %6021 = vmatpush.bf16.msra.mxu3 %v7960_v4  ;;  %v8267_v4 = vld [vmem:[%s15423_s7 + $0x438] sm:$0xf]  ;;  %v5620_v18 = vadd.f32 %v14284_v17, %v5606_v59  ;;  %v9977_v17 = vld [vmem:[%s15423_s7 + $0x418] sm:$0xf0]  ;;  %v9963_v59 = vld [vmem:[%s15423_s7 + $0x3a8] sm:$0xf0] }
 0x324   :  { %6056 = vmatpush.bf16.msrb.mxu2 %v8828_v56  ;;  %v10180_v56 = vld [vmem:[%s15423_s7 + $0xa70] sm:$0xf0] }
 0x325   :  { %v9052_v54 = vor.u32 %v10180_v56, %v9051_v53  ;;  %5938 = vmatmul.bf16.vlgmr.msrb.gmra.mxu1 %v12815_v40  ;;  %5980 = vmatmul.bf16.vlgmr.msra.gmra.mxu0 %v13297_v20  ;;  %v10075_v53 = vld [vmem:[%s15423_s7 + $0x728] sm:$0xf0]  ;;  %v8296_v56 = vor.u32 %v9991_v51, %v8295_v49  ;;  %v5634_v14 = vadd.f32 %v5633_v38, %v5620_v18  ;;  %v3235_v49 = vperm.slane %v14158_v5, 1  ;;  %v8157_v18 = vld [vmem:[%s15423_s7 + $0x374] sm:$0xf0] }
 0x326   :  { %6028 = vmatpush.bf16.msrb.mxu0 %v8380_v39  ;;  %5986 = vmatpush.bf16.msra.mxu1 %v9496_v46  ;;  %v9412_v39 = vor.u32 %v10267_v45, %v9409_v52  ;;  %v5660_v46 = vadd.f32 %v5659_v60, %v5646_v61  ;;  %v8632_v35 = vor.u32 %v10075_v53, %v8631_v12  ;;  %v9883_v38 = vld [vmem:[%s15423_s7 + $0x12c] sm:$0xf]  ;;  %v8883_v52 = vld [vmem:[%s15423_s7 + $0x908] sm:$0xf]  ;;  %v7849_v12 = vld [vmem:[%s15423_s7 + $0x10c] sm:$0xf0] }
 0x327   :  { %6070 = vmatpush.bf16.msrb.mxu3 %v9052_v54  ;;  %v9381_v54 = vld [vmem:[%s15423_s7 + $0xd0c] sm:$0xf0]  ;;  %v5648_v37 = vadd.f32 %v5647_v0, %v5634_v14  ;;  %v7880_v45 = vor.u32 %v9883_v38, %v7877_v15  ;;  %v9876_v0 = vld [vmem:[%s15423_s7 + $0xf4] sm:$0xf]  ;;  %v10239_v53 = vld [vmem:[%s15423_s7 + $0xc4c] sm:$0xf] }
 0x328   :  { %6057 = vmatpush.bf16.msrb.mxu2 %v8800_v9  ;;  %v8716_v9 = vor.u32 %v10096_v22, %v8715_v42  ;;  %6022 = vmatmul.bf16.vlgmr.msra.gmra.mxu3 %v12692_v63  ;;  %v9897_v42 = vld [vmem:[%s15423_s7 + $0x19c] sm:$0xf]  ;;  %v7933_v22 = vld [vmem:[%s15423_s7 + $0x1b4] sm:$0xf0]  ;;  %10294 = vtanh.f32 %v5660_v46  ;;  %v9384_v21 = vor.u32 %v10260_v8, %v9381_v54  ;;  %v9297_v61 = vld [vmem:[%s15423_s7 + $0xc64] sm:$0xf0]  ;;  %v7852_v8 = vor.u32 %v9876_v0, %v7849_v12 }
 0x329   :  { %v7936_v25 = vor.u32 %v9897_v42, %v7933_v22  ;;  %v5701_v41 = vpop.f32.mrf.mxu0  ;;  %v8183_v22 = vld [vmem:[%s15423_s7 + $0x390] sm:$0xf]  ;;  %v9275_v46 = vld [vmem:[%s15423_s7 + $0xc18] sm:$0xf]  ;;  %v9946_v38 = vld [vmem:[%s15423_s7 + $0x324] sm:$0xf] }
 0x32a   :  { %6029 = vmatpush.bf16.msrb.mxu0 %v8352_v19  ;;  %5987 = vmatpush.bf16.msra.mxu1 %v9468_v24  ;;  %v14375_v19 = vpop.f32.mrf.mxu3  ;;  %v8239_v24 = vld [vmem:[%s15423_s7 + $0x400] sm:$0xf]  ;;  %v5661_v16 = vpop.f32.mrf.mxu1  ;;  %v8855_v60 = vld [vmem:[%s15423_s7 + $0x8d0] sm:$0xf]  ;;  %v8603_v54 = vld [vmem:[%s15423_s7 + $0x6d8] sm:$0xf] }
 0x32b   :  { %v8240_v26 = vor.u32 %v9977_v17, %v8239_v24  ;;  %v5662_v51 = vadd.f32 %v5661_v16, %v5648_v37  ;;  %v9862_v16 = vld [vmem:[%s15423_s7 + $0x84] sm:$0xf]  ;;  %v8101_v12 = vld [vmem:[%s15423_s7 + $0x304] sm:$0xf0] }
 0x32c   :  { %6058 = vmatpush.bf16.msrb.mxu2 %v8772_v28  ;;  %v9024_v28 = vor.u32 %v10173_v7, %v9023_v13  ;;  %v10152_v13 = vld [vmem:[%s15423_s7 + $0x990] sm:$0xf0]  ;;  %v8268_v7 = vor.u32 %v9984_v2, %v8267_v4  ;;  %v10131_v2 = vld [vmem:[%s15423_s7 + $0x8e8] sm:$0xf0] }
 0x32d   :  { %v8940_v27 = vor.u32 %v10152_v13, %v8939_v11  ;;  %10296 = vtanh.f32 %v5662_v51  ;;  %v8184_v13 = vor.u32 %v9963_v59, %v8183_v22  ;;  %v8856_v14 = vor.u32 %v10131_v2, %v8855_v60 }
 0x32e   :  { %6071 = vmatpush.bf16.msrb.mxu3 %v9024_v28  ;;  %6030 = vmatpush.bf16.msrb.mxu0 %v8324_v58  ;;  %v9353_v28 = vld [vmem:[%s15423_s7 + $0xcd4] sm:$0xf0]  ;;  %v8211_v58 = vld [vmem:[%s15423_s7 + $0x3c8] sm:$0xf] }
 0x32f   :  { %5988 = vmatpush.bf16.msra.mxu1 %v9440_v34  ;;  %v9356_v47 = vor.u32 %v10253_v33, %v9353_v28  ;;  %v10295_v34 = vpop.eup %10294  ;;  %v8575_v33 = vld [vmem:[%s15423_s7 + $0x6a0] sm:$0xf] }
 0x330   :  { %6059 = vmatpush.bf16.msrb.mxu2 %v8744_v43  ;;  %v8967_v43 = vld [vmem:[%s15423_s7 + $0x9b0] sm:$0xf]  ;;  %6350 = vst [vmem:[%s15426_s9] sm:$0xff] %v10295_v34  ;;  %v9247_v28 = vld [vmem:[%s15423_s7 + $0xbe0] sm:$0xf] }
 0x331   :  { %v8968_v6 = vor.u32 %v10159_v50, %v8967_v43  ;;  %v10138_v43 = vld [vmem:[%s15423_s7 + $0x920] sm:$0xf0]  ;;  %v8212_v50 = vor.u32 %v9970_v48, %v8211_v58  ;;  %v5703_v31 = vpop.f32.mrf.mxu0 }
 0x332   :  { %6072 = vmatpush.bf16.msrb.mxu3 %v8996_v57  ;;  %6031 = vmatpush.bf16.msrb.mxu0 %v8296_v56  ;;  %v10246_v57 = vld [vmem:[%s15423_s7 + $0xc84] sm:$0xf]  ;;  %v8884_v4 = vor.u32 %v10138_v43, %v8883_v52  ;;  %v8547_v52 = vld [vmem:[%s15423_s7 + $0x668] sm:$0xf]  ;;  %v9939_v43 = vld [vmem:[%s15423_s7 + $0x2ec] sm:$0xf] }
 0x333   :  { %5989 = vmatpush.bf16.msra.mxu1 %v9412_v39  ;;  %v10297_v17 = vpop.eup %10296  ;;  %v8104_v2 = vor.u32 %v9939_v43, %v8101_v12  ;;  %v8017_v43 = vld [vmem:[%s15423_s7 + $0x25c] sm:$0xf0]  ;;  %v8773_v12 = vld [vmem:[%s15423_s7 + $0x844] sm:$0xf0] }
 0x334   :  { %6060 = vmatpush.bf16.msrb.mxu2 %v8716_v9  ;;  %v14360_v9 = vpop.f32.mrf.mxu2  ;;  %6358 = vst [vmem:[%s15426_s9 + $0x38] sm:$0xff] %v10297_v17  ;;  %v10208_v17 = vld [vmem:[%s15423_s7 + $0xb50] sm:$0xf0] }
 0x335   :  { %v5674_v39 = vadd.f32 %v14360_v9, %v3235_v49  ;;  %v10068_v9 = vld [vmem:[%s15423_s7 + $0x6f0] sm:$0xf0] }
 0x336   :  { %6073 = vmatpush.bf16.msrb.mxu3 %v8968_v6  ;;  %6032 = vmatpush.bf16.msrb.mxu0 %v8268_v7  ;;  %v10236_v6 = vld [vmem:[%s15423_s7 + $0xc30] sm:$0xf0]  ;;  %v9869_v7 = vld [vmem:[%s15423_s7 + $0xbc] sm:$0xf] }
 0x337   :  { %5990 = vmatpush.bf16.msra.mxu1 %v9384_v21  ;;  %v5688_v11 = vadd.f32 %v14375_v19, %v5674_v39  ;;  %v9300_v21 = vor.u32 %v10239_v53, %v9297_v61  ;;  %v9276_v24 = vor.u32 %v10236_v6, %v9275_v46  ;;  %v9855_v53 = vld [vmem:[%s15423_s7 + $0x4c] sm:$0xf]  ;;  %v7765_v61 = vld [vmem:[%s15423_s7 + $0x64] sm:$0xf0]  ;;  %v9191_v39 = vld [vmem:[%s15423_s7 + $0xb70] sm:$0xf] }
 0x338   :  { %6061 = vmatpush.bf16.msrb.mxu2 %v8688_v29  ;;  %v7908_v29 = vor.u32 %v9890_v1, %v7905_v10  ;;  %v7821_v1 = vld [vmem:[%s15423_s7 + $0xd4] sm:$0xf0]  ;;  %v5715_v10 = vpop.f32.mrf.mxu1  ;;  %v7768_v46 = vor.u32 %v9855_v53, %v7765_v61  ;;  %v8519_v6 = vld [vmem:[%s15423_s7 + $0x630] sm:$0xf]  ;;  %v9107_v61 = vld [vmem:[%s15423_s7 + $0xac8] sm:$0xf] }
 0x339   :  { %v5702_v19 = vadd.f32 %v5701_v41, %v5688_v11  ;;  %v7824_v37 = vor.u32 %v9869_v7, %v7821_v1  ;;  %v8129_v41 = vld [vmem:[%s15423_s7 + $0x33c] sm:$0xf0]  ;;  %v9848_v11 = vld [vmem:[%s15423_s7 + $0x14] sm:$0xf]  ;;  %v10121_v1 = vld [vmem:[%s15423_s7 + $0x89c] sm:$0xf] }
 0x33a   :  { %6074 = vmatpush.bf16.msrb.mxu3 %v8940_v27  ;;  %6033 = vmatpush.bf16.msrb.mxu0 %v8240_v26  ;;  %v8604_v27 = vor.u32 %v10068_v9, %v8603_v54  ;;  %v10061_v26 = vld [vmem:[%s15423_s7 + $0x6b8] sm:$0xf0] }
 0x33b   :  { %5991 = vmatpush.bf16.msra.mxu1 %v9356_v47  ;;  %v5716_v15 = vadd.f32 %v5715_v10, %v5702_v19  ;;  %v7793_v47 = vld [vmem:[%s15423_s7 + $0x9c] sm:$0xf0]  ;;  %v8576_v51 = vor.u32 %v10061_v26, %v8575_v33  ;;  %v8829_v10 = vld [vmem:[%s15423_s7 + $0x8b4] sm:$0xf0] }
 0x33c   :  { %6062 = vmatpush.bf16.msrb.mxu2 %v8660_v23  ;;  %v9325_v23 = vld [vmem:[%s15423_s7 + $0xc9c] sm:$0xf0]  ;;  %v5675_v56 = vpop.f32.mrf.mxu2  ;;  %v8491_v33 = vld [vmem:[%s15423_s7 + $0x5f8] sm:$0xf] }
 0x33d   :  { %v9328_v42 = vor.u32 %v10246_v57, %v9325_v23  ;;  %v5676_v34 = vadd.f32 %v5675_v56, %v3235_v49  ;;  %v10222_v57 = vld [vmem:[%s15423_s7 + $0xbc0] sm:$0xf0]  ;;  %v8132_v23 = vor.u32 %v9946_v38, %v8129_v41  ;;  %v8045_v26 = vld [vmem:[%s15423_s7 + $0x294] sm:$0xf0] }
 0x33e   :  { %6075 = vmatpush.bf16.msrb.mxu3 %v8912_v62  ;;  %6034 = vmatpush.bf16.msrb.mxu0 %v8212_v50  ;;  %v9219_v62 = vld [vmem:[%s15423_s7 + $0xba8] sm:$0xf]  ;;  %v10054_v49 = vld [vmem:[%s15423_s7 + $0x680] sm:$0xf0] }
 0x33f   :  { %5992 = vmatpush.bf16.msra.mxu1 %v9328_v42  ;;  %v9220_v22 = vor.u32 %v10222_v57, %v9219_v62  ;;  %v8548_v60 = vor.u32 %v10054_v49, %v8547_v52  ;;  %v10114_v41 = vld [vmem:[%s15423_s7 + $0x864] sm:$0xf]  ;;  %v8463_v57 = vld [vmem:[%s15423_s7 + $0x5c0] sm:$0xf] }
 0x340   :  { %6063 = vmatpush.bf16.msrb.mxu2 %v8632_v35  ;;  %v5689_v35 = vpop.f32.mrf.mxu3  ;;  %v5717_v42 = vpop.f32.mrf.mxu1  ;;  %v9918_v49 = vld [vmem:[%s15423_s7 + $0x244] sm:$0xf] }
 0x341   :  { %v5690_v0 = vadd.f32 %v5689_v35, %v5676_v34  ;;  %v10047_v35 = vld [vmem:[%s15423_s7 + $0x648] sm:$0xf0]  ;;  %v10201_v34 = vld [vmem:[%s15423_s7 + $0xb18] sm:$0xf0] }
 0x342   :  { %6076 = vmatpush.bf16.msrb.mxu3 %v8884_v4  ;;  %6035 = vmatpush.bf16.msrb.mxu0 %v8184_v13  ;;  %v10215_v4 = vld [vmem:[%s15423_s7 + $0xb88] sm:$0xf0]  ;;  %v7737_v13 = vld [vmem:[%s15423_s7 + $0x2c] sm:$0xf0] }
 0x343   :  { %6064 = vmatmul.bf16.vlgmr.msrb.gmra.mxu2 %v12963_v32  ;;  %5993 = vmatpush.bf16.msra.mxu1 %v9300_v21  ;;  %v5704_v59 = vadd.f32 %v5703_v31, %v5690_v0  ;;  %v9192_v7 = vor.u32 %v10215_v4, %v9191_v39  ;;  %v8520_v21 = vor.u32 %v10047_v35, %v8519_v6  ;;  %v9911_v39 = vld [vmem:[%s15423_s7 + $0x20c] sm:$0xf]  ;;  %v10100_v6 = vld [vmem:[%s15423_s7 + $0x7f4] sm:$0xf]  ;;  %v8745_v35 = vld [vmem:[%s15423_s7 + $0x80c] sm:$0xf0] }
 0x344   :  { %6112 = vmatpush.bf16.msra.mxu2 %v7936_v25  ;;  %v9953_v25 = vld [vmem:[%s15423_s7 + $0x35c] sm:$0xf]  ;;  %v5729_v58 = vpop.f32.mrf.mxu2 }
 0x345   :  { %v8160_v3 = vor.u32 %v9953_v25, %v8157_v18  ;;  %v5730_v50 = vadd.f32 %v5729_v58, %v5716_v15  ;;  %6036 = vmatmul.bf16.vlgmr.msrb.gmra.mxu0 %v12836_v36  ;;  %v5718_v54 = vadd.f32 %v5717_v42, %v5704_v59  ;;  %v8073_v25 = vld [vmem:[%s15423_s7 + $0x2cc] sm:$0xf0]  ;;  %v5757_v18 = vpop.f32.mrf.mxu0  ;;  %v8435_v59 = vld [vmem:[%s15423_s7 + $0x588] sm:$0xf] }
 0x346   :  { %6084 = vmatpush.bf16.msra.mxu0 %v9276_v24  ;;  %6077 = vmatpush.bf16.msrb.mxu3 %v8856_v14  ;;  %v9163_v24 = vld [vmem:[%s15423_s7 + $0xb38] sm:$0xf] }
 0x347   :  { %6042 = vmatpush.bf16.msrb.mxu1 %v8604_v27  ;;  %v7740_v27 = vor.u32 %v9848_v11, %v7737_v13  ;;  %v9164_v15 = vor.u32 %v10208_v17, %v9163_v24  ;;  %v9079_v11 = vld [vmem:[%s15423_s7 + $0xa90] sm:$0xf]  ;;  %v10009_v17 = vld [vmem:[%s15423_s7 + $0x51c] sm:$0xf] }
 0x348   :  { %6113 = vmatpush.bf16.msra.mxu2 %v7908_v29  ;;  %v10229_v29 = vld [vmem:[%s15423_s7 + $0xbf8] sm:$0xf0]  ;;  %5994 = vmatmul.bf16.vlgmr.msra.gmra.mxu1 %v13445_v55  ;;  %v5743_v56 = vpop.f32.mrf.mxu3  ;;  %v5771_v38 = vpop.f32.mrf.mxu1 }
 0x349   :  { %v9248_v48 = vor.u32 %v10229_v29, %v9247_v28  ;;  %6078 = vmatmul.bf16.vlgmr.msrb.gmra.mxu3 %v13133_v44  ;;  %v5744_v9 = vadd.f32 %v5743_v56, %v5730_v50  ;;  %v10040_v28 = vld [vmem:[%s15423_s7 + $0x610] sm:$0xf0]  ;;  %v10107_v50 = vld [vmem:[%s15423_s7 + $0x82c] sm:$0xf]  ;;  %v10194_v56 = vld [vmem:[%s15423_s7 + $0xae0] sm:$0xf0] }
 0x34a   :  { %6126 = vmatpush.bf16.msra.mxu3 %v8160_v3  ;;  %v8832_v3 = vor.u32 %v10121_v1, %v8829_v10  ;;  %v8492_v58 = vor.u32 %v10040_v28, %v8491_v33  ;;  %v10187_v1 = vld [vmem:[%s15423_s7 + $0xaa8] sm:$0xf0]  ;;  %v9904_v10 = vld [vmem:[%s15423_s7 + $0x1d4] sm:$0xf]  ;;  %v10177_v28 = vld [vmem:[%s15423_s7 + $0xa5c] sm:$0xf] }
 0x34b   :  { %6085 = vmatpush.bf16.msra.mxu0 %v9248_v48  ;;  %6043 = vmatpush.bf16.msrb.mxu1 %v8576_v51  ;;  %v5758_v31 = vadd.f32 %v5757_v18, %v5744_v9  ;;  %v9135_v48 = vld [vmem:[%s15423_s7 + $0xb00] sm:$0xf]  ;;  %v8407_v9 = vld [vmem:[%s15423_s7 + $0x550] sm:$0xf]  ;;  %v10292_v33 = vld [vmem:[%s15423_s7 + $0xdf0] sm:$0xf0] }
 0x34c   :  { %6114 = vmatpush.bf16.msra.mxu2 %v7880_v45  ;;  %v7796_v45 = vor.u32 %v9862_v16, %v7793_v47  ;;  %v5731_v19 = vpop.f32.mrf.mxu2  ;;  %v8801_v16 = vld [vmem:[%s15423_s7 + $0x87c] sm:$0xf0]  ;;  %v9136_v0 = vor.u32 %v10201_v34, %v9135_v48 }
 0x34d   :  { %v5732_v29 = vadd.f32 %v5731_v19, %v5718_v54  ;;  %v5772_v47 = vadd.f32 %v5771_v38, %v5758_v31  ;;  %v5759_v42 = vpop.f32.mrf.mxu0  ;;  %v9108_v54 = vor.u32 %v10194_v56, %v9107_v61  ;;  %v8381_v19 = vld [vmem:[%s15423_s7 + $0x534] sm:$0xf0]  ;;  %v9471_v34 = vld [vmem:[%s15423_s7 + $0xda0] sm:$0xf]  ;;  %v9443_v61 = vld [vmem:[%s15423_s7 + $0xd68] sm:$0xf] }
 0x34e   :  { %6127 = vmatpush.bf16.msra.mxu3 %v8132_v23  ;;  %v10033_v23 = vld [vmem:[%s15423_s7 + $0x5d8] sm:$0xf0]  ;;  %v9053_v31 = vld [vmem:[%s15423_s7 + $0xa74] sm:$0xf0]  ;;  %v8384_v38 = vor.u32 %v10009_v17, %v8381_v19  ;;  %v10278_v56 = vld [vmem:[%s15423_s7 + $0xd80] sm:$0xf0] }
 0x34f   :  { %6086 = vmatpush.bf16.msra.mxu0 %v9220_v22  ;;  %6044 = vmatpush.bf16.msrb.mxu1 %v8548_v60  ;;  %10298 = vtanh.f32 %v5772_v47  ;;  %v8464_v53 = vor.u32 %v10033_v23, %v8463_v57  ;;  %v8020_v22 = vor.u32 %v9918_v49, %v8017_v43  ;;  %v10026_v60 = vld [vmem:[%s15423_s7 + $0x5a0] sm:$0xf0]  ;;  %v8353_v47 = vld [vmem:[%s15423_s7 + $0x4fc] sm:$0xf0] }
 0x350   :  { %6115 = vmatpush.bf16.msra.mxu2 %v7852_v8  ;;  %v9932_v8 = vld [vmem:[%s15423_s7 + $0x2b4] sm:$0xf]  ;;  %v5745_v51 = vpop.f32.mrf.mxu3  ;;  %v9025_v57 = vld [vmem:[%s15423_s7 + $0xa3c] sm:$0xf0]  ;;  %v10086_v23 = vld [vmem:[%s15423_s7 + $0x784] sm:$0xf] }
 0x351   :  { %v8076_v14 = vor.u32 %v9932_v8, %v8073_v25  ;;  %v5746_v52 = vadd.f32 %v5745_v51, %v5732_v29  ;;  %v5773_v8 = vpop.f32.mrf.mxu1  ;;  %v10019_v25 = vld [vmem:[%s15423_s7 + $0x568] sm:$0xf0]  ;;  %v9080_v29 = vor.u32 %v10187_v1, %v9079_v11  ;;  %v10285_v51 = vld [vmem:[%s15423_s7 + $0xdb8] sm:$0xf0]  ;;  %v10072_v11 = vld [vmem:[%s15423_s7 + $0x714] sm:$0xf] }
 0x352   :  { %6128 = vmatpush.bf16.msra.mxu3 %v8104_v2  ;;  %v8776_v2 = vor.u32 %v10107_v50, %v8773_v12  ;;  %v9472_v43 = vor.u32 %v10285_v51, %v9471_v34  ;;  %v8325_v50 = vld [vmem:[%s15423_s7 + $0x4c4] sm:$0xf0]  ;;  %v9901_v1 = vld [vmem:[%s15423_s7 + $0x1b8] sm:$0xf0]  ;;  %v10142_v51 = vld [vmem:[%s15423_s7 + $0x944] sm:$0xf] }
 0x353   :  { %6087 = vmatpush.bf16.msra.mxu0 %v9192_v7  ;;  %6045 = vmatpush.bf16.msrb.mxu1 %v8520_v21  ;;  %v5760_v4 = vadd.f32 %v5759_v42, %v5746_v52  ;;  %v8436_v7 = vor.u32 %v10026_v60, %v8435_v59  ;;  %v7961_v21 = vld [vmem:[%s15423_s7 + $0x1ec] sm:$0xf0]  ;;  %v10163_v42 = vld [vmem:[%s15423_s7 + $0x9ec] sm:$0xf]  ;;  %v8661_v60 = vld [vmem:[%s15423_s7 + $0x764] sm:$0xf0] }
 0x354   :  { %6116 = vmatpush.bf16.msra.mxu2 %v7824_v37  ;;  %v9925_v37 = vld [vmem:[%s15423_s7 + $0x27c] sm:$0xf]  ;;  %v10079_v59 = vld [vmem:[%s15423_s7 + $0x74c] sm:$0xf] }
 0x355   :  { %v8048_v62 = vor.u32 %v9925_v37, %v8045_v26  ;;  %v10299_v13 = vpop.eup %10298  ;;  %v5774_v18 = vadd.f32 %v5773_v8, %v5760_v4  ;;  %v8717_v37 = vld [vmem:[%s15423_s7 + $0x7d4] sm:$0xf0]  ;;  %v8408_v26 = vor.u32 %v10019_v25, %v8407_v9  ;;  %v9444_v4 = vor.u32 %v10278_v56, %v9443_v61  ;;  %v9415_v8 = vld [vmem:[%s15423_s7 + $0xd30] sm:$0xf]  ;;  %v10156_v9 = vld [vmem:[%s15423_s7 + $0x9b4] sm:$0xf]  ;;  %v5813_v61 = vpop.f32.mrf.mxu0 }
 0x356   :  { %6129 = vmatpush.bf16.msra.mxu3 %v8076_v14  ;;  %6351 = vst [vmem:[%s15426_s9 + $0x8] sm:$0xff] %v10299_v13  ;;  %v8748_v14 = vor.u32 %v10100_v6, %v8745_v35  ;;  %v8664_v35 = vor.u32 %v10079_v59, %v8661_v60  ;;  %v8969_v25 = vld [vmem:[%s15423_s7 + $0x9cc] sm:$0xf0]  ;;  %v7855_v59 = vld [vmem:[%s15423_s7 + $0xf8] sm:$0xf] }
 0x357   :  { %6088 = vmatpush.bf16.msra.mxu0 %v9164_v15  ;;  %6046 = vmatpush.bf16.msrb.mxu1 %v8492_v58  ;;  %10300 = vtanh.f32 %v5774_v18  ;;  %v7964_v15 = vor.u32 %v9904_v10, %v7961_v21  ;;  %v9056_v58 = vor.u32 %v10177_v28, %v9053_v31  ;;  %v8633_v13 = vld [vmem:[%s15423_s7 + $0x72c] sm:$0xf0]  ;;  %v9981_v21 = vld [vmem:[%s15423_s7 + $0x43c] sm:$0xf]  ;;  %v8972_v17 = vor.u32 %v10156_v9, %v8969_v25  ;;  %v8941_v31 = vld [vmem:[%s15423_s7 + $0x994] sm:$0xf0] }
 0x358   :  { %6117 = vmatpush.bf16.msra.mxu2 %v7796_v45  ;;  %v8804_v45 = vor.u32 %v10114_v41, %v8801_v16  ;;  %v10002_v16 = vld [vmem:[%s15423_s7 + $0x4e4] sm:$0xf]  ;;  %v8636_v19 = vor.u32 %v10072_v11, %v8633_v13  ;;  %v8857_v11 = vld [vmem:[%s15423_s7 + $0x8ec] sm:$0xf0]  ;;  %v10233_v13 = vld [vmem:[%s15423_s7 + $0xc1c] sm:$0xf] }
 0x359   :  { %v8356_v49 = vor.u32 %v10002_v16, %v8353_v47  ;;  %v9359_v47 = vld [vmem:[%s15423_s7 + $0xcc0] sm:$0xf] }
 0x35a   :  { %6130 = vmatpush.bf16.msra.mxu3 %v8048_v62  ;;  %v10170_v62 = vld [vmem:[%s15423_s7 + $0xa24] sm:$0xf] }
 0x35b   :  { %6089 = vmatpush.bf16.msra.mxu0 %v9136_v0  ;;  %6047 = vmatpush.bf16.msrb.mxu1 %v8464_v53  ;;  %v9995_v0 = vld [vmem:[%s15423_s7 + $0x4ac] sm:$0xf]  ;;  %v9028_v12 = vor.u32 %v10170_v62, %v9025_v57  ;;  %v8913_v62 = vld [vmem:[%s15423_s7 + $0x95c] sm:$0xf0] }
 0x35c   :  { %6118 = vmatpush.bf16.msra.mxu2 %v7768_v46  ;;  %v7989_v46 = vld [vmem:[%s15423_s7 + $0x224] sm:$0xf0] }
 0x35d   :  { %v7992_v24 = vor.u32 %v9911_v39, %v7989_v46  ;;  %v10301_v52 = vpop.eup %10300  ;;  %v8328_v39 = vor.u32 %v9995_v0, %v8325_v50  ;;  %v8297_v46 = vld [vmem:[%s15423_s7 + $0x48c] sm:$0xf0]  ;;  %v3236_v0 = vperm.slane %v14158_v5, 2  ;;  %v8916_v50 = vor.u32 %v10142_v51, %v8913_v62  ;;  %v9950_v51 = vld [vmem:[%s15423_s7 + $0x340] sm:$0xf0] }
 0x35e   :  { %6131 = vmatpush.bf16.msra.mxu3 %v8020_v22  ;;  %6359 = vst [vmem:[%s15426_s9 + $0x40] sm:$0xff] %v10301_v52  ;;  %v8997_v22 = vld [vmem:[%s15423_s7 + $0xa04] sm:$0xf0]  ;;  %v10051_v5 = vld [vmem:[%s15423_s7 + $0x66c] sm:$0xf] }
 0x35f   :  { %6090 = vmatpush.bf16.msra.mxu0 %v9108_v54  ;;  %6048 = vmatpush.bf16.msrb.mxu1 %v8436_v7  ;;  %v9000_v6 = vor.u32 %v10163_v42, %v8997_v22  ;;  %v10271_v54 = vld [vmem:[%s15423_s7 + $0xd48] sm:$0xf0]  ;;  %v7939_v7 = vld [vmem:[%s15423_s7 + $0x1a0] sm:$0xf]  ;;  %v8885_v22 = vld [vmem:[%s15423_s7 + $0x924] sm:$0xf0] }
 0x360   :  { %6119 = vmatpush.bf16.msra.mxu2 %v7740_v27  ;;  %v9499_v27 = vld [vmem:[%s15423_s7 + $0xdd8] sm:$0xf]  ;;  %v9416_v10 = vor.u32 %v10271_v54, %v9415_v8  ;;  %v7940_v28 = vor.u32 %v9901_v1, %v7939_v7  ;;  %v10135_v42 = vld [vmem:[%s15423_s7 + $0x90c] sm:$0xf]  ;;  %v8185_v8 = vld [vmem:[%s15423_s7 + $0x3ac] sm:$0xf0] }
 0x361   :  { %v9500_v41 = vor.u32 %v10292_v33, %v9499_v27  ;;  %v10264_v27 = vld [vmem:[%s15423_s7 + $0xd10] sm:$0xf0]  ;;  %v5785_v33 = vpop.f32.mrf.mxu2  ;;  %v8888_v25 = vor.u32 %v10135_v42, %v8885_v22  ;;  %v7799_v62 = vld [vmem:[%s15423_s7 + $0x88] sm:$0xf] }
 0x362   :  { %6132 = vmatpush.bf16.msra.mxu3 %v7992_v24  ;;  %v8269_v24 = vld [vmem:[%s15423_s7 + $0x454] sm:$0xf0]  ;;  %v10128_v54 = vld [vmem:[%s15423_s7 + $0x8d4] sm:$0xf]  ;;  %v5786_v9 = vadd.f32 %v5785_v33, %v3236_v0  ;;  %v5827_v7 = vpop.f32.mrf.mxu1  ;;  %v9873_v33 = vld [vmem:[%s15423_s7 + $0xd8] sm:$0xf0] }
 0x363   :  { %6120 = vmatmul.bf16.vlgmr.msra.gmra.mxu2 %v12736_v30  ;;  %6091 = vmatpush.bf16.msra.mxu0 %v9080_v29  ;;  %v10149_v29 = vld [vmem:[%s15423_s7 + $0x97c] sm:$0xf] }
 0x364   :  { %6168 = vmatpush.bf16.msrb.mxu2 %v8832_v3  ;;  %v10093_v3 = vld [vmem:[%s15423_s7 + $0x7bc] sm:$0xf]  ;;  %6049 = vmatpush.bf16.msrb.mxu1 %v8408_v26  ;;  %v9894_v26 = vld [vmem:[%s15423_s7 + $0x180] sm:$0xf0]  ;;  %v8944_v16 = vor.u32 %v10149_v29, %v8941_v31 }
 0x365   :  { %v8720_v48 = vor.u32 %v10093_v3, %v8717_v37  ;;  %v8272_v3 = vor.u32 %v9981_v21, %v8269_v24  ;;  %v7911_v37 = vld [vmem:[%s15423_s7 + $0x168] sm:$0xf]  ;;  %v8605_v21 = vld [vmem:[%s15423_s7 + $0x6f4] sm:$0xf0]  ;;  %v8163_v24 = vld [vmem:[%s15423_s7 + $0x360] sm:$0xf] }
 0x366   :  { %6133 = vmatpush.bf16.msra.mxu3 %v7964_v15  ;;  %6092 = vmatmul.bf16.vlgmr.msra.gmra.mxu0 %v13297_v20  ;;  %v9974_v15 = vld [vmem:[%s15423_s7 + $0x404] sm:$0xf]  ;;  %v7912_v34 = vor.u32 %v9894_v26, %v7911_v37  ;;  %v8860_v37 = vor.u32 %v10128_v54, %v8857_v11  ;;  %v9193_v54 = vld [vmem:[%s15423_s7 + $0xb8c] sm:$0xf0]  ;;  %v10044_v11 = vld [vmem:[%s15423_s7 + $0x634] sm:$0xf] }
 0x367   :  { %6140 = vmatpush.bf16.msrb.mxu0 %v8384_v38  ;;  %6050 = vmatmul.bf16.vlgmr.msrb.gmra.mxu1 %v12815_v40 }
 0x368   :  { %6169 = vmatpush.bf16.msrb.mxu2 %v8804_v45  ;;  %v8689_v45 = vld [vmem:[%s15423_s7 + $0x79c] sm:$0xf0]  ;;  %6098 = vmatpush.bf16.msra.mxu1 %v9500_v41 }
 0x369   :  { %v8692_v53 = vor.u32 %v10086_v23, %v8689_v45  ;;  %6134 = vmatmul.bf16.vlgmr.msra.gmra.mxu3 %v12692_v63  ;;  %v8241_v41 = vld [vmem:[%s15423_s7 + $0x41c] sm:$0xf0]  ;;  %v7883_v23 = vld [vmem:[%s15423_s7 + $0x130] sm:$0xf]  ;;  %v9887_v45 = vld [vmem:[%s15423_s7 + $0x148] sm:$0xf0] }
 0x36a   :  { %6182 = vmatpush.bf16.msrb.mxu3 %v9056_v58  ;;  %v10257_v58 = vld [vmem:[%s15423_s7 + $0xcd8] sm:$0xf0]  ;;  %v8244_v57 = vor.u32 %v9974_v15, %v8241_v41  ;;  %v7884_v56 = vor.u32 %v9887_v45, %v7883_v23  ;;  %v9249_v15 = vld [vmem:[%s15423_s7 + $0xbfc] sm:$0xf0]  ;;  %v5815_v45 = vpop.f32.mrf.mxu0 }
 0x36b   :  { %6141 = vmatpush.bf16.msrb.mxu0 %v8356_v49  ;;  %v9360_v52 = vor.u32 %v10257_v58, %v9359_v47  ;;  %v9967_v49 = vld [vmem:[%s15423_s7 + $0x3cc] sm:$0xf]  ;;  %v10058_v47 = vld [vmem:[%s15423_s7 + $0x6a4] sm:$0xf]  ;;  %v8577_v58 = vld [vmem:[%s15423_s7 + $0x6bc] sm:$0xf0] }
 0x36c   :  { %6170 = vmatpush.bf16.msrb.mxu2 %v8776_v2  ;;  %6099 = vmatpush.bf16.msra.mxu1 %v9472_v43  ;;  %v9988_v2 = vld [vmem:[%s15423_s7 + $0x474] sm:$0xf]  ;;  %v8213_v43 = vld [vmem:[%s15423_s7 + $0x3e4] sm:$0xf0] }
 0x36d   :  { %v8300_v18 = vor.u32 %v9988_v2, %v8297_v46  ;;  %v8216_v60 = vor.u32 %v9967_v49, %v8213_v43  ;;  %v10243_v2 = vld [vmem:[%s15423_s7 + $0xc68] sm:$0xf0]  ;;  %v5787_v46 = vpop.f32.mrf.mxu2  ;;  %v8580_v43 = vor.u32 %v10058_v47, %v8577_v58  ;;  %v8051_v47 = vld [vmem:[%s15423_s7 + $0x280] sm:$0xf]  ;;  %v9929_v58 = vld [vmem:[%s15423_s7 + $0x298] sm:$0xf0] }
 0x36e   :  { %6183 = vmatpush.bf16.msrb.mxu3 %v9028_v12  ;;  %v9331_v12 = vld [vmem:[%s15423_s7 + $0xc88] sm:$0xf]  ;;  %v5788_v49 = vadd.f32 %v5787_v46, %v3236_v0 }
 0x36f   :  { %6142 = vmatpush.bf16.msrb.mxu0 %v8328_v39  ;;  %v9880_v39 = vld [vmem:[%s15423_s7 + $0x110] sm:$0xf0]  ;;  %v8549_v0 = vld [vmem:[%s15423_s7 + $0x684] sm:$0xf0] }
 0x370   :  { %6171 = vmatpush.bf16.msrb.mxu2 %v8748_v14  ;;  %6100 = vmatpush.bf16.msra.mxu1 %v9444_v4  ;;  %v9387_v14 = vld [vmem:[%s15423_s7 + $0xcf8] sm:$0xf]  ;;  %v9303_v4 = vld [vmem:[%s15423_s7 + $0xc50] sm:$0xf]  ;;  %v7856_v1 = vor.u32 %v9880_v39, %v7855_v59  ;;  %v9943_v59 = vld [vmem:[%s15423_s7 + $0x308] sm:$0xf0] }
 0x371   :  { %v9388_v38 = vor.u32 %v10264_v27, %v9387_v14  ;;  %v9957_v14 = vld [vmem:[%s15423_s7 + $0x378] sm:$0xf0]  ;;  %v7827_v27 = vld [vmem:[%s15423_s7 + $0xc0] sm:$0xf]  ;;  %v9304_v29 = vor.u32 %v10243_v2, %v9303_v4  ;;  %v9859_v39 = vld [vmem:[%s15423_s7 + $0x68] sm:$0xf0]  ;;  %v5829_v2 = vpop.f32.mrf.mxu1 }
 0x372   :  { %6184 = vmatpush.bf16.msrb.mxu3 %v9000_v6  ;;  %v8164_v41 = vor.u32 %v9957_v14, %v8163_v24  ;;  %v9852_v24 = vld [vmem:[%s15423_s7 + $0x30] sm:$0xf0]  ;;  %v8835_v14 = vld [vmem:[%s15423_s7 + $0x8a0] sm:$0xf] }
 0x373   :  { %6143 = vmatpush.bf16.msrb.mxu0 %v8300_v18  ;;  %v9277_v18 = vld [vmem:[%s15423_s7 + $0xc34] sm:$0xf0] }
 0x374   :  { %6172 = vmatpush.bf16.msrb.mxu2 %v8720_v48  ;;  %6101 = vmatpush.bf16.msra.mxu1 %v9416_v10  ;;  %v5799_v48 = vpop.f32.mrf.mxu3  ;;  %v10065_v10 = vld [vmem:[%s15423_s7 + $0x6dc] sm:$0xf]  ;;  %v9280_v31 = vor.u32 %v10233_v13, %v9277_v18  ;;  %v8521_v13 = vld [vmem:[%s15423_s7 + $0x64c] sm:$0xf0]  ;;  %v8079_v18 = vld [vmem:[%s15423_s7 + $0x2b8] sm:$0xf] }
 0x375   :  { %v8608_v26 = vor.u32 %v10065_v10, %v8605_v21  ;;  %v5841_v23 = vpop.f32.mrf.mxu2  ;;  %v9936_v10 = vld [vmem:[%s15423_s7 + $0x2d0] sm:$0xf0]  ;;  %v7743_v21 = vld [vmem:[%s15423_s7 + $0x18] sm:$0xf] }
 0x376   :  { %6185 = vmatpush.bf16.msrb.mxu3 %v8972_v17  ;;  %v5800_v17 = vadd.f32 %v5799_v48, %v5786_v9  ;;  %v8135_v48 = vld [vmem:[%s15423_s7 + $0x328] sm:$0xf] }
 0x377   :  { %6144 = vmatpush.bf16.msrb.mxu0 %v8272_v3 }
 0x378   :  { %6173 = vmatpush.bf16.msrb.mxu2 %v8692_v53  ;;  %6102 = vmatpush.bf16.msra.mxu1 %v9388_v38  ;;  %v10250_v53 = vld [vmem:[%s15423_s7 + $0xca0] sm:$0xf0]  ;;  %v5814_v3 = vadd.f32 %v5813_v61, %v5800_v17  ;;  %v5869_v17 = vpop.f32.mrf.mxu0 }
 0x379   :  { %v9332_v6 = vor.u32 %v10250_v53, %v9331_v12  ;;  %v10226_v38 = vld [vmem:[%s15423_s7 + $0xbe4] sm:$0xf]  ;;  %v9221_v12 = vld [vmem:[%s15423_s7 + $0xbc4] sm:$0xf0]  ;;  %v8136_v53 = vor.u32 %v9950_v51, %v8135_v48 }
 0x37a   :  { %6186 = vmatpush.bf16.msrb.mxu3 %v8944_v16  ;;  %v7828_v16 = vor.u32 %v9873_v33, %v7827_v27  ;;  %v10125_v27 = vld [vmem:[%s15423_s7 + $0x8b8] sm:$0xf0]  ;;  %v8524_v33 = vor.u32 %v10044_v11, %v8521_v13  ;;  %v8807_v51 = vld [vmem:[%s15423_s7 + $0x868] sm:$0xf] }
 0x37b   :  { %6145 = vmatpush.bf16.msrb.mxu0 %v8244_v57  ;;  %v9866_v57 = vld [vmem:[%s15423_s7 + $0xa0] sm:$0xf0] }
 0x37c   :  { %6174 = vmatpush.bf16.msrb.mxu2 %v8664_v35  ;;  %6103 = vmatpush.bf16.msra.mxu1 %v9360_v52  ;;  %v9960_v35 = vld [vmem:[%s15423_s7 + $0x394] sm:$0xf]  ;;  %v9252_v52 = vor.u32 %v10226_v38, %v9249_v15  ;;  %v7800_v61 = vor.u32 %v9866_v57, %v7799_v62  ;;  %v8493_v38 = vld [vmem:[%s15423_s7 + $0x614] sm:$0xf0]  ;;  %v10118_v62 = vld [vmem:[%s15423_s7 + $0x880] sm:$0xf0] }
 0x37e   :  { %6187 = vmatpush.bf16.msrb.mxu3 %v8916_v50  ;;  %v10219_v50 = vld [vmem:[%s15423_s7 + $0xbac] sm:$0xf] }
 0x37f   :  { %6146 = vmatpush.bf16.msrb.mxu0 %v8216_v60  ;;  %v7771_v60 = vld [vmem:[%s15423_s7 + $0x50] sm:$0xf]  ;;  %v9224_v46 = vor.u32 %v10219_v50, %v9221_v12  ;;  %v10030_v50 = vld [vmem:[%s15423_s7 + $0x5c4] sm:$0xf]  ;;  %v8465_v12 = vld [vmem:[%s15423_s7 + $0x5dc] sm:$0xf0] }
 0x380   :  { %6175 = vmatpush.bf16.msrb.mxu2 %v8636_v19  ;;  %v8188_v19 = vor.u32 %v9960_v35, %v8185_v8  ;;  %6104 = vmatpush.bf16.msra.mxu1 %v9332_v6  ;;  %v8552_v35 = vor.u32 %v10051_v5, %v8549_v0  ;;  %v10212_v8 = vld [vmem:[%s15423_s7 + $0xb74] sm:$0xf]  ;;  %v8023_v5 = vld [vmem:[%s15423_s7 + $0x248] sm:$0xf]  ;;  %v9922_v0 = vld [vmem:[%s15423_s7 + $0x260] sm:$0xf0] }
 0x382   :  { %6188 = vmatpush.bf16.msrb.mxu3 %v8888_v25  ;;  %v7772_v25 = vor.u32 %v9859_v39, %v7771_v60  ;;  %v5883_v48 = vpop.f32.mrf.mxu1  ;;  %v10191_v60 = vld [vmem:[%s15423_s7 + $0xacc] sm:$0xf]  ;;  %v9109_v39 = vld [vmem:[%s15423_s7 + $0xae4] sm:$0xf0] }
 0x383   :  { %6176 = vmatmul.bf16.vlgmr.msrb.gmra.mxu2 %v12963_v32  ;;  %6147 = vmatpush.bf16.msrb.mxu0 %v8188_v19  ;;  %v9196_v19 = vor.u32 %v10212_v8, %v9193_v54  ;;  %v9915_v54 = vld [vmem:[%s15423_s7 + $0x228] sm:$0xf0]  ;;  %v9112_v13 = vor.u32 %v10191_v60, %v9109_v39  ;;  %v9003_v60 = vld [vmem:[%s15423_s7 + $0x9f0] sm:$0xf] }
 0x384   :  { %6224 = vmatpush.bf16.msra.mxu2 %v7940_v28  ;;  %v5801_v28 = vpop.f32.mrf.mxu3  ;;  %6105 = vmatpush.bf16.msra.mxu1 %v9304_v29  ;;  %v9165_v29 = vld [vmem:[%s15423_s7 + $0xb54] sm:$0xf0]  ;;  %v10167_v39 = vld [vmem:[%s15423_s7 + $0xa08] sm:$0xf0] }
 0x385   :  { %v5802_v42 = vadd.f32 %v5801_v28, %v5788_v49  ;;  %v10205_v28 = vld [vmem:[%s15423_s7 + $0xb3c] sm:$0xf] }
 0x386   :  { %6189 = vmatpush.bf16.msrb.mxu3 %v8860_v37  ;;  %6148 = vmatmul.bf16.vlgmr.msrb.gmra.mxu0 %v12836_v36  ;;  %v7744_v37 = vor.u32 %v9852_v24, %v7743_v21 }
 0x387   :  { %6196 = vmatpush.bf16.msra.mxu0 %v9280_v31  ;;  %6106 = vmatmul.bf16.vlgmr.msra.gmra.mxu1 %v13445_v55  ;;  %v5816_v6 = vadd.f32 %v5815_v45, %v5802_v42  ;;  %v5843_v31 = vpop.f32.mrf.mxu2  ;;  %v10198_v45 = vld [vmem:[%s15423_s7 + $0xb04] sm:$0xf]  ;;  %v8779_v42 = vld [vmem:[%s15423_s7 + $0x830] sm:$0xf] }
 0x388   :  { %6225 = vmatpush.bf16.msra.mxu2 %v7912_v34  ;;  %v5828_v34 = vadd.f32 %v5827_v7, %v5814_v3  ;;  %6154 = vmatpush.bf16.msrb.mxu1 %v8608_v26  ;;  %v8080_v3 = vor.u32 %v9936_v10, %v8079_v18  ;;  %v10037_v26 = vld [vmem:[%s15423_s7 + $0x5fc] sm:$0xf]  ;;  %v10016_v18 = vld [vmem:[%s15423_s7 + $0x554] sm:$0xf] }
 0x389   :  { %6190 = vmatmul.bf16.vlgmr.msrb.gmra.mxu3 %v13133_v44 }
 0x38a   :  { %6238 = vmatpush.bf16.msra.mxu3 %v8164_v41  ;;  %v5842_v22 = vadd.f32 %v5841_v23, %v5828_v34  ;;  %v9168_v34 = vor.u32 %v10205_v28, %v9165_v29  ;;  %v8496_v23 = vor.u32 %v10037_v26, %v8493_v38  ;;  %v5885_v11 = vpop.f32.mrf.mxu1  ;;  %v10013_v28 = vld [vmem:[%s15423_s7 + $0x538] sm:$0xf0] }
 0x38b   :  { %6197 = vmatpush.bf16.msra.mxu0 %v9252_v52  ;;  %v9137_v52 = vld [vmem:[%s15423_s7 + $0xb1c] sm:$0xf0]  ;;  %v10181_v38 = vld [vmem:[%s15423_s7 + $0xa78] sm:$0xf0] }
 0x38c   :  { %6226 = vmatpush.bf16.msra.mxu2 %v7884_v56  ;;  %v8107_v56 = vld [vmem:[%s15423_s7 + $0x2f0] sm:$0xf]  ;;  %v5855_v4 = vpop.f32.mrf.mxu3  ;;  %6155 = vmatpush.bf16.msrb.mxu1 %v8580_v43  ;;  %v8052_v43 = vor.u32 %v9929_v58, %v8051_v47 }
 0x38d   :  { %v8108_v9 = vor.u32 %v9943_v59, %v8107_v56  ;;  %v5856_v7 = vadd.f32 %v5855_v4, %v5842_v22  ;;  %v9140_v56 = vor.u32 %v10198_v45, %v9137_v52  ;;  %v10111_v22 = vld [vmem:[%s15423_s7 + $0x848] sm:$0xf0]  ;;  %v8468_v59 = vor.u32 %v10030_v50, %v8465_v12  ;;  %v5871_v4 = vpop.f32.mrf.mxu0  ;;  %v9473_v45 = vld [vmem:[%s15423_s7 + $0xdbc] sm:$0xf0]  ;;  %v9031_v52 = vld [vmem:[%s15423_s7 + $0xa28] sm:$0xf] }
 0x38e   :  { %6239 = vmatpush.bf16.msra.mxu3 %v8136_v53  ;;  %v8780_v8 = vor.u32 %v10111_v22, %v8779_v42  ;;  %v10090_v50 = vld [vmem:[%s15423_s7 + $0x7a0] sm:$0xf0]  ;;  %v10275_v22 = vld [vmem:[%s15423_s7 + $0xd6c] sm:$0xf] }
 0x38f   :  { %6198 = vmatpush.bf16.msra.mxu0 %v9224_v46  ;;  %v5870_v15 = vadd.f32 %v5869_v17, %v5856_v7  ;;  %v10023_v46 = vld [vmem:[%s15423_s7 + $0x58c] sm:$0xf]  ;;  %v8409_v7 = vld [vmem:[%s15423_s7 + $0x56c] sm:$0xf0] }
 0x390   :  { %6227 = vmatpush.bf16.msra.mxu2 %v7856_v1  ;;  %v5830_v1 = vadd.f32 %v5829_v2, %v5816_v6  ;;  %6156 = vmatpush.bf16.msrb.mxu1 %v8552_v35  ;;  %v8024_v2 = vor.u32 %v9922_v0, %v8023_v5  ;;  %v7995_v6 = vld [vmem:[%s15423_s7 + $0x210] sm:$0xf]  ;;  %v9999_v0 = vld [vmem:[%s15423_s7 + $0x4c8] sm:$0xf0] }
 0x391   :  { %v5884_v57 = vadd.f32 %v5883_v48, %v5870_v15  ;;  %v9081_v17 = vld [vmem:[%s15423_s7 + $0xaac] sm:$0xf0]  ;;  %v8723_v15 = vld [vmem:[%s15423_s7 + $0x7c0] sm:$0xf] }
 0x392   :  { %6240 = vmatpush.bf16.msra.mxu3 %v8108_v9  ;;  %v5844_v41 = vadd.f32 %v5843_v31, %v5830_v1  ;;  %v8751_v9 = vld [vmem:[%s15423_s7 + $0x7f8] sm:$0xf]  ;;  %v10184_v1 = vld [vmem:[%s15423_s7 + $0xa94] sm:$0xf]  ;;  %v10289_v31 = vld [vmem:[%s15423_s7 + $0xddc] sm:$0xf] }
 0x393   :  { %6199 = vmatpush.bf16.msra.mxu0 %v9196_v19  ;;  %10302 = vtanh.f32 %v5884_v57  ;;  %v7967_v19 = vld [vmem:[%s15423_s7 + $0x1d8] sm:$0xf]  ;;  %v9084_v26 = vor.u32 %v10184_v1, %v9081_v17  ;;  %v8331_v5 = vld [vmem:[%s15423_s7 + $0x4b0] sm:$0xf] }
 0x394   :  { %6228 = vmatpush.bf16.msra.mxu2 %v7828_v16  ;;  %v8836_v16 = vor.u32 %v10125_v27, %v8835_v14  ;;  %6157 = vmatpush.bf16.msrb.mxu1 %v8524_v33  ;;  %v5857_v49 = vpop.f32.mrf.mxu3  ;;  %v9908_v14 = vld [vmem:[%s15423_s7 + $0x1f0] sm:$0xf0]  ;;  %v7996_v27 = vor.u32 %v9915_v54, %v7995_v6  ;;  %v8387_v33 = vld [vmem:[%s15423_s7 + $0x520] sm:$0xf]  ;;  %v8303_v6 = vld [vmem:[%s15423_s7 + $0x478] sm:$0xf] }
 0x395   :  { %v5858_v53 = vadd.f32 %v5857_v49, %v5844_v41  ;;  %v10097_v41 = vld [vmem:[%s15423_s7 + $0x7d8] sm:$0xf0]  ;;  %v8388_v47 = vor.u32 %v10013_v28, %v8387_v33  ;;  %v7968_v58 = vor.u32 %v9908_v14, %v7967_v19  ;;  %v10174_v49 = vld [vmem:[%s15423_s7 + $0xa40] sm:$0xf0]  ;;  %v9389_v14 = vld [vmem:[%s15423_s7 + $0xd14] sm:$0xf0] }
 0x396   :  { %6241 = vmatpush.bf16.msra.mxu3 %v8080_v3  ;;  %v9501_v3 = vld [vmem:[%s15423_s7 + $0xdf4] sm:$0xf0]  ;;  %v8724_v57 = vor.u32 %v10097_v41, %v8723_v15  ;;  %v10261_v19 = vld [vmem:[%s15423_s7 + $0xcfc] sm:$0xf]  ;;  %v8947_v33 = vld [vmem:[%s15423_s7 + $0x980] sm:$0xf] }
 0x397   :  { %6200 = vmatpush.bf16.msra.mxu0 %v9168_v34  ;;  %v5872_v35 = vadd.f32 %v5871_v4, %v5858_v53  ;;  %v9504_v48 = vor.u32 %v10289_v31, %v9501_v3  ;;  %v8359_v34 = vld [vmem:[%s15423_s7 + $0x4e8] sm:$0xf]  ;;  %v8667_v4 = vld [vmem:[%s15423_s7 + $0x750] sm:$0xf]  ;;  %v10153_v28 = vld [vmem:[%s15423_s7 + $0x998] sm:$0xf0]  ;;  %v9392_v31 = vor.u32 %v10261_v19, %v9389_v14 }
 0x398   :  { %6229 = vmatpush.bf16.msra.mxu2 %v7800_v61  ;;  %v8808_v61 = vor.u32 %v10118_v62, %v8807_v51  ;;  %6158 = vmatpush.bf16.msrb.mxu1 %v8496_v23  ;;  %v10006_v51 = vld [vmem:[%s15423_s7 + $0x500] sm:$0xf0]  ;;  %v8247_v3 = vld [vmem:[%s15423_s7 + $0x408] sm:$0xf]  ;;  %v9361_v15 = vld [vmem:[%s15423_s7 + $0xcdc] sm:$0xf0] }
 0x399   :  { %v10303_v10 = vpop.eup %10302  ;;  %v5886_v21 = vadd.f32 %v5885_v11, %v5872_v35  ;;  %v10282_v23 = vld [vmem:[%s15423_s7 + $0xda4] sm:$0xf]  ;;  %v8360_v53 = vor.u32 %v10006_v51, %v8359_v34  ;;  %v9992_v35 = vld [vmem:[%s15423_s7 + $0x490] sm:$0xf0]  ;;  %v8219_v34 = vld [vmem:[%s15423_s7 + $0x3d0] sm:$0xf] }
 0x39a   :  { %6242 = vmatpush.bf16.msra.mxu3 %v8052_v43  ;;  %6352 = vst [vmem:[%s15426_s9 + $0x10] sm:$0xff] %v10303_v10  ;;  %v8695_v43 = vld [vmem:[%s15423_s7 + $0x788] sm:$0xf]  ;;  %v10160_v11 = vld [vmem:[%s15423_s7 + $0x9d0] sm:$0xf0] }
 0x39b   :  { %6201 = vmatpush.bf16.msra.mxu0 %v9140_v56  ;;  %10304 = vtanh.f32 %v5886_v21  ;;  %v9032_v56 = vor.u32 %v10174_v49, %v9031_v52  ;;  %v8696_v42 = vor.u32 %v10090_v50, %v8695_v43  ;;  %v8275_v10 = vld [vmem:[%s15423_s7 + $0x440] sm:$0xf]  ;;  %v9985_v21 = vld [vmem:[%s15423_s7 + $0x458] sm:$0xf0]  ;;  %v9971_v51 = vld [vmem:[%s15423_s7 + $0x3e8] sm:$0xf0]  ;;  %v5925_v52 = vpop.f32.mrf.mxu0 }
 0x39c   :  { %6230 = vmatpush.bf16.msra.mxu2 %v7772_v25  ;;  %v10104_v25 = vld [vmem:[%s15423_s7 + $0x810] sm:$0xf0]  ;;  %6159 = vmatpush.bf16.msrb.mxu1 %v8468_v59  ;;  %v9445_v59 = vld [vmem:[%s15423_s7 + $0xd84] sm:$0xf0]  ;;  %v5911_v41 = vpop.f32.mrf.mxu3  ;;  %v8891_v49 = vld [vmem:[%s15423_s7 + $0x910] sm:$0xf]  ;;  %v8220_v50 = vor.u32 %v9971_v51, %v8219_v34 }
 0x39d   :  { %v8752_v29 = vor.u32 %v10104_v25, %v8751_v9  ;;  %v9417_v9 = vld [vmem:[%s15423_s7 + $0xd4c] sm:$0xf0]  ;;  %v8975_v25 = vld [vmem:[%s15423_s7 + $0x9b8] sm:$0xf]  ;;  %v10139_v43 = vld [vmem:[%s15423_s7 + $0x928] sm:$0xf0] }
 0x39e   :  { %6243 = vmatpush.bf16.msra.mxu3 %v8024_v2  ;;  %v10083_v2 = vld [vmem:[%s15423_s7 + $0x768] sm:$0xf0] }
 0x39f   :  { %6202 = vmatpush.bf16.msra.mxu0 %v9112_v13  ;;  %v8668_v54 = vor.u32 %v10083_v2, %v8667_v4  ;;  %v8639_v13 = vld [vmem:[%s15423_s7 + $0x718] sm:$0xf]  ;;  %v10132_v2 = vld [vmem:[%s15423_s7 + $0x8f0] sm:$0xf0] }
 0x3a0   :  { %6231 = vmatpush.bf16.msra.mxu2 %v7744_v37  ;;  %v9059_v37 = vld [vmem:[%s15423_s7 + $0xa60] sm:$0xf] }
 0x3a1   :  { %v9060_v62 = vor.u32 %v10181_v38, %v9059_v37  ;;  %v10305_v12 = vpop.eup %10304  ;;  %v9978_v37 = vld [vmem:[%s15423_s7 + $0x420] sm:$0xf0] }
 0x3a2   :  { %6244 = vmatpush.bf16.msra.mxu3 %v7996_v27  ;;  %6360 = vst [vmem:[%s15426_s9 + $0x48] sm:$0xff] %v10305_v12  ;;  %v5897_v27 = vpop.f32.mrf.mxu2  ;;  %v10254_v38 = vld [vmem:[%s15423_s7 + $0xcc4] sm:$0xf]  ;;  %v10240_v12 = vld [vmem:[%s15423_s7 + $0xc54] sm:$0xf]  ;;  %v5939_v4 = vpop.f32.mrf.mxu1 }
 0x3a3   :  { %6232 = vmatmul.bf16.vlgmr.msra.gmra.mxu2 %v12736_v30  ;;  %v8437_v30 = vld [vmem:[%s15423_s7 + $0x5a4] sm:$0xf0]  ;;  %6203 = vmatpush.bf16.msra.mxu0 %v9084_v26  ;;  %v8948_v26 = vor.u32 %v10153_v28, %v8947_v33  ;;  %v10223_v33 = vld [vmem:[%s15423_s7 + $0xbc8] sm:$0xf0]  ;;  %v8555_v28 = vld [vmem:[%s15423_s7 + $0x670] sm:$0xf] }
 0x3a4   :  { %6280 = vmatpush.bf16.msrb.mxu2 %v8836_v16  ;;  %v8440_v24 = vor.u32 %v10023_v46, %v8437_v30  ;;  %v8412_v16 = vor.u32 %v10016_v18, %v8409_v7  ;;  %v8332_v46 = vor.u32 %v9999_v0, %v8331_v5  ;;  %v9448_v30 = vor.u32 %v10275_v22, %v9445_v59  ;;  %v10076_v18 = vld [vmem:[%s15423_s7 + $0x730] sm:$0xf0]  ;;  %v9305_v5 = vld [vmem:[%s15423_s7 + $0xc6c] sm:$0xf0]  ;;  %v8191_v0 = vld [vmem:[%s15423_s7 + $0x398] sm:$0xf] }
 0x3a5   :  { %v8304_v7 = vor.u32 %v9992_v35, %v8303_v6  ;;  %v8640_v17 = vor.u32 %v10076_v18, %v8639_v13  ;;  %v8892_v22 = vor.u32 %v10139_v43, %v8891_v49  ;;  %v8863_v59 = vld [vmem:[%s15423_s7 + $0x8d8] sm:$0xf]  ;;  %v9255_v13 = vld [vmem:[%s15423_s7 + $0xbe8] sm:$0xf]  ;;  %v10230_v18 = vld [vmem:[%s15423_s7 + $0xc00] sm:$0xf0] }
 0x3a6   :  { %6160 = vmatpush.bf16.msrb.mxu1 %v8440_v24  ;;  %6245 = vmatpush.bf16.msra.mxu3 %v7968_v58  ;;  %v8976_v24 = vor.u32 %v10160_v11, %v8975_v25  ;;  %v8248_v58 = vor.u32 %v9978_v37, %v8247_v3  ;;  %v8864_v25 = vor.u32 %v10132_v2, %v8863_v59  ;;  %v10041_v49 = vld [vmem:[%s15423_s7 + $0x618] sm:$0xf0]  ;;  %v10034_v59 = vld [vmem:[%s15423_s7 + $0x5e0] sm:$0xf0]  ;;  %v9115_v2 = vld [vmem:[%s15423_s7 + $0xad0] sm:$0xf] }
 0x3a7   :  { %6252 = vmatpush.bf16.msrb.mxu0 %v8388_v47  ;;  %v10146_v47 = vld [vmem:[%s15423_s7 + $0x960] sm:$0xf0] }
 0x3a8   :  { %6281 = vmatpush.bf16.msrb.mxu2 %v8808_v61  ;;  %v9476_v61 = vor.u32 %v10282_v23, %v9473_v45  ;;  %6204 = vmatmul.bf16.vlgmr.msra.gmra.mxu0 %v13297_v20  ;;  %v9333_v45 = vld [vmem:[%s15423_s7 + $0xca4] sm:$0xf0] }
 0x3a9   :  { %6246 = vmatmul.bf16.vlgmr.msra.gmra.mxu3 %v12692_v63  ;;  %v10268_v63 = vld [vmem:[%s15423_s7 + $0xd34] sm:$0xf] }
 0x3aa   :  { %6161 = vmatpush.bf16.msrb.mxu1 %v8412_v16  ;;  %6294 = vmatpush.bf16.msrb.mxu3 %v9060_v62  ;;  %v9420_v1 = vor.u32 %v10268_v63, %v9417_v9  ;;  %v8919_v16 = vld [vmem:[%s15423_s7 + $0x948] sm:$0xf]  ;;  %v15207_v62 = vld [vmem:[%s15425_s8] sm:$0x7f] }
 0x3ab   :  { %6253 = vmatpush.bf16.msrb.mxu0 %v8360_v53  ;;  %v8920_v23 = vor.u32 %v10146_v47, %v8919_v16  ;;  %v5899_v53 = vpop.f32.mrf.mxu2  ;;  %v10216_v16 = vld [vmem:[%s15423_s7 + $0xb90] sm:$0xf0]  ;;  %v8527_v47 = vld [vmem:[%s15423_s7 + $0x638] sm:$0xf] }
 0x3ac   :  { %6282 = vmatpush.bf16.msrb.mxu2 %v8780_v8  ;;  %v9004_v8 = vor.u32 %v10167_v39, %v9003_v60  ;;  %v9283_v60 = vld [vmem:[%s15423_s7 + $0xc20] sm:$0xf]  ;;  %v10237_v39 = vld [vmem:[%s15423_s7 + $0xc38] sm:$0xf0] }
 0x3ad   :  { %6162 = vmatmul.bf16.vlgmr.msrb.gmra.mxu1 %v12815_v40  ;;  %v9284_v63 = vor.u32 %v10237_v39, %v9283_v60 }
 0x3ae   :  { %6210 = vmatpush.bf16.msra.mxu1 %v9504_v48  ;;  %6295 = vmatpush.bf16.msrb.mxu3 %v9032_v56  ;;  %v9364_v48 = vor.u32 %v10254_v38, %v9361_v15  ;;  %v9964_v56 = vld [vmem:[%s15423_s7 + $0x3b0] sm:$0xf0] }
 0x3af   :  { %6254 = vmatpush.bf16.msrb.mxu0 %v8332_v46  ;;  %v8611_v46 = vld [vmem:[%s15423_s7 + $0x6e0] sm:$0xf]  ;;  %v8192_v35 = vor.u32 %v9964_v56, %v8191_v0  ;;  %v9143_v0 = vld [vmem:[%s15423_s7 + $0xb08] sm:$0xf]  ;;  %v10202_v56 = vld [vmem:[%s15423_s7 + $0xb20] sm:$0xf0] }
 0x3b0   :  { %6283 = vmatpush.bf16.msrb.mxu2 %v8752_v29  ;;  %v8276_v29 = vor.u32 %v9985_v21, %v8275_v10  ;;  %v9144_v39 = vor.u32 %v10202_v56, %v9143_v0 }
 0x3b2   :  { %6211 = vmatpush.bf16.msra.mxu1 %v9476_v61  ;;  %6296 = vmatpush.bf16.msrb.mxu3 %v9004_v8  ;;  %v5913_v8 = vpop.f32.mrf.mxu3 }
 0x3b3   :  { %6255 = vmatpush.bf16.msrb.mxu0 %v8304_v7  ;;  %v8583_v7 = vld [vmem:[%s15423_s7 + $0x6a8] sm:$0xf]  ;;  %v5953_v21 = vpop.f32.mrf.mxu2 }
 0x3b4   :  { %6284 = vmatpush.bf16.msrb.mxu2 %v8724_v57  ;;  %v3237_v57 = vperm.slane %v15207_v62, 3 }
 0x3b6   :  { %6212 = vmatpush.bf16.msra.mxu1 %v9448_v30  ;;  %6297 = vmatpush.bf16.msrb.mxu3 %v8976_v24  ;;  %v10069_v30 = vld [vmem:[%s15423_s7 + $0x6f8] sm:$0xf0]  ;;  %v5927_v24 = vpop.f32.mrf.mxu0  ;;  %v5900_v19 = vadd.f32 %v5899_v53, %v3237_v57 }
 0x3b7   :  { %6256 = vmatpush.bf16.msrb.mxu0 %v8276_v29  ;;  %v8612_v11 = vor.u32 %v10069_v30, %v8611_v46  ;;  %v10055_v29 = vld [vmem:[%s15423_s7 + $0x688] sm:$0xf0] }
 0x3b8   :  { %6285 = vmatpush.bf16.msrb.mxu2 %v8696_v42  ;;  %v5898_v42 = vadd.f32 %v5897_v27, %v3237_v57  ;;  %v9227_v27 = vld [vmem:[%s15423_s7 + $0xbb0] sm:$0xf]  ;;  %v10195_v46 = vld [vmem:[%s15423_s7 + $0xae8] sm:$0xf0] }
 0x3b9   :  { %v9228_v38 = vor.u32 %v10223_v33, %v9227_v27  ;;  %v10286_v27 = vld [vmem:[%s15423_s7 + $0xdc0] sm:$0xf0] }
 0x3ba   :  { %6213 = vmatpush.bf16.msra.mxu1 %v9420_v1  ;;  %6298 = vmatpush.bf16.msrb.mxu3 %v8948_v26  ;;  %v5912_v6 = vadd.f32 %v5911_v41, %v5898_v42  ;;  %v10062_v1 = vld [vmem:[%s15423_s7 + $0x6c0] sm:$0xf0]  ;;  %v5967_v37 = vpop.f32.mrf.mxu3  ;;  %v5941_v26 = vpop.f32.mrf.mxu1  ;;  %v9199_v41 = vld [vmem:[%s15423_s7 + $0xb78] sm:$0xf] }
 0x3bb   :  { %6257 = vmatpush.bf16.msrb.mxu0 %v8248_v58  ;;  %v8584_v14 = vor.u32 %v10062_v1, %v8583_v7  ;;  %v9200_v51 = vor.u32 %v10216_v16, %v9199_v41  ;;  %v8415_v7 = vld [vmem:[%s15423_s7 + $0x558] sm:$0xf]  ;;  %v10020_v1 = vld [vmem:[%s15423_s7 + $0x570] sm:$0xf0]  ;;  %v9367_v41 = vld [vmem:[%s15423_s7 + $0xcc8] sm:$0xf] }
 0x3bc   :  { %6286 = vmatpush.bf16.msrb.mxu2 %v8668_v54  ;;  %v9308_v54 = vor.u32 %v10240_v12, %v9305_v5  ;;  %v5926_v9 = vadd.f32 %v5925_v52, %v5912_v6  ;;  %v8499_v52 = vld [vmem:[%s15423_s7 + $0x600] sm:$0xf]  ;;  %v8443_v6 = vld [vmem:[%s15423_s7 + $0x590] sm:$0xf]  ;;  %v10258_v16 = vld [vmem:[%s15423_s7 + $0xce0] sm:$0xf0] }
 0x3bd   :  { %v8500_v5 = vor.u32 %v10041_v49, %v8499_v52  ;;  %v10244_v52 = vld [vmem:[%s15423_s7 + $0xc70] sm:$0xf0] }
 0x3be   :  { %6214 = vmatpush.bf16.msra.mxu1 %v9392_v31  ;;  %6299 = vmatpush.bf16.msrb.mxu3 %v8920_v23  ;;  %v5940_v10 = vadd.f32 %v5939_v4, %v5926_v9  ;;  %v5914_v31 = vadd.f32 %v5913_v8, %v5900_v19  ;;  %v5981_v34 = vpop.f32.mrf.mxu0  ;;  %v9171_v23 = vld [vmem:[%s15423_s7 + $0xb40] sm:$0xf] }
 0x3bf   :  { %6258 = vmatpush.bf16.msrb.mxu0 %v8220_v50 }
 0x3c0   :  { %6287 = vmatpush.bf16.msrb.mxu2 %v8640_v17  ;;  %v9256_v17 = vor.u32 %v10230_v18, %v9255_v13  ;;  %v5954_v3 = vadd.f32 %v5953_v21, %v5940_v10  ;;  %v5928_v15 = vadd.f32 %v5927_v24, %v5914_v31  ;;  %v9087_v13 = vld [vmem:[%s15423_s7 + $0xa98] sm:$0xf]  ;;  %v10188_v18 = vld [vmem:[%s15423_s7 + $0xab0] sm:$0xf0]  ;;  %v9507_v10 = vld [vmem:[%s15423_s7 + $0xde0] sm:$0xf] }
 0x3c1   :  { %v10293_v21 = vld [vmem:[%s15423_s7 + $0xdf8] sm:$0xf0]  ;;  %v9088_v24 = vor.u32 %v10188_v18, %v9087_v13  ;;  %v10279_v31 = vld [vmem:[%s15423_s7 + $0xd88] sm:$0xf0] }
 0x3c2   :  { %6215 = vmatpush.bf16.msra.mxu1 %v9364_v48  ;;  %6300 = vmatpush.bf16.msrb.mxu3 %v8892_v22  ;;  %v5968_v58 = vadd.f32 %v5967_v37, %v5954_v3  ;;  %v5942_v48 = vadd.f32 %v5941_v26, %v5928_v15  ;;  %v5969_v42 = vpop.f32.mrf.mxu3  ;;  %v8471_v22 = vld [vmem:[%s15423_s7 + $0x5c8] sm:$0xf]  ;;  %v9508_v19 = vor.u32 %v10293_v21, %v9507_v10  ;;  %v9423_v37 = vld [vmem:[%s15423_s7 + $0xd38] sm:$0xf]  ;;  %v3239_v21 = vperm.slane %v15207_v62, 5 }
 0x3c3   :  { %6288 = vmatmul.bf16.vlgmr.msrb.gmra.mxu2 %v12963_v32  ;;  %v10247_v32 = vld [vmem:[%s15423_s7 + $0xc8c] sm:$0xf]  ;;  %6259 = vmatpush.bf16.msrb.mxu0 %v8192_v35  ;;  %v8472_v4 = vor.u32 %v10034_v59, %v8471_v22 }
 0x3c4   :  { %v9336_v61 = vor.u32 %v10247_v32, %v9333_v45  ;;  %v10209_v32 = vld [vmem:[%s15423_s7 + $0xb58] sm:$0xf0]  ;;  %v5955_v45 = vpop.f32.mrf.mxu2  ;;  %v5982_v43 = vadd.f32 %v5981_v34, %v5968_v58  ;;  %v10027_v35 = vld [vmem:[%s15423_s7 + $0x5a8] sm:$0xf0]  ;;  %v3238_v58 = vperm.slane %v15207_v62, 4 }
 0x3c5   :  { %v5956_v50 = vadd.f32 %v5955_v45, %v5942_v48  ;;  %v5995_v12 = vpop.f32.mrf.mxu1  ;;  %v9172_v53 = vor.u32 %v10209_v32, %v9171_v23  ;;  %v9339_v48 = vld [vmem:[%s15423_s7 + $0xc90] sm:$0xf]  ;;  %v10251_v34 = vld [vmem:[%s15423_s7 + $0xca8] sm:$0xf0]  ;;  %v9311_v45 = vld [vmem:[%s15423_s7 + $0xc58] sm:$0xf] }
 0x3c6   :  { %6216 = vmatpush.bf16.msra.mxu1 %v9336_v61  ;;  %6301 = vmatpush.bf16.msrb.mxu3 %v8864_v25  ;;  %v5996_v61 = vadd.f32 %v5995_v12, %v5982_v43  ;;  %v5983_v30 = vpop.f32.mrf.mxu0  ;;  %v9340_v23 = vor.u32 %v10251_v34, %v9339_v48  ;;  %v9312_v12 = vor.u32 %v10244_v52, %v9311_v45 }
 0x3c7   :  { %6308 = vmatpush.bf16.msra.mxu0 %v9284_v63  ;;  %v5970_v60 = vadd.f32 %v5969_v42, %v5956_v50  ;;  %v9116_v63 = vor.u32 %v10195_v46, %v9115_v2 }
 0x3c8   :  { %6260 = vmatmul.bf16.vlgmr.msrb.gmra.mxu0 %v12836_v36  ;;  %v8556_v36 = vor.u32 %v10055_v29, %v8555_v28  ;;  %10306 = vtanh.f32 %v5996_v61  ;;  %v9451_v29 = vld [vmem:[%s15423_s7 + $0xd70] sm:$0xf] }
 0x3c9   :  { %6302 = vmatmul.bf16.vlgmr.msrb.gmra.mxu3 %v13133_v44  ;;  %v10048_v44 = vld [vmem:[%s15423_s7 + $0x650] sm:$0xf0]  ;;  %v5984_v8 = vadd.f32 %v5983_v30, %v5970_v60  ;;  %v9452_v3 = vor.u32 %v10279_v31, %v9451_v29 }
 0x3ca   :  { %6217 = vmatpush.bf16.msra.mxu1 %v9308_v54  ;;  %v8528_v57 = vor.u32 %v10048_v44, %v8527_v47  ;;  %v6023_v47 = vpop.f32.mrf.mxu3  ;;  %v9368_v44 = vor.u32 %v10258_v16, %v9367_v41 }
 0x3cb   :  { %6309 = vmatpush.bf16.msra.mxu0 %v9256_v17  ;;  %v8416_v17 = vor.u32 %v10020_v1, %v8415_v7 }
 0x3cc   :  { %v6009_v15 = vpop.f32.mrf.mxu2 }
 0x3cd   :  { %6218 = vmatmul.bf16.vlgmr.msra.gmra.mxu1 %v13445_v55  ;;  %v5997_v54 = vpop.f32.mrf.mxu1  ;;  %v6010_v32 = vadd.f32 %v6009_v15, %v3238_v58 }
 0x3ce   :  { %6266 = vmatpush.bf16.msrb.mxu1 %v8612_v11  ;;  %v10307_v9 = vpop.eup %10306  ;;  %v5998_v25 = vadd.f32 %v5997_v54, %v5984_v8  ;;  %v8444_v11 = vor.u32 %v10027_v35, %v8443_v6 }
 0x3cf   :  { %6310 = vmatpush.bf16.msra.mxu0 %v9228_v38  ;;  %6353 = vst [vmem:[%s15426_s9 + $0x18] sm:$0xff] %v10307_v9  ;;  %v9395_v38 = vld [vmem:[%s15423_s7 + $0xd00] sm:$0xf]  ;;  %v6024_v43 = vadd.f32 %v6023_v47, %v6010_v32 }
 0x3d0   :  { %10308 = vtanh.f32 %v5998_v25 }
 0x3d2   :  { %6267 = vmatpush.bf16.msrb.mxu1 %v8584_v14  ;;  %v9479_v14 = vld [vmem:[%s15423_s7 + $0xda8] sm:$0xf]  ;;  %v6025_v50 = vpop.f32.mrf.mxu3 }
 0x3d3   :  { %6311 = vmatpush.bf16.msra.mxu0 %v9200_v51  ;;  %v9480_v28 = vor.u32 %v10286_v27, %v9479_v14  ;;  %v6037_v51 = vpop.f32.mrf.mxu0 }
 0x3d6   :  { %6268 = vmatpush.bf16.msrb.mxu1 %v8556_v36  ;;  %v10309_v33 = vpop.eup %10308 }
 0x3d7   :  { %6312 = vmatpush.bf16.msra.mxu0 %v9172_v53  ;;  %6361 = vst [vmem:[%s15426_s9 + $0x50] sm:$0xff] %v10309_v33  ;;  %v6038_v53 = vadd.f32 %v6037_v51, %v6024_v43 }
 0x3da   :  { %6269 = vmatpush.bf16.msrb.mxu1 %v8528_v57  ;;  %v6011_v57 = vpop.f32.mrf.mxu2  ;;  %v6079_v59 = vpop.f32.mrf.mxu3 }
 0x3db   :  { %6313 = vmatpush.bf16.msra.mxu0 %v9144_v39  ;;  %v6039_v0 = vpop.f32.mrf.mxu0  ;;  %v6012_v56 = vadd.f32 %v6011_v57, %v3238_v58 }
 0x3dd   :  { %v6026_v42 = vadd.f32 %v6025_v50, %v6012_v56 }
 0x3de   :  { %6270 = vmatpush.bf16.msrb.mxu1 %v8500_v5 }
 0x3df   :  { %6314 = vmatpush.bf16.msra.mxu0 %v9116_v63  ;;  %v6040_v39 = vadd.f32 %v6039_v0, %v6026_v42 }
 0x3e2   :  { %6271 = vmatpush.bf16.msrb.mxu1 %v8472_v4  ;;  %v6065_v5 = vpop.f32.mrf.mxu2  ;;  %v6081_v63 = vpop.f32.mrf.mxu3 }
 0x3e3   :  { %6315 = vmatpush.bf16.msra.mxu0 %v9088_v24  ;;  %v6093_v46 = vpop.f32.mrf.mxu0 }
 0x3e4   :  { %v6051_v49 = vpop.f32.mrf.mxu1 }
 0x3e5   :  { %v6052_v61 = vadd.f32 %v6051_v49, %v6038_v53  ;;  %v3240_v53 = vperm.slane %v15207_v62, 6 }
 0x3e6   :  { %6272 = vmatpush.bf16.msrb.mxu1 %v8444_v11  ;;  %6316 = vmatmul.bf16.vlgmr.msra.gmra.mxu0 %v13297_v20  ;;  %v10272_v20 = vld [vmem:[%s15423_s7 + $0xd50] sm:$0xf0] }
 0x3e7   :  { %v9424_v26 = vor.u32 %v10272_v20, %v9423_v37  ;;  %v6066_v22 = vadd.f32 %v6065_v5, %v6052_v61 }
 0x3e9   :  { %v6080_v4 = vadd.f32 %v6079_v59, %v6066_v22 }
 0x3ea   :  { %6273 = vmatpush.bf16.msrb.mxu1 %v8416_v17  ;;  %v6067_v30 = vpop.f32.mrf.mxu2 }
 0x3eb   :  { %v6094_v6 = vadd.f32 %v6093_v46, %v6080_v4  ;;  %v6095_v25 = vpop.f32.mrf.mxu0 }
 0x3ec   :  { %v6053_v60 = vpop.f32.mrf.mxu1  ;;  %v6135_v10 = vpop.f32.mrf.mxu3 }
 0x3ed   :  { %6274 = vmatmul.bf16.vlgmr.msrb.gmra.mxu1 %v12815_v40  ;;  %v10265_v40 = vld [vmem:[%s15423_s7 + $0xd18] sm:$0xf0]  ;;  %v6054_v2 = vadd.f32 %v6053_v60, %v6040_v39 }
 0x3ee   :  { %6322 = vmatpush.bf16.msra.mxu1 %v9508_v19  ;;  %v9396_v36 = vor.u32 %v10265_v40, %v9395_v38 }
 0x3ef   :  { %v6068_v35 = vadd.f32 %v6067_v30, %v6054_v2 }
 0x3f1   :  { %v6082_v9 = vadd.f32 %v6081_v63, %v6068_v35 }
 0x3f2   :  { %6323 = vmatpush.bf16.msra.mxu1 %v9480_v28  ;;  %v6121_v1 = vpop.f32.mrf.mxu2 }
 0x3f3   :  { %v6096_v11 = vadd.f32 %v6095_v25, %v6082_v9  ;;  %v6122_v19 = vadd.f32 %v6121_v1, %v3239_v21 }
 0x3f4   :  { %v6137_v33 = vpop.f32.mrf.mxu3 }
 0x3f5   :  { %v6136_v27 = vadd.f32 %v6135_v10, %v6122_v19 }
 0x3f6   :  { %6324 = vmatpush.bf16.msra.mxu1 %v9452_v3 }
 0x3fa   :  { %6325 = vmatpush.bf16.msra.mxu1 %v9424_v26  ;;  %v6123_v17 = vpop.f32.mrf.mxu2 }
 0x3fb   :  { %v6124_v37 = vadd.f32 %v6123_v17, %v3239_v21 }
 0x3fd   :  { %v6138_v20 = vadd.f32 %v6137_v33, %v6124_v37 }
 0x3fe   :  { %6326 = vmatpush.bf16.msra.mxu1 %v9396_v36 }
 0x402   :  { %6327 = vmatpush.bf16.msra.mxu1 %v9368_v44 }
 0x403   :  { %v6149_v24 = vpop.f32.mrf.mxu0 }
 0x404   :  { %v6107_v8 = vpop.f32.mrf.mxu1  ;;  %v6150_v28 = vadd.f32 %v6149_v24, %v6136_v27 }
 0x405   :  { %v6108_v54 = vadd.f32 %v6107_v8, %v6094_v6 }
 0x406   :  { %6328 = vmatpush.bf16.msra.mxu1 %v9340_v23  ;;  %v6177_v31 = vpop.f32.mrf.mxu2 }
 0x407   :  { %10310 = vtanh.f32 %v6108_v54 }
 0x40a   :  { %6329 = vmatpush.bf16.msra.mxu1 %v9312_v12 }
 0x40b   :  { %v6151_v3 = vpop.f32.mrf.mxu0 }
 0x40c   :  { %v6109_v13 = vpop.f32.mrf.mxu1  ;;  %v6191_v38 = vpop.f32.mrf.mxu3  ;;  %v6152_v15 = vadd.f32 %v6151_v3, %v6138_v20 }
 0x40d   :  { %6330 = vmatmul.bf16.vlgmr.msra.gmra.mxu1 %v13445_v55  ;;  %v10311_v18 = vpop.eup %10310  ;;  %v6110_v7 = vadd.f32 %v6109_v13, %v6096_v11 }
 0x40e   :  { %6354 = vst [vmem:[%s15426_s9 + $0x20] sm:$0xff] %v10311_v18  ;;  %v6179_v47 = vpop.f32.mrf.mxu2 }
 0x40f   :  { %10312 = vtanh.f32 %v6110_v7 }
 0x414   :  { %v6193_v51 = vpop.f32.mrf.mxu3 }
 0x415   :  { %v10313_v55 = vpop.eup %10312 }
 0x416   :  { %6362 = vst [vmem:[%s15426_s9 + $0x58] sm:$0xff] %v10313_v55 }
 0x425   :  { %v6205_v16 = vpop.f32.mrf.mxu0 }
 0x426   :  { %v6233_v50 = vpop.f32.mrf.mxu2 }
 0x427   :  { %v6234_v0 = vadd.f32 %v6233_v50, %v3240_v53 }
 0x42a   :  { %v6163_v14 = vpop.f32.mrf.mxu1 }
 0x42b   :  { %v6164_v29 = vadd.f32 %v6163_v14, %v6150_v28 }
 0x42c   :  { %v6247_v12 = vpop.f32.mrf.mxu3 }
 0x42d   :  { %v6178_v26 = vadd.f32 %v6177_v31, %v6164_v29  ;;  %v6207_v23 = vpop.f32.mrf.mxu0  ;;  %v6248_v42 = vadd.f32 %v6247_v12, %v6234_v0 }
 0x42e   :  { %v6235_v5 = vpop.f32.mrf.mxu2 }
 0x42f   :  { %v6192_v36 = vadd.f32 %v6191_v38, %v6178_v26  ;;  %v6236_v2 = vadd.f32 %v6235_v5, %v3240_v53 }
 0x431   :  { %v6206_v44 = vadd.f32 %v6205_v16, %v6192_v36 }
 0x432   :  { %v6165_v40 = vpop.f32.mrf.mxu1 }
 0x433   :  { %v6166_v41 = vadd.f32 %v6165_v40, %v6152_v15 }
 0x434   :  { %v6249_v22 = vpop.f32.mrf.mxu3 }
 0x435   :  { %v6180_v58 = vadd.f32 %v6179_v47, %v6166_v41  ;;  %v6250_v46 = vadd.f32 %v6249_v22, %v6236_v2 }
 0x437   :  { %v6194_v57 = vadd.f32 %v6193_v51, %v6180_v58 }
 0x439   :  { %v6208_v32 = vadd.f32 %v6207_v23, %v6194_v57 }
 0x445   :  { %v6261_v61 = vpop.f32.mrf.mxu0 }
 0x446   :  { %v6262_v59 = vadd.f32 %v6261_v61, %v6248_v42  ;;  %v6289_v39 = vpop.f32.mrf.mxu2 }
 0x44a   :  { %v6219_v48 = vpop.f32.mrf.mxu1 }
 0x44b   :  { %v6220_v34 = vadd.f32 %v6219_v48, %v6206_v44 }
 0x44c   :  { %v6303_v6 = vpop.f32.mrf.mxu3 }
 0x44d   :  { %10314 = vtanh.f32 %v6220_v34  ;;  %v6263_v4 = vpop.f32.mrf.mxu0 }
 0x44e   :  { %v6264_v8 = vadd.f32 %v6263_v4, %v6250_v46  ;;  %v6291_v62 = vpop.f32.mrf.mxu2 }
 0x452   :  { %v6221_v45 = vpop.f32.mrf.mxu1 }
 0x453   :  { %v10315_v52 = vpop.eup %10314  ;;  %v6222_v49 = vadd.f32 %v6221_v45, %v6208_v32 }
 0x454   :  { %6355 = vst [vmem:[%s15426_s9 + $0x28] sm:$0xff] %v10315_v52  ;;  %v6305_v7 = vpop.f32.mrf.mxu3 }
 0x455   :  { %10316 = vtanh.f32 %v6222_v49 }
 0x45b   :  { %v10317_v43 = vpop.eup %10316 }
 0x45c   :  { %6363 = vst [vmem:[%s15426_s9 + $0x60] sm:$0xff] %v10317_v43 }
 0x463   :  { %v6317_v9 = vpop.f32.mrf.mxu0 }
 0x46a   :  { %v6275_v56 = vpop.f32.mrf.mxu1 }
 0x46b   :  { %v6276_v60 = vadd.f32 %v6275_v56, %v6262_v59  ;;  %v6319_v1 = vpop.f32.mrf.mxu0 }
 0x46d   :  { %v6290_v30 = vadd.f32 %v6289_v39, %v6276_v60 }
 0x46f   :  { %v6304_v54 = vadd.f32 %v6303_v6, %v6290_v30 }
 0x471   :  { %v6318_v25 = vadd.f32 %v6317_v9, %v6304_v54 }
 0x472   :  { %v6277_v35 = vpop.f32.mrf.mxu1 }
 0x473   :  { %v6278_v63 = vadd.f32 %v6277_v35, %v6264_v8 }
 0x475   :  { %v6292_v11 = vadd.f32 %v6291_v62, %v6278_v63 }
 0x477   :  { %v6306_v55 = vadd.f32 %v6305_v7, %v6292_v11 }
 0x479   :  { %v6320_v10 = vadd.f32 %v6319_v1, %v6306_v55 }
 0x48a   :  { %v6331_v13 = vpop.f32.mrf.mxu1 }
 0x48b   :  { %v6332_v18 = vadd.f32 %v6331_v13, %v6318_v25 }
 0x48d   :  { %10318 = vtanh.f32 %v6332_v18 }
 0x492   :  { %v6333_v21 = vpop.f32.mrf.mxu1 }
 0x493   :  { %v10319_v24 = vpop.eup %10318  ;;  %v6334_v17 = vadd.f32 %v6333_v21, %v6320_v10 }
 0x494   :  { %6357 = vst.msk [vmem:[%s15426_s9 + $0x30] sm:$0xff] %vm6356_vm0, %v10319_v24 }
 0x495   :  { %10320 = vtanh.f32 %v6334_v17 }
 0x49b   :  { %v10321_v19 = vpop.eup %10320 }
 0x49c   :  { %6364 = vst.msk [vmem:[%s15426_s9 + $0x68] sm:$0xff] %vm6356_vm0, %v10321_v19 }

</bundles_post_ra>
